<compile_context>
chip_gen: v6e
topology: v6e:2x2x1
jax: 0.10.0
libtpu: 0.0.40
codegen_flags: <defaults>
</compile_context>

<pallas_src>
import functools
import math

import jax
import jax.numpy as jnp
from jax.experimental import pallas as pl
from jax.experimental.pallas import tpu as pltpu

# ----------------------- small synthetic Whisper config -----------------------
N_MELS = 16        # real Whisper: 80
N_FRAMES = 16      # real Whisper: 3000
D_MODEL = 32
N_HEADS = 4
N_LAYERS = 2
FFN_DIM = 64
LN_EPS = 1e-5
SEQ_LEN = N_FRAMES // 2   # seq len after the stride-2 conv

_SQRT1_2 = 0.7071067811865476


# ------------------------------ in-kernel math --------------------------------
def _erf(x):
    # Abramowitz & Stegun 7.1.26 rational approximation, |err| < 1.5e-7
    # (matches torch.erf-based exact GELU closely without relying on lax.erf
    #  lowering inside Mosaic).
    a1, a2, a3, a4, a5 = 0.254829592, -0.284496736, 1.421413741, -1.453152027, 1.061405429
    p = 0.3275911
    sign = jnp.where(x < 0.0, -1.0, 1.0)
    ax = jnp.abs(x)
    t = 1.0 / (1.0 + p * ax)
    poly = ((((a5 * t + a4) * t + a3) * t + a2) * t + a1) * t
    return sign * (1.0 - poly * jnp.exp(-ax * ax))


def _gelu_exact(x):
    # nn.GELU() / F.gelu(approximate='none') semantics, f32 math.
    return 0.5 * x * (1.0 + _erf(x * _SQRT1_2))


def _layernorm(x, g, b):
    # torch.nn.LayerNorm semantics (biased variance), f32 math.
    mean = jnp.mean(x, axis=-1, keepdims=True)
    var = jnp.mean(jnp.square(x - mean), axis=-1, keepdims=True)
    return (x - mean) * jax.lax.rsqrt(var + LN_EPS) * g + b


_dot = functools.partial(jnp.dot, preferred_element_type=jnp.float32)


# --------------------- kernel 1: fused conv frontend ---------------------------
def _frontend_kernel(x_ref, w1_ref, b1_ref, w2_ref, b2_ref, pos_ref, o_ref):
    """Conv1d(k3,s1,p1)+GELU -> Conv1d(k3,s2,p1)+GELU -> +pos, all in VMEM.

    x_ref:   (B, T, C)   log-mel features (time-major)
    w1_ref:  (3, C, D)   conv1 taps (tap j multiplies x[t+j-1])
    w2_ref:  (3, D, D)   conv2 taps (tap j multiplies h1[2s+j-1])
    o_ref:   (B*S, D)    flattened hidden states (batch folded on sublanes)

    Shifts / stride-2 deinterleave are expressed as 0/1 selection matmuls
    (MXU work) instead of misaligned slices or JAX-side strided gathers; the
    zero rows of the selection matrices implement the conv zero padding.
    """
    bsz, t, _ = x_ref.shape
    s = pos_ref.shape[0]

    # Hoisted (loop-invariant) selection matrices.
    ti = jax.lax.broadcasted_iota(jnp.int32, (t, t), 0)   # output row
    tj = jax.lax.broadcasted_iota(jnp.int32, (t, t), 1)   # input row
    shift_m1 = jnp.where(tj == ti - 1, 1.0, 0.0)          # row t -> x[t-1], row 0 = pad
    shift_p1 = jnp.where(tj == ti + 1, 1.0, 0.0)          # row t -> x[t+1], row T-1 = pad
    si = jax.lax.broadcasted_iota(jnp.int32, (s, t), 0)
    sj = jax.lax.broadcasted_iota(jnp.int32, (s, t), 1)
    sel_m1 = jnp.where(sj == 2 * si - 1, 1.0, 0.0)        # h1[2s-1], row 0 = pad
    sel_0 = jnp.where(sj == 2 * si, 1.0, 0.0)             # h1[2s]
    sel_p1 = jnp.where(sj == 2 * si + 1, 1.0, 0.0)        # h1[2s+1]

    w1_0, w1_1, w1_2 = w1_ref[0], w1_ref[1], w1_ref[2]
    w2_0, w2_1, w2_2 = w2_ref[0], w2_ref[1], w2_ref[2]
    b1 = b1_ref[...]
    b2 = b2_ref[...]
    pos = pos_ref[...]

    for b in range(bsz):                                   # static unroll (B=2)
        x = x_ref[b]                                       # (T, C)
        h1 = _gelu_exact(_dot(_dot(shift_m1, x), w1_0)
                         + _dot(x, w1_1)
                         + _dot(_dot(shift_p1, x), w1_2) + b1)      # (T, D)
        h2 = _gelu_exact(_dot(_dot(sel_m1, h1), w2_0)
                         + _dot(_dot(sel_0, h1), w2_1)
                         + _dot(_dot(sel_p1, h1), w2_2) + b2)       # (S, D)
        o_ref[b * s:(b + 1) * s, :] = (h2 + pos).astype(o_ref.dtype)


def conv_frontend(x_btc, packed):
    """x_btc: [B, T, C] -> flattened hidden states [B*S, D]."""
    bsz = x_btc.shape[0]
    return pl.pallas_call(
        _frontend_kernel,
        out_shape=jax.ShapeDtypeStruct((bsz * SEQ_LEN, D_MODEL), jnp.float32),
    )(x_btc, packed["w1_taps"], packed["b1"], packed["w2_taps"], packed["b2"],
      packed["pos"])


# ------------- kernel 2: fused encoder layers + final LayerNorm ----------------
def _layers_kernel(h0_ref, ln1g_ref, ln1b_ref, wqkv_ref, bqkv_ref, wo_ref, bo_ref,
                   ln2g_ref, ln2b_ref, fc1w_ref, fc1b_ref, fc2w_ref, fc2b_ref,
                   lnfg_ref, lnfb_ref, o_ref, h_scr, ctx_scr,
                   *, n_heads, scale, bsz, seq):
    """One grid step == one encoder layer.  Hidden state lives in h_scr (VMEM)
    across the layer axis; layer weights arrive as [1, ...] slices of the
    stacked [L, ...] arrays.  Output block l holds hidden_states[l+1]; the last
    block is the post-final-LayerNorm output (HF replaces the last entry)."""
    l = pl.program_id(0)
    last = pl.num_programs(0) - 1

    @pl.when(l == 0)
    def _():
        h_scr[...] = h0_ref[...]

    x = h_scr[...]                                    # (B*S, D) batch folded
    d = x.shape[-1]
    dh = d // n_heads

    # ---- self-attention block (pre-LN), packed QKV matmul ----
    y = _layernorm(x, ln1g_ref[0], ln1b_ref[0])
    qkv = _dot(y, wqkv_ref[0]) + bqkv_ref[0]          # (B*S, 3D)
    q = qkv[:, 0:d] * scale                           # HF scales queries once
    k = qkv[:, d:2 * d]
    v = qkv[:, 2 * d:3 * d]
    for b in range(bsz):                              # static unroll (B*H = 8 tiny dots)
        rs = slice(b * seq, (b + 1) * seq)
        for hh in range(n_heads):
            cs = slice(hh * dh, (hh + 1) * dh)
            # scores = q_h @ k_h^T without materializing a transpose
            sc = jax.lax.dot_general(q[rs, cs], k[rs, cs],
                                     (((1,), (1,)), ((), ())),
                                     preferred_element_type=jnp.float32)   # (S, S)
            sc = sc - jnp.max(sc, axis=-1, keepdims=True)
            e = jnp.exp(sc)
            p = e / jnp.sum(e, axis=-1, keepdims=True)      # exact softmax divide
            ctx_scr[rs, cs] = _dot(p, v[rs, cs])            # write head ctx in place
    attn = _dot(ctx_scr[...], wo_ref[0]) + bo_ref[0]
    h1 = x + attn                                            # residual 1

    # ---- feed-forward block (pre-LN) ----
    y2 = _layernorm(h1, ln2g_ref[0], ln2b_ref[0])
    f = _gelu_exact(_dot(y2, fc1w_ref[0]) + fc1b_ref[0])
    f = _dot(f, fc2w_ref[0]) + fc2b_ref[0]
    h_new = h1 + f                                           # residual 2
    h_scr[...] = h_new                                       # carry to next layer

    @pl.when(l != last)
    def _():
        o_ref[0] = h_new.astype(o_ref.dtype)

    @pl.when(l == last)
    def _():
        o_ref[0] = _layernorm(h_new, lnfg_ref[...], lnfb_ref[...]).astype(o_ref.dtype)


def encoder_layers(h0_flat, packed, *, n_heads):
    """h0_flat: [B*S, D]; returns [L, B*S, D] (entry l-1 = hidden_states[l],
    last entry already has the closing LayerNorm applied)."""
    nbs, d = h0_flat.shape
    n_layers = packed["wqkv"].shape[0]
    ffn = packed["fc1_w"].shape[-1]
    bsz = nbs // SEQ_LEN
    scale = float((d // n_heads)) ** -0.5

    def stacked(shape):   # per-layer weight, pick slice l
        return pl.BlockSpec((1,) + shape, lambda l: (l,) + (0,) * len(shape))

    def rep(shape):       # replicated across the layer axis
        return pl.BlockSpec(shape, lambda l: (0,) * len(shape))

    in_specs = [
        rep((nbs, d)),                                 # h0
        stacked((1, d)), stacked((1, d)),              # ln1 g/b
        stacked((d, 3 * d)), stacked((1, 3 * d)),      # wqkv, bqkv
        stacked((d, d)), stacked((1, d)),              # wo, bo
        stacked((1, d)), stacked((1, d)),              # ln2 g/b
        stacked((d, ffn)), stacked((1, ffn)),          # fc1 w/b
        stacked((ffn, d)), stacked((1, d)),            # fc2 w/b
        rep((1, d)), rep((1, d)),                      # final LN g/b
    ]
    out_spec = pl.BlockSpec((1, nbs, d), lambda l: (l, 0, 0))

    return pl.pallas_call(
        functools.partial(_layers_kernel, n_heads=n_heads, scale=scale,
                          bsz=bsz, seq=SEQ_LEN),
        out_shape=jax.ShapeDtypeStruct((n_layers, nbs, d), jnp.float32),
        grid=(n_layers,),
        in_specs=in_specs,
        out_specs=out_spec,
        scratch_shapes=[pltpu.VMEM((nbs, d), jnp.float32),   # resident hidden state
                        pltpu.VMEM((nbs, d), jnp.float32)],  # per-layer attn context
        compiler_params=pltpu.CompilerParams(
            dimension_semantics=("arbitrary",)),   # state carried across layers
    )(h0_flat,
      packed["ln1_g"], packed["ln1_b"], packed["wqkv"], packed["bqkv"],
      packed["wo"], packed["bo"], packed["ln2_g"], packed["ln2_b"],
      packed["fc1_w"], packed["fc1_b"], packed["fc2_w"], packed["fc2_b"],
      packed["lnf_g"], packed["lnf_b"])


# ------------------------------ params & packing -------------------------------
def sinusoidal_positions(length, channels):
    half = channels // 2
    log_timescale_increment = math.log(10000.0) / (half - 1)
    inv_timescales = jnp.exp(-log_timescale_increment * jnp.arange(half, dtype=jnp.float32))
    scaled_time = jnp.arange(length, dtype=jnp.float32)[:, None] * inv_timescales[None, :]
    return jnp.concatenate([jnp.sin(scaled_time), jnp.cos(scaled_time)], axis=1)


def init_params(key):
    """PyTorch-layout parameters (Conv1d weight [out, in, k], Linear as [in, out])."""
    keys = iter(jax.random.split(key, 8 + 16 * N_LAYERS))

    def dense(fan_in, fan_out):
        return jax.random.normal(next(keys), (fan_in, fan_out), jnp.float32) * 0.02

    def bias(n):
        return jax.random.normal(next(keys), (n,), jnp.float32) * 0.02

    params = {
        "conv1_w": jax.random.normal(next(keys), (D_MODEL, N_MELS, 3), jnp.float32) * 0.02,
        "conv1_b": bias(D_MODEL),
        "conv2_w": jax.random.normal(next(keys), (D_MODEL, D_MODEL, 3), jnp.float32) * 0.02,
        "conv2_b": bias(D_MODEL),
        "pos_emb": sinusoidal_positions(SEQ_LEN, D_MODEL),
        "lnf_g": jnp.ones((D_MODEL,), jnp.float32),
        "lnf_b": jnp.zeros((D_MODEL,), jnp.float32),
        "layers": [],
    }
    for _ in range(N_LAYERS):
        params["layers"].append({
            "ln1_g": jnp.ones((D_MODEL,), jnp.float32),
            "ln1_b": jnp.zeros((D_MODEL,), jnp.float32),
            "wq": dense(D_MODEL, D_MODEL), "bq": bias(D_MODEL),
            "wk": dense(D_MODEL, D_MODEL),                      # Whisper k_proj has no bias
            "wv": dense(D_MODEL, D_MODEL), "bv": bias(D_MODEL),
            "wo": dense(D_MODEL, D_MODEL), "bo": bias(D_MODEL),
            "ln2_g": jnp.ones((D_MODEL,), jnp.float32),
            "ln2_b": jnp.zeros((D_MODEL,), jnp.float32),
            "fc1_w": dense(D_MODEL, FFN_DIM), "fc1_b": bias(FFN_DIM),
            "fc2_w": dense(FFN_DIM, D_MODEL), "fc2_b": bias(D_MODEL),
        })
    return params


def pack_params(params):
    """One-time packing: conv tap stacks, packed QKV, per-layer [L, ...] stacks.
    Runs once outside the jitted forward, so no per-call concat/transpose ops."""
    layers = params["layers"]
    zero_b = jnp.zeros((D_MODEL,), jnp.float32)

    def stack(key):
        return jnp.stack([lyr[key] for lyr in layers], axis=0)

    def stack_bias(key):
        return jnp.stack([lyr[key] for lyr in layers], axis=0)[:, None, :]

    wqkv = jnp.stack(
        [jnp.concatenate([l["wq"], l["wk"], l["wv"]], axis=1) for l in layers], axis=0)
    bqkv = jnp.stack(
        [jnp.concatenate([l["bq"], zero_b, l["bv"]], axis=0) for l in layers], axis=0)[:, None, :]

    return {
        "w1_taps": jnp.stack([params["conv1_w"][:, :, j].T for j in range(3)], axis=0),
        "b1": params["conv1_b"].reshape(1, D_MODEL),
        "w2_taps": jnp.stack([params["conv2_w"][:, :, j].T for j in range(3)], axis=0),
        "b2": params["conv2_b"].reshape(1, D_MODEL),
        "pos": params["pos_emb"],
        "ln1_g": stack_bias("ln1_g"), "ln1_b": stack_bias("ln1_b"),
        "wqkv": wqkv, "bqkv": bqkv,
        "wo": stack("wo"), "bo": stack_bias("bo"),
        "ln2_g": stack_bias("ln2_g"), "ln2_b": stack_bias("ln2_b"),
        "fc1_w": stack("fc1_w"), "fc1_b": stack_bias("fc1_b"),
        "fc2_w": stack("fc2_w"), "fc2_b": stack_bias("fc2_b"),
        "lnf_g": params["lnf_g"].reshape(1, D_MODEL),
        "lnf_b": params["lnf_b"].reshape(1, D_MODEL),
    }


# --------------------------------- forward -------------------------------------
def whisper_encoder_forward(packed, features, middle_layer=-1):
    """Mirrors WhisperEncoder(..., output_hidden_states=True)['hidden_states'][middle_layer].
    features: [B, n_mels, T] (PyTorch Conv1d NCL layout)."""
    bsz = features.shape[0]
    x_btc = jnp.transpose(features, (0, 2, 1))                # [B, T, n_mels]
    h0 = conv_frontend(x_btc, packed)                         # [B*S, D]  (pallas_call #1)
    hs = encoder_layers(h0, packed, n_heads=N_HEADS)          # [L, B*S, D] (pallas_call #2)
    # hidden_states = [h0, h1, ..., h_{L-1}, final_LN(h_L)]
    idx = middle_layer % (N_LAYERS + 1)
    sel = h0 if idx == 0 else hs[idx - 1]
    return sel.reshape(bsz, SEQ_LEN, D_MODEL)


if __name__ == "__main__":
    key = jax.random.PRNGKey(0)
    pkey, fkey = jax.random.split(key)
    params = init_params(pkey)
    packed = pack_params(params)   # one-time weight packing

    # Precomputed log-mel features (see TODO(synk) at top about the STFT frontend).
    features = jax.random.normal(fkey, (2, N_MELS, N_FRAMES), jnp.float32)

    fwd = jax.jit(whisper_encoder_forward, static_argnames=("middle_layer",))
    out = fwd(packed, features, middle_layer=-1)
    out = jax.block_until_ready(out)
    assert out.shape == (2, SEQ_LEN, D_MODEL), out.shape
    assert bool(jnp.all(jnp.isfinite(out)))
    print("KERNEL_OK")
</pallas_src>

<mosaic_0001>
module attributes {stable_mosaic.version = 11 : i64} {
  func.func @_layers_kernel(%arg0: i32, %arg1: memref<16x32xf32, #tpu.memory_space<vmem>>, %arg2: memref<1x1x32xf32, #tpu.memory_space<vmem>>, %arg3: memref<1x1x32xf32, #tpu.memory_space<vmem>>, %arg4: memref<1x32x96xf32, #tpu.memory_space<vmem>>, %arg5: memref<1x1x96xf32, #tpu.memory_space<vmem>>, %arg6: memref<1x32x32xf32, #tpu.memory_space<vmem>>, %arg7: memref<1x1x32xf32, #tpu.memory_space<vmem>>, %arg8: memref<1x1x32xf32, #tpu.memory_space<vmem>>, %arg9: memref<1x1x32xf32, #tpu.memory_space<vmem>>, %arg10: memref<1x32x64xf32, #tpu.memory_space<vmem>>, %arg11: memref<1x1x64xf32, #tpu.memory_space<vmem>>, %arg12: memref<1x64x32xf32, #tpu.memory_space<vmem>>, %arg13: memref<1x1x32xf32, #tpu.memory_space<vmem>>, %arg14: memref<1x32xf32, #tpu.memory_space<vmem>>, %arg15: memref<1x32xf32, #tpu.memory_space<vmem>>, %arg16: memref<1x16x32xf32, #tpu.memory_space<vmem>>, %arg17: memref<16x32xf32, #tpu.memory_space<vmem>>, %arg18: memref<16x32xf32, #tpu.memory_space<vmem>>) attributes {dimension_semantics = [#tpu.dimension_semantics<arbitrary>], iteration_bounds = array<i64: 2>, scalar_prefetch = 0 : i64, scratch_operands = 2 : i64, tpu.core_type = #tpu.core_type<tc>, window_params = [{pipeline_mode = #tpu.pipeline_mode<synchronous>, transform_indices = @transform_0, window_bounds = array<i64: 16, 32>}, {transform_indices = @transform_1, window_bounds = array<i64: 1, 1, 32>}, {transform_indices = @transform_2, window_bounds = array<i64: 1, 1, 32>}, {transform_indices = @transform_3, window_bounds = array<i64: 1, 32, 96>}, {transform_indices = @transform_4, window_bounds = array<i64: 1, 1, 96>}, {transform_indices = @transform_5, window_bounds = array<i64: 1, 32, 32>}, {transform_indices = @transform_6, window_bounds = array<i64: 1, 1, 32>}, {transform_indices = @transform_7, window_bounds = array<i64: 1, 1, 32>}, {transform_indices = @transform_8, window_bounds = array<i64: 1, 1, 32>}, {transform_indices = @transform_9, window_bounds = array<i64: 1, 32, 64>}, {transform_indices = @transform_10, window_bounds = array<i64: 1, 1, 64>}, {transform_indices = @transform_11, window_bounds = array<i64: 1, 64, 32>}, {transform_indices = @transform_12, window_bounds = array<i64: 1, 1, 32>}, {pipeline_mode = #tpu.pipeline_mode<synchronous>, transform_indices = @transform_13, window_bounds = array<i64: 1, 32>}, {pipeline_mode = #tpu.pipeline_mode<synchronous>, transform_indices = @transform_14, window_bounds = array<i64: 1, 32>}, {transform_indices = @transform_15, window_bounds = array<i64: 1, 16, 32>}]} {
    %c0_i32 = arith.constant 0 : i32
    %0 = arith.cmpi eq, %arg0, %c0_i32 : i32
    %1 = arith.extui %0 : i1 to i32
    %c0_i32_0 = arith.constant 0 : i32
    %2 = arith.cmpi ne, %1, %c0_i32_0 : i32
    scf.if %2 {
      %c0_120 = arith.constant 0 : index
      %c0_121 = arith.constant 0 : index
      %260 = vector.load %arg1[%c0_120, %c0_121] : memref<16x32xf32, #tpu.memory_space<vmem>>, vector<16x32xf32>
      %c0_122 = arith.constant 0 : index
      %c0_123 = arith.constant 0 : index
      %261 = vector.load %arg17[%c0_122, %c0_123] : memref<16x32xf32, #tpu.memory_space<vmem>>, vector<16x32xf32>
      tpu.vector_store %arg17[%c0_122, %c0_123], %260 {strides = array<i32>} : memref<16x32xf32, #tpu.memory_space<vmem>>, vector<16x32xf32>,
    } else {
    }
    %c0 = arith.constant 0 : index
    %c0_1 = arith.constant 0 : index
    %3 = vector.load %arg17[%c0, %c0_1] : memref<16x32xf32, #tpu.memory_space<vmem>>, vector<16x32xf32>
    %c0_2 = arith.constant 0 : index
    %c0_3 = arith.constant 0 : index
    %c0_4 = arith.constant 0 : index
    %4 = vector.load %arg2[%c0_2, %c0_3, %c0_4] : memref<1x1x32xf32, #tpu.memory_space<vmem>>, vector<1x1x32xf32>
    %5 = vector.shape_cast %4 : vector<1x1x32xf32> to vector<1x32xf32>
    %c0_5 = arith.constant 0 : index
    %c0_6 = arith.constant 0 : index
    %c0_7 = arith.constant 0 : index
    %6 = vector.load %arg3[%c0_5, %c0_6, %c0_7] : memref<1x1x32xf32, #tpu.memory_space<vmem>>, vector<1x1x32xf32>
    %7 = vector.shape_cast %6 : vector<1x1x32xf32> to vector<1x32xf32>
    %cst = arith.constant dense<0.000000e+00> : vector<16xf32>
    %8 = vector.multi_reduction <add>, %3, %cst [1] : vector<16x32xf32> to vector<16xf32>
    %9 = vector.shape_cast %8 : vector<16xf32> to vector<16x1xf32>
    %cst_8 = arith.constant 3.200000e+01 : f32
    %10 = vector.broadcast %cst_8 : f32 to vector<16x1xf32>
    %11 = arith.divf %9, %10 : vector<16x1xf32>
    %12 = vector.broadcast %11 : vector<16x1xf32> to vector<16x32xf32>
    %13 = arith.subf %3, %12 : vector<16x32xf32>
    %14 = arith.mulf %13, %13 : vector<16x32xf32>
    %cst_9 = arith.constant dense<0.000000e+00> : vector<16xf32>
    %15 = vector.multi_reduction <add>, %14, %cst_9 [1] : vector<16x32xf32> to vector<16xf32>
    %16 = vector.shape_cast %15 : vector<16xf32> to vector<16x1xf32>
    %cst_10 = arith.constant 3.200000e+01 : f32
    %17 = vector.broadcast %cst_10 : f32 to vector<16x1xf32>
    %18 = arith.divf %16, %17 : vector<16x1xf32>
    %19 = vector.broadcast %11 : vector<16x1xf32> to vector<16x32xf32>
    %20 = arith.subf %3, %19 : vector<16x32xf32>
    %cst_11 = arith.constant 9.99999974E-6 : f32
    %21 = vector.broadcast %cst_11 : f32 to vector<16x1xf32>
    %22 = arith.addf %18, %21 : vector<16x1xf32>
    %23 = math.rsqrt %22 : vector<16x1xf32>
    %24 = vector.broadcast %23 : vector<16x1xf32> to vector<16x32xf32>
    %25 = arith.mulf %20, %24 : vector<16x32xf32>
    %26 = vector.broadcast %5 : vector<1x32xf32> to vector<16x32xf32>
    %27 = arith.mulf %25, %26 : vector<16x32xf32>
    %28 = vector.broadcast %7 : vector<1x32xf32> to vector<16x32xf32>
    %29 = arith.addf %27, %28 : vector<16x32xf32>
    %c0_12 = arith.constant 0 : index
    %c0_13 = arith.constant 0 : index
    %c0_14 = arith.constant 0 : index
    %30 = vector.load %arg4[%c0_12, %c0_13, %c0_14] : memref<1x32x96xf32, #tpu.memory_space<vmem>>, vector<1x32x96xf32>
    %31 = vector.shape_cast %30 : vector<1x32x96xf32> to vector<32x96xf32>
    %cst_15 = arith.constant dense<0.000000e+00> : vector<16x96xf32>
    %32 = tpu.matmul %29, %31, %cst_15 {dimension_numbers = #tpu.dot_dimension_numbers<[1], [0], [0], [1], [0, 0, 1, 1], [], []>} : vector<16x32xf32>, vector<32x96xf32>, vector<16x96xf32> -> vector<16x96xf32>
    %c0_16 = arith.constant 0 : index
    %c0_17 = arith.constant 0 : index
    %c0_18 = arith.constant 0 : index
    %33 = vector.load %arg5[%c0_16, %c0_17, %c0_18] : memref<1x1x96xf32, #tpu.memory_space<vmem>>, vector<1x1x96xf32>
    %34 = vector.shape_cast %33 : vector<1x1x96xf32> to vector<1x96xf32>
    %35 = vector.broadcast %34 : vector<1x96xf32> to vector<16x96xf32>
    %36 = arith.addf %32, %35 : vector<16x96xf32>
    %37 = vector.extract_strided_slice %36 {offsets = [0, 0], sizes = [16, 32], strides = [1, 1]} : vector<16x96xf32> to vector<16x32xf32>
    %cst_19 = arith.constant 0.353553385 : f32
    %38 = vector.broadcast %cst_19 : f32 to vector<16x32xf32>
    %39 = arith.mulf %37, %38 : vector<16x32xf32>
    %40 = vector.extract_strided_slice %36 {offsets = [0, 32], sizes = [16, 32], strides = [1, 1]} : vector<16x96xf32> to vector<16x32xf32>
    %41 = vector.extract_strided_slice %36 {offsets = [0, 64], sizes = [16, 32], strides = [1, 1]} : vector<16x96xf32> to vector<16x32xf32>
    %42 = vector.extract_strided_slice %39 {offsets = [0, 0], sizes = [8, 8], strides = [1, 1]} : vector<16x32xf32> to vector<8x8xf32>
    %43 = vector.extract_strided_slice %40 {offsets = [0, 0], sizes = [8, 8], strides = [1, 1]} : vector<16x32xf32> to vector<8x8xf32>
    %cst_20 = arith.constant dense<0.000000e+00> : vector<8x8xf32>
    %44 = tpu.matmul %42, %43, %cst_20 {dimension_numbers = #tpu.dot_dimension_numbers<[1], [1], [0], [0], [0, 0, 1, 0], [], []>} : vector<8x8xf32>, vector<8x8xf32>, vector<8x8xf32> -> vector<8x8xf32>
    %cst_21 = arith.constant dense<0xFF800000> : vector<8xf32>
    %45 = vector.multi_reduction <maximumf>, %44, %cst_21 [1] : vector<8x8xf32> to vector<8xf32>
    %46 = vector.shape_cast %45 : vector<8xf32> to vector<8x1xf32>
    %47 = vector.broadcast %46 : vector<8x1xf32> to vector<8x8xf32>
    %48 = arith.subf %44, %47 : vector<8x8xf32>
    %49 = math.exp %48 : vector<8x8xf32>
    %cst_22 = arith.constant dense<0.000000e+00> : vector<8xf32>
    %50 = vector.multi_reduction <add>, %49, %cst_22 [1] : vector<8x8xf32> to vector<8xf32>
    %51 = vector.shape_cast %50 : vector<8xf32> to vector<8x1xf32>
    %52 = vector.broadcast %51 : vector<8x1xf32> to vector<8x8xf32>
    %53 = arith.divf %49, %52 : vector<8x8xf32>
    %54 = vector.extract_strided_slice %41 {offsets = [0, 0], sizes = [8, 8], strides = [1, 1]} : vector<16x32xf32> to vector<8x8xf32>
    %cst_23 = arith.constant dense<0.000000e+00> : vector<8x8xf32>
    %55 = tpu.matmul %53, %54, %cst_23 {dimension_numbers = #tpu.dot_dimension_numbers<[1], [0], [0], [1], [0, 0, 1, 1], [], []>} : vector<8x8xf32>, vector<8x8xf32>, vector<8x8xf32> -> vector<8x8xf32>
    %c0_24 = arith.constant 0 : index
    %c0_25 = arith.constant 0 : index
    %56 = vector.load %arg18[%c0_24, %c0_25] : memref<16x32xf32, #tpu.memory_space<vmem>>, vector<8x8xf32>
    tpu.vector_store %arg18[%c0_24, %c0_25], %55 {strides = array<i32>} : memref<16x32xf32, #tpu.memory_space<vmem>>, vector<8x8xf32>,
    %57 = vector.extract_strided_slice %39 {offsets = [0, 8], sizes = [8, 8], strides = [1, 1]} : vector<16x32xf32> to vector<8x8xf32>
    %58 = vector.extract_strided_slice %40 {offsets = [0, 8], sizes = [8, 8], strides = [1, 1]} : vector<16x32xf32> to vector<8x8xf32>
    %cst_26 = arith.constant dense<0.000000e+00> : vector<8x8xf32>
    %59 = tpu.matmul %57, %58, %cst_26 {dimension_numbers = #tpu.dot_dimension_numbers<[1], [1], [0], [0], [0, 0, 1, 0], [], []>} : vector<8x8xf32>, vector<8x8xf32>, vector<8x8xf32> -> vector<8x8xf32>
    %cst_27 = arith.constant dense<0xFF800000> : vector<8xf32>
    %60 = vector.multi_reduction <maximumf>, %59, %cst_27 [1] : vector<8x8xf32> to vector<8xf32>
    %61 = vector.shape_cast %60 : vector<8xf32> to vector<8x1xf32>
    %62 = vector.broadcast %61 : vector<8x1xf32> to vector<8x8xf32>
    %63 = arith.subf %59, %62 : vector<8x8xf32>
    %64 = math.exp %63 : vector<8x8xf32>
    %cst_28 = arith.constant dense<0.000000e+00> : vector<8xf32>
    %65 = vector.multi_reduction <add>, %64, %cst_28 [1] : vector<8x8xf32> to vector<8xf32>
    %66 = vector.shape_cast %65 : vector<8xf32> to vector<8x1xf32>
    %67 = vector.broadcast %66 : vector<8x1xf32> to vector<8x8xf32>
    %68 = arith.divf %64, %67 : vector<8x8xf32>
    %69 = vector.extract_strided_slice %41 {offsets = [0, 8], sizes = [8, 8], strides = [1, 1]} : vector<16x32xf32> to vector<8x8xf32>
    %cst_29 = arith.constant dense<0.000000e+00> : vector<8x8xf32>
    %70 = tpu.matmul %68, %69, %cst_29 {dimension_numbers = #tpu.dot_dimension_numbers<[1], [0], [0], [1], [0, 0, 1, 1], [], []>} : vector<8x8xf32>, vector<8x8xf32>, vector<8x8xf32> -> vector<8x8xf32>
    %c0_30 = arith.constant 0 : index
    %c8 = arith.constant 8 : index
    %71 = vector.load %arg18[%c0_30, %c8] : memref<16x32xf32, #tpu.memory_space<vmem>>, vector<8x8xf32>
    tpu.vector_store %arg18[%c0_30, %c8], %70 {strides = array<i32>} : memref<16x32xf32, #tpu.memory_space<vmem>>, vector<8x8xf32>,
    %72 = vector.extract_strided_slice %39 {offsets = [0, 16], sizes = [8, 8], strides = [1, 1]} : vector<16x32xf32> to vector<8x8xf32>
    %73 = vector.extract_strided_slice %40 {offsets = [0, 16], sizes = [8, 8], strides = [1, 1]} : vector<16x32xf32> to vector<8x8xf32>
    %cst_31 = arith.constant dense<0.000000e+00> : vector<8x8xf32>
    %74 = tpu.matmul %72, %73, %cst_31 {dimension_numbers = #tpu.dot_dimension_numbers<[1], [1], [0], [0], [0, 0, 1, 0], [], []>} : vector<8x8xf32>, vector<8x8xf32>, vector<8x8xf32> -> vector<8x8xf32>
    %cst_32 = arith.constant dense<0xFF800000> : vector<8xf32>
    %75 = vector.multi_reduction <maximumf>, %74, %cst_32 [1] : vector<8x8xf32> to vector<8xf32>
    %76 = vector.shape_cast %75 : vector<8xf32> to vector<8x1xf32>
    %77 = vector.broadcast %76 : vector<8x1xf32> to vector<8x8xf32>
    %78 = arith.subf %74, %77 : vector<8x8xf32>
    %79 = math.exp %78 : vector<8x8xf32>
    %cst_33 = arith.constant dense<0.000000e+00> : vector<8xf32>
    %80 = vector.multi_reduction <add>, %79, %cst_33 [1] : vector<8x8xf32> to vector<8xf32>
    %81 = vector.shape_cast %80 : vector<8xf32> to vector<8x1xf32>
    %82 = vector.broadcast %81 : vector<8x1xf32> to vector<8x8xf32>
    %83 = arith.divf %79, %82 : vector<8x8xf32>
    %84 = vector.extract_strided_slice %41 {offsets = [0, 16], sizes = [8, 8], strides = [1, 1]} : vector<16x32xf32> to vector<8x8xf32>
    %cst_34 = arith.constant dense<0.000000e+00> : vector<8x8xf32>
    %85 = tpu.matmul %83, %84, %cst_34 {dimension_numbers = #tpu.dot_dimension_numbers<[1], [0], [0], [1], [0, 0, 1, 1], [], []>} : vector<8x8xf32>, vector<8x8xf32>, vector<8x8xf32> -> vector<8x8xf32>
    %c0_35 = arith.constant 0 : index
    %c16 = arith.constant 16 : index
    %86 = vector.load %arg18[%c0_35, %c16] : memref<16x32xf32, #tpu.memory_space<vmem>>, vector<8x8xf32>
    tpu.vector_store %arg18[%c0_35, %c16], %85 {strides = array<i32>} : memref<16x32xf32, #tpu.memory_space<vmem>>, vector<8x8xf32>,
    %87 = vector.extract_strided_slice %39 {offsets = [0, 24], sizes = [8, 8], strides = [1, 1]} : vector<16x32xf32> to vector<8x8xf32>
    %88 = vector.extract_strided_slice %40 {offsets = [0, 24], sizes = [8, 8], strides = [1, 1]} : vector<16x32xf32> to vector<8x8xf32>
    %cst_36 = arith.constant dense<0.000000e+00> : vector<8x8xf32>
    %89 = tpu.matmul %87, %88, %cst_36 {dimension_numbers = #tpu.dot_dimension_numbers<[1], [1], [0], [0], [0, 0, 1, 0], [], []>} : vector<8x8xf32>, vector<8x8xf32>, vector<8x8xf32> -> vector<8x8xf32>
    %cst_37 = arith.constant dense<0xFF800000> : vector<8xf32>
    %90 = vector.multi_reduction <maximumf>, %89, %cst_37 [1] : vector<8x8xf32> to vector<8xf32>
    %91 = vector.shape_cast %90 : vector<8xf32> to vector<8x1xf32>
    %92 = vector.broadcast %91 : vector<8x1xf32> to vector<8x8xf32>
    %93 = arith.subf %89, %92 : vector<8x8xf32>
    %94 = math.exp %93 : vector<8x8xf32>
    %cst_38 = arith.constant dense<0.000000e+00> : vector<8xf32>
    %95 = vector.multi_reduction <add>, %94, %cst_38 [1] : vector<8x8xf32> to vector<8xf32>
    %96 = vector.shape_cast %95 : vector<8xf32> to vector<8x1xf32>
    %97 = vector.broadcast %96 : vector<8x1xf32> to vector<8x8xf32>
    %98 = arith.divf %94, %97 : vector<8x8xf32>
    %99 = vector.extract_strided_slice %41 {offsets = [0, 24], sizes = [8, 8], strides = [1, 1]} : vector<16x32xf32> to vector<8x8xf32>
    %cst_39 = arith.constant dense<0.000000e+00> : vector<8x8xf32>
    %100 = tpu.matmul %98, %99, %cst_39 {dimension_numbers = #tpu.dot_dimension_numbers<[1], [0], [0], [1], [0, 0, 1, 1], [], []>} : vector<8x8xf32>, vector<8x8xf32>, vector<8x8xf32> -> vector<8x8xf32>
    %c0_40 = arith.constant 0 : index
    %c24 = arith.constant 24 : index
    %101 = vector.load %arg18[%c0_40, %c24] : memref<16x32xf32, #tpu.memory_space<vmem>>, vector<8x8xf32>
    tpu.vector_store %arg18[%c0_40, %c24], %100 {strides = array<i32>} : memref<16x32xf32, #tpu.memory_space<vmem>>, vector<8x8xf32>,
    %102 = vector.extract_strided_slice %39 {offsets = [8, 0], sizes = [8, 8], strides = [1, 1]} : vector<16x32xf32> to vector<8x8xf32>
    %103 = vector.extract_strided_slice %40 {offsets = [8, 0], sizes = [8, 8], strides = [1, 1]} : vector<16x32xf32> to vector<8x8xf32>
    %cst_41 = arith.constant dense<0.000000e+00> : vector<8x8xf32>
    %104 = tpu.matmul %102, %103, %cst_41 {dimension_numbers = #tpu.dot_dimension_numbers<[1], [1], [0], [0], [0, 0, 1, 0], [], []>} : vector<8x8xf32>, vector<8x8xf32>, vector<8x8xf32> -> vector<8x8xf32>
    %cst_42 = arith.constant dense<0xFF800000> : vector<8xf32>
    %105 = vector.multi_reduction <maximumf>, %104, %cst_42 [1] : vector<8x8xf32> to vector<8xf32>
    %106 = vector.shape_cast %105 : vector<8xf32> to vector<8x1xf32>
    %107 = vector.broadcast %106 : vector<8x1xf32> to vector<8x8xf32>
    %108 = arith.subf %104, %107 : vector<8x8xf32>
    %109 = math.exp %108 : vector<8x8xf32>
    %cst_43 = arith.constant dense<0.000000e+00> : vector<8xf32>
    %110 = vector.multi_reduction <add>, %109, %cst_43 [1] : vector<8x8xf32> to vector<8xf32>
    %111 = vector.shape_cast %110 : vector<8xf32> to vector<8x1xf32>
    %112 = vector.broadcast %111 : vector<8x1xf32> to vector<8x8xf32>
    %113 = arith.divf %109, %112 : vector<8x8xf32>
    %114 = vector.extract_strided_slice %41 {offsets = [8, 0], sizes = [8, 8], strides = [1, 1]} : vector<16x32xf32> to vector<8x8xf32>
    %cst_44 = arith.constant dense<0.000000e+00> : vector<8x8xf32>
    %115 = tpu.matmul %113, %114, %cst_44 {dimension_numbers = #tpu.dot_dimension_numbers<[1], [0], [0], [1], [0, 0, 1, 1], [], []>} : vector<8x8xf32>, vector<8x8xf32>, vector<8x8xf32> -> vector<8x8xf32>
    %c8_45 = arith.constant 8 : index
    %c0_46 = arith.constant 0 : index
    %116 = vector.load %arg18[%c8_45, %c0_46] : memref<16x32xf32, #tpu.memory_space<vmem>>, vector<8x8xf32>
    tpu.vector_store %arg18[%c8_45, %c0_46], %115 {strides = array<i32>} : memref<16x32xf32, #tpu.memory_space<vmem>>, vector<8x8xf32>,
    %117 = vector.extract_strided_slice %39 {offsets = [8, 8], sizes = [8, 8], strides = [1, 1]} : vector<16x32xf32> to vector<8x8xf32>
    %118 = vector.extract_strided_slice %40 {offsets = [8, 8], sizes = [8, 8], strides = [1, 1]} : vector<16x32xf32> to vector<8x8xf32>
    %cst_47 = arith.constant dense<0.000000e+00> : vector<8x8xf32>
    %119 = tpu.matmul %117, %118, %cst_47 {dimension_numbers = #tpu.dot_dimension_numbers<[1], [1], [0], [0], [0, 0, 1, 0], [], []>} : vector<8x8xf32>, vector<8x8xf32>, vector<8x8xf32> -> vector<8x8xf32>
    %cst_48 = arith.constant dense<0xFF800000> : vector<8xf32>
    %120 = vector.multi_reduction <maximumf>, %119, %cst_48 [1] : vector<8x8xf32> to vector<8xf32>
    %121 = vector.shape_cast %120 : vector<8xf32> to vector<8x1xf32>
    %122 = vector.broadcast %121 : vector<8x1xf32> to vector<8x8xf32>
    %123 = arith.subf %119, %122 : vector<8x8xf32>
    %124 = math.exp %123 : vector<8x8xf32>
    %cst_49 = arith.constant dense<0.000000e+00> : vector<8xf32>
    %125 = vector.multi_reduction <add>, %124, %cst_49 [1] : vector<8x8xf32> to vector<8xf32>
    %126 = vector.shape_cast %125 : vector<8xf32> to vector<8x1xf32>
    %127 = vector.broadcast %126 : vector<8x1xf32> to vector<8x8xf32>
    %128 = arith.divf %124, %127 : vector<8x8xf32>
    %129 = vector.extract_strided_slice %41 {offsets = [8, 8], sizes = [8, 8], strides = [1, 1]} : vector<16x32xf32> to vector<8x8xf32>
    %cst_50 = arith.constant dense<0.000000e+00> : vector<8x8xf32>
    %130 = tpu.matmul %128, %129, %cst_50 {dimension_numbers = #tpu.dot_dimension_numbers<[1], [0], [0], [1], [0, 0, 1, 1], [], []>} : vector<8x8xf32>, vector<8x8xf32>, vector<8x8xf32> -> vector<8x8xf32>
    %c8_51 = arith.constant 8 : index
    %c8_52 = arith.constant 8 : index
    %131 = vector.load %arg18[%c8_51, %c8_52] : memref<16x32xf32, #tpu.memory_space<vmem>>, vector<8x8xf32>
    tpu.vector_store %arg18[%c8_51, %c8_52], %130 {strides = array<i32>} : memref<16x32xf32, #tpu.memory_space<vmem>>, vector<8x8xf32>,
    %132 = vector.extract_strided_slice %39 {offsets = [8, 16], sizes = [8, 8], strides = [1, 1]} : vector<16x32xf32> to vector<8x8xf32>
    %133 = vector.extract_strided_slice %40 {offsets = [8, 16], sizes = [8, 8], strides = [1, 1]} : vector<16x32xf32> to vector<8x8xf32>
    %cst_53 = arith.constant dense<0.000000e+00> : vector<8x8xf32>
    %134 = tpu.matmul %132, %133, %cst_53 {dimension_numbers = #tpu.dot_dimension_numbers<[1], [1], [0], [0], [0, 0, 1, 0], [], []>} : vector<8x8xf32>, vector<8x8xf32>, vector<8x8xf32> -> vector<8x8xf32>
    %cst_54 = arith.constant dense<0xFF800000> : vector<8xf32>
    %135 = vector.multi_reduction <maximumf>, %134, %cst_54 [1] : vector<8x8xf32> to vector<8xf32>
    %136 = vector.shape_cast %135 : vector<8xf32> to vector<8x1xf32>
    %137 = vector.broadcast %136 : vector<8x1xf32> to vector<8x8xf32>
    %138 = arith.subf %134, %137 : vector<8x8xf32>
    %139 = math.exp %138 : vector<8x8xf32>
    %cst_55 = arith.constant dense<0.000000e+00> : vector<8xf32>
    %140 = vector.multi_reduction <add>, %139, %cst_55 [1] : vector<8x8xf32> to vector<8xf32>
    %141 = vector.shape_cast %140 : vector<8xf32> to vector<8x1xf32>
    %142 = vector.broadcast %141 : vector<8x1xf32> to vector<8x8xf32>
    %143 = arith.divf %139, %142 : vector<8x8xf32>
    %144 = vector.extract_strided_slice %41 {offsets = [8, 16], sizes = [8, 8], strides = [1, 1]} : vector<16x32xf32> to vector<8x8xf32>
    %cst_56 = arith.constant dense<0.000000e+00> : vector<8x8xf32>
    %145 = tpu.matmul %143, %144, %cst_56 {dimension_numbers = #tpu.dot_dimension_numbers<[1], [0], [0], [1], [0, 0, 1, 1], [], []>} : vector<8x8xf32>, vector<8x8xf32>, vector<8x8xf32> -> vector<8x8xf32>
    %c8_57 = arith.constant 8 : index
    %c16_58 = arith.constant 16 : index
    %146 = vector.load %arg18[%c8_57, %c16_58] : memref<16x32xf32, #tpu.memory_space<vmem>>, vector<8x8xf32>
    tpu.vector_store %arg18[%c8_57, %c16_58], %145 {strides = array<i32>} : memref<16x32xf32, #tpu.memory_space<vmem>>, vector<8x8xf32>,
    %147 = vector.extract_strided_slice %39 {offsets = [8, 24], sizes = [8, 8], strides = [1, 1]} : vector<16x32xf32> to vector<8x8xf32>
    %148 = vector.extract_strided_slice %40 {offsets = [8, 24], sizes = [8, 8], strides = [1, 1]} : vector<16x32xf32> to vector<8x8xf32>
    %cst_59 = arith.constant dense<0.000000e+00> : vector<8x8xf32>
    %149 = tpu.matmul %147, %148, %cst_59 {dimension_numbers = #tpu.dot_dimension_numbers<[1], [1], [0], [0], [0, 0, 1, 0], [], []>} : vector<8x8xf32>, vector<8x8xf32>, vector<8x8xf32> -> vector<8x8xf32>
    %cst_60 = arith.constant dense<0xFF800000> : vector<8xf32>
    %150 = vector.multi_reduction <maximumf>, %149, %cst_60 [1] : vector<8x8xf32> to vector<8xf32>
    %151 = vector.shape_cast %150 : vector<8xf32> to vector<8x1xf32>
    %152 = vector.broadcast %151 : vector<8x1xf32> to vector<8x8xf32>
    %153 = arith.subf %149, %152 : vector<8x8xf32>
    %154 = math.exp %153 : vector<8x8xf32>
    %cst_61 = arith.constant dense<0.000000e+00> : vector<8xf32>
    %155 = vector.multi_reduction <add>, %154, %cst_61 [1] : vector<8x8xf32> to vector<8xf32>
    %156 = vector.shape_cast %155 : vector<8xf32> to vector<8x1xf32>
    %157 = vector.broadcast %156 : vector<8x1xf32> to vector<8x8xf32>
    %158 = arith.divf %154, %157 : vector<8x8xf32>
    %159 = vector.extract_strided_slice %41 {offsets = [8, 24], sizes = [8, 8], strides = [1, 1]} : vector<16x32xf32> to vector<8x8xf32>
    %cst_62 = arith.constant dense<0.000000e+00> : vector<8x8xf32>
    %160 = tpu.matmul %158, %159, %cst_62 {dimension_numbers = #tpu.dot_dimension_numbers<[1], [0], [0], [1], [0, 0, 1, 1], [], []>} : vector<8x8xf32>, vector<8x8xf32>, vector<8x8xf32> -> vector<8x8xf32>
    %c8_63 = arith.constant 8 : index
    %c24_64 = arith.constant 24 : index
    %161 = vector.load %arg18[%c8_63, %c24_64] : memref<16x32xf32, #tpu.memory_space<vmem>>, vector<8x8xf32>
    tpu.vector_store %arg18[%c8_63, %c24_64], %160 {strides = array<i32>} : memref<16x32xf32, #tpu.memory_space<vmem>>, vector<8x8xf32>,
    %c0_65 = arith.constant 0 : index
    %c0_66 = arith.constant 0 : index
    %162 = vector.load %arg18[%c0_65, %c0_66] : memref<16x32xf32, #tpu.memory_space<vmem>>, vector<16x32xf32>
    %c0_67 = arith.constant 0 : index
    %c0_68 = arith.constant 0 : index
    %c0_69 = arith.constant 0 : index
    %163 = vector.load %arg6[%c0_67, %c0_68, %c0_69] : memref<1x32x32xf32, #tpu.memory_space<vmem>>, vector<1x32x32xf32>
    %164 = vector.shape_cast %163 : vector<1x32x32xf32> to vector<32x32xf32>
    %cst_70 = arith.constant dense<0.000000e+00> : vector<16x32xf32>
    %165 = tpu.matmul %162, %164, %cst_70 {dimension_numbers = #tpu.dot_dimension_numbers<[1], [0], [0], [1], [0, 0, 1, 1], [], []>} : vector<16x32xf32>, vector<32x32xf32>, vector<16x32xf32> -> vector<16x32xf32>
    %c0_71 = arith.constant 0 : index
    %c0_72 = arith.constant 0 : index
    %c0_73 = arith.constant 0 : index
    %166 = vector.load %arg7[%c0_71, %c0_72, %c0_73] : memref<1x1x32xf32, #tpu.memory_space<vmem>>, vector<1x1x32xf32>
    %167 = vector.shape_cast %166 : vector<1x1x32xf32> to vector<1x32xf32>
    %168 = vector.broadcast %167 : vector<1x32xf32> to vector<16x32xf32>
    %169 = arith.addf %165, %168 : vector<16x32xf32>
    %170 = arith.addf %3, %169 : vector<16x32xf32>
    %c0_74 = arith.constant 0 : index
    %c0_75 = arith.constant 0 : index
    %c0_76 = arith.constant 0 : index
    %171 = vector.load %arg8[%c0_74, %c0_75, %c0_76] : memref<1x1x32xf32, #tpu.memory_space<vmem>>, vector<1x1x32xf32>
    %172 = vector.shape_cast %171 : vector<1x1x32xf32> to vector<1x32xf32>
    %c0_77 = arith.constant 0 : index
    %c0_78 = arith.constant 0 : index
    %c0_79 = arith.constant 0 : index
    %173 = vector.load %arg9[%c0_77, %c0_78, %c0_79] : memref<1x1x32xf32, #tpu.memory_space<vmem>>, vector<1x1x32xf32>
    %174 = vector.shape_cast %173 : vector<1x1x32xf32> to vector<1x32xf32>
    %cst_80 = arith.constant dense<0.000000e+00> : vector<16xf32>
    %175 = vector.multi_reduction <add>, %170, %cst_80 [1] : vector<16x32xf32> to vector<16xf32>
    %176 = vector.shape_cast %175 : vector<16xf32> to vector<16x1xf32>
    %cst_81 = arith.constant 3.200000e+01 : f32
    %177 = vector.broadcast %cst_81 : f32 to vector<16x1xf32>
    %178 = arith.divf %176, %177 : vector<16x1xf32>
    %179 = vector.broadcast %178 : vector<16x1xf32> to vector<16x32xf32>
    %180 = arith.subf %170, %179 : vector<16x32xf32>
    %181 = arith.mulf %180, %180 : vector<16x32xf32>
    %cst_82 = arith.constant dense<0.000000e+00> : vector<16xf32>
    %182 = vector.multi_reduction <add>, %181, %cst_82 [1] : vector<16x32xf32> to vector<16xf32>
    %183 = vector.shape_cast %182 : vector<16xf32> to vector<16x1xf32>
    %cst_83 = arith.constant 3.200000e+01 : f32
    %184 = vector.broadcast %cst_83 : f32 to vector<16x1xf32>
    %185 = arith.divf %183, %184 : vector<16x1xf32>
    %186 = vector.broadcast %178 : vector<16x1xf32> to vector<16x32xf32>
    %187 = arith.subf %170, %186 : vector<16x32xf32>
    %cst_84 = arith.constant 9.99999974E-6 : f32
    %188 = vector.broadcast %cst_84 : f32 to vector<16x1xf32>
    %189 = arith.addf %185, %188 : vector<16x1xf32>
    %190 = math.rsqrt %189 : vector<16x1xf32>
    %191 = vector.broadcast %190 : vector<16x1xf32> to vector<16x32xf32>
    %192 = arith.mulf %187, %191 : vector<16x32xf32>
    %193 = vector.broadcast %172 : vector<1x32xf32> to vector<16x32xf32>
    %194 = arith.mulf %192, %193 : vector<16x32xf32>
    %195 = vector.broadcast %174 : vector<1x32xf32> to vector<16x32xf32>
    %196 = arith.addf %194, %195 : vector<16x32xf32>
    %c0_85 = arith.constant 0 : index
    %c0_86 = arith.constant 0 : index
    %c0_87 = arith.constant 0 : index
    %197 = vector.load %arg10[%c0_85, %c0_86, %c0_87] : memref<1x32x64xf32, #tpu.memory_space<vmem>>, vector<1x32x64xf32>
    %198 = vector.shape_cast %197 : vector<1x32x64xf32> to vector<32x64xf32>
    %cst_88 = arith.constant dense<0.000000e+00> : vector<16x64xf32>
    %199 = tpu.matmul %196, %198, %cst_88 {dimension_numbers = #tpu.dot_dimension_numbers<[1], [0], [0], [1], [0, 0, 1, 1], [], []>} : vector<16x32xf32>, vector<32x64xf32>, vector<16x64xf32> -> vector<16x64xf32>
    %c0_89 = arith.constant 0 : index
    %c0_90 = arith.constant 0 : index
    %c0_91 = arith.constant 0 : index
    %200 = vector.load %arg11[%c0_89, %c0_90, %c0_91] : memref<1x1x64xf32, #tpu.memory_space<vmem>>, vector<1x1x64xf32>
    %201 = vector.shape_cast %200 : vector<1x1x64xf32> to vector<1x64xf32>
    %202 = vector.broadcast %201 : vector<1x64xf32> to vector<16x64xf32>
    %203 = arith.addf %199, %202 : vector<16x64xf32>
    %cst_92 = arith.constant 5.000000e-01 : f32
    %204 = vector.broadcast %cst_92 : f32 to vector<16x64xf32>
    %205 = arith.mulf %204, %203 : vector<16x64xf32>
    %cst_93 = arith.constant 0.707106769 : f32
    %206 = vector.broadcast %cst_93 : f32 to vector<16x64xf32>
    %207 = arith.mulf %203, %206 : vector<16x64xf32>
    %cst_94 = arith.constant 0.000000e+00 : f32
    %208 = vector.broadcast %cst_94 : f32 to vector<16x64xf32>
    %209 = arith.cmpf olt, %207, %208 : vector<16x64xf32>
    %cst_95 = arith.constant -1.000000e+00 : f32
    %cst_96 = arith.constant 1.000000e+00 : f32
    %210 = vector.broadcast %cst_95 : f32 to vector<16x64xf32>
    %211 = vector.broadcast %cst_96 : f32 to vector<16x64xf32>
    %212 = arith.select %209, %210, %211 : vector<16x64xi1>, vector<16x64xf32>
    %213 = math.absf %207 : vector<16x64xf32>
    %cst_97 = arith.constant 0.327591091 : f32
    %214 = vector.broadcast %cst_97 : f32 to vector<16x64xf32>
    %215 = arith.mulf %214, %213 : vector<16x64xf32>
    %cst_98 = arith.constant 1.000000e+00 : f32
    %216 = vector.broadcast %cst_98 : f32 to vector<16x64xf32>
    %217 = arith.addf %216, %215 : vector<16x64xf32>
    %cst_99 = arith.constant 1.000000e+00 : f32
    %218 = vector.broadcast %cst_99 : f32 to vector<16x64xf32>
    %219 = arith.divf %218, %217 : vector<16x64xf32>
    %cst_100 = arith.constant 1.06140542 : f32
    %220 = vector.broadcast %cst_100 : f32 to vector<16x64xf32>
    %221 = arith.mulf %220, %219 : vector<16x64xf32>
    %cst_101 = arith.constant -1.45315206 : f32
    %222 = vector.broadcast %cst_101 : f32 to vector<16x64xf32>
    %223 = arith.addf %221, %222 : vector<16x64xf32>
    %224 = arith.mulf %223, %219 : vector<16x64xf32>
    %cst_102 = arith.constant 1.42141378 : f32
    %225 = vector.broadcast %cst_102 : f32 to vector<16x64xf32>
    %226 = arith.addf %224, %225 : vector<16x64xf32>
    %227 = arith.mulf %226, %219 : vector<16x64xf32>
    %cst_103 = arith.constant -0.284496725 : f32
    %228 = vector.broadcast %cst_103 : f32 to vector<16x64xf32>
    %229 = arith.addf %227, %228 : vector<16x64xf32>
    %230 = arith.mulf %229, %219 : vector<16x64xf32>
    %cst_104 = arith.constant 0.254829586 : f32
    %231 = vector.broadcast %cst_104 : f32 to vector<16x64xf32>
    %232 = arith.addf %230, %231 : vector<16x64xf32>
    %233 = arith.mulf %232, %219 : vector<16x64xf32>
    %cst_105 = arith.constant 0.000000e+00 : f32
    %234 = vector.broadcast %cst_105 : f32 to vector<16x64xf32>
    %235 = arith.subf %234, %213 : vector<16x64xf32>
    %236 = arith.mulf %235, %213 : vector<16x64xf32>
    %237 = math.exp %236 : vector<16x64xf32>
    %238 = arith.mulf %233, %237 : vector<16x64xf32>
    %cst_106 = arith.constant 1.000000e+00 : f32
    %239 = vector.broadcast %cst_106 : f32 to vector<16x64xf32>
    %240 = arith.subf %239, %238 : vector<16x64xf32>
    %241 = arith.mulf %212, %240 : vector<16x64xf32>
    %cst_107 = arith.constant 1.000000e+00 : f32
    %242 = vector.broadcast %cst_107 : f32 to vector<16x64xf32>
    %243 = arith.addf %242, %241 : vector<16x64xf32>
    %244 = arith.mulf %205, %243 : vector<16x64xf32>
    %c0_108 = arith.constant 0 : index
    %c0_109 = arith.constant 0 : index
    %c0_110 = arith.constant 0 : index
    %245 = vector.load %arg12[%c0_108, %c0_109, %c0_110] : memref<1x64x32xf32, #tpu.memory_space<vmem>>, vector<1x64x32xf32>
    %246 = vector.shape_cast %245 : vector<1x64x32xf32> to vector<64x32xf32>
    %cst_111 = arith.constant dense<0.000000e+00> : vector<16x32xf32>
    %247 = tpu.matmul %244, %246, %cst_111 {dimension_numbers = #tpu.dot_dimension_numbers<[1], [0], [0], [1], [0, 0, 1, 1], [], []>} : vector<16x64xf32>, vector<64x32xf32>, vector<16x32xf32> -> vector<16x32xf32>
    %c0_112 = arith.constant 0 : index
    %c0_113 = arith.constant 0 : index
    %c0_114 = arith.constant 0 : index
    %248 = vector.load %arg13[%c0_112, %c0_113, %c0_114] : memref<1x1x32xf32, #tpu.memory_space<vmem>>, vector<1x1x32xf32>
    %249 = vector.shape_cast %248 : vector<1x1x32xf32> to vector<1x32xf32>
    %250 = vector.broadcast %249 : vector<1x32xf32> to vector<16x32xf32>
    %251 = arith.addf %247, %250 : vector<16x32xf32>
    %252 = arith.addf %170, %251 : vector<16x32xf32>
    %c0_115 = arith.constant 0 : index
    %c0_116 = arith.constant 0 : index
    %253 = vector.load %arg17[%c0_115, %c0_116] : memref<16x32xf32, #tpu.memory_space<vmem>>, vector<16x32xf32>
    tpu.vector_store %arg17[%c0_115, %c0_116], %252 {strides = array<i32>} : memref<16x32xf32, #tpu.memory_space<vmem>>, vector<16x32xf32>,
    %c1_i32 = arith.constant 1 : i32
    %254 = arith.cmpi ne, %arg0, %c1_i32 : i32
    %255 = arith.extui %254 : i1 to i32
    %c0_i32_117 = arith.constant 0 : i32
    %256 = arith.cmpi ne, %255, %c0_i32_117 : i32
    scf.if %256 {
      %c0_120 = arith.constant 0 : index
      %c0_121 = arith.constant 0 : index
      %c0_122 = arith.constant 0 : index
      %260 = vector.load %arg16[%c0_120, %c0_121, %c0_122] : memref<1x16x32xf32, #tpu.memory_space<vmem>>, vector<1x16x32xf32>
      %261 = vector.shape_cast %260 : vector<1x16x32xf32> to vector<16x32xf32>
      %262 = vector.shape_cast %252 : vector<16x32xf32> to vector<1x16x32xf32>
      tpu.vector_store %arg16[%c0_120, %c0_121, %c0_122], %262 {strides = array<i32>} : memref<1x16x32xf32, #tpu.memory_space<vmem>>, vector<1x16x32xf32>,
    } else {
    }
    %c1_i32_118 = arith.constant 1 : i32
    %257 = arith.cmpi eq, %arg0, %c1_i32_118 : i32
    %258 = arith.extui %257 : i1 to i32
    %c0_i32_119 = arith.constant 0 : i32
    %259 = arith.cmpi ne, %258, %c0_i32_119 : i32
    scf.if %259 {
      %c0_120 = arith.constant 0 : index
      %c0_121 = arith.constant 0 : index
      %260 = vector.load %arg14[%c0_120, %c0_121] : memref<1x32xf32, #tpu.memory_space<vmem>>, vector<1x32xf32>
      %c0_122 = arith.constant 0 : index
      %c0_123 = arith.constant 0 : index
      %261 = vector.load %arg15[%c0_122, %c0_123] : memref<1x32xf32, #tpu.memory_space<vmem>>, vector<1x32xf32>
      %cst_124 = arith.constant dense<0.000000e+00> : vector<16xf32>
      %262 = vector.multi_reduction <add>, %252, %cst_124 [1] : vector<16x32xf32> to vector<16xf32>
      %263 = vector.shape_cast %262 : vector<16xf32> to vector<16x1xf32>
      %cst_125 = arith.constant 3.200000e+01 : f32
      %264 = vector.broadcast %cst_125 : f32 to vector<16x1xf32>
      %265 = arith.divf %263, %264 : vector<16x1xf32>
      %266 = vector.broadcast %265 : vector<16x1xf32> to vector<16x32xf32>
      %267 = arith.subf %252, %266 : vector<16x32xf32>
      %268 = arith.mulf %267, %267 : vector<16x32xf32>
      %cst_126 = arith.constant dense<0.000000e+00> : vector<16xf32>
      %269 = vector.multi_reduction <add>, %268, %cst_126 [1] : vector<16x32xf32> to vector<16xf32>
      %270 = vector.shape_cast %269 : vector<16xf32> to vector<16x1xf32>
      %cst_127 = arith.constant 3.200000e+01 : f32
      %271 = vector.broadcast %cst_127 : f32 to vector<16x1xf32>
      %272 = arith.divf %270, %271 : vector<16x1xf32>
      %273 = vector.broadcast %265 : vector<16x1xf32> to vector<16x32xf32>
      %274 = arith.subf %252, %273 : vector<16x32xf32>
      %cst_128 = arith.constant 9.99999974E-6 : f32
      %275 = vector.broadcast %cst_128 : f32 to vector<16x1xf32>
      %276 = arith.addf %272, %275 : vector<16x1xf32>
      %277 = math.rsqrt %276 : vector<16x1xf32>
      %278 = vector.broadcast %277 : vector<16x1xf32> to vector<16x32xf32>
      %279 = arith.mulf %274, %278 : vector<16x32xf32>
      %280 = vector.broadcast %260 : vector<1x32xf32> to vector<16x32xf32>
      %281 = arith.mulf %279, %280 : vector<16x32xf32>
      %282 = vector.broadcast %261 : vector<1x32xf32> to vector<16x32xf32>
      %283 = arith.addf %281, %282 : vector<16x32xf32>
      %c0_129 = arith.constant 0 : index
      %c0_130 = arith.constant 0 : index
      %c0_131 = arith.constant 0 : index
      %284 = vector.load %arg16[%c0_129, %c0_130, %c0_131] : memref<1x16x32xf32, #tpu.memory_space<vmem>>, vector<1x16x32xf32>
      %285 = vector.shape_cast %284 : vector<1x16x32xf32> to vector<16x32xf32>
      %286 = vector.shape_cast %283 : vector<16x32xf32> to vector<1x16x32xf32>
      tpu.vector_store %arg16[%c0_129, %c0_130, %c0_131], %286 {strides = array<i32>} : memref<1x16x32xf32, #tpu.memory_space<vmem>>, vector<1x16x32xf32>,
    } else {
    }
    return
  }
  func.func @transform_0(%arg0: i32) -> (i32, i32) {
    %c0_i32 = arith.constant 0 : i32
    %c0_i32_0 = arith.constant 0 : i32
    %c0_i32_1 = arith.constant 0 : i32
    return %c0_i32, %c0_i32_0 : i32, i32
  }
  func.func @transform_1(%arg0: i32) -> (i32, i32, i32) {
    %c0_i32 = arith.constant 0 : i32
    %c0_i32_0 = arith.constant 0 : i32
    %c0_i32_1 = arith.constant 0 : i32
    return %arg0, %c0_i32, %c0_i32_0 : i32, i32, i32
  }
  func.func @transform_2(%arg0: i32) -> (i32, i32, i32) {
    %c0_i32 = arith.constant 0 : i32
    %c0_i32_0 = arith.constant 0 : i32
    %c0_i32_1 = arith.constant 0 : i32
    return %arg0, %c0_i32, %c0_i32_0 : i32, i32, i32
  }
  func.func @transform_3(%arg0: i32) -> (i32, i32, i32) {
    %c0_i32 = arith.constant 0 : i32
    %c0_i32_0 = arith.constant 0 : i32
    %c0_i32_1 = arith.constant 0 : i32
    return %arg0, %c0_i32, %c0_i32_0 : i32, i32, i32
  }
  func.func @transform_4(%arg0: i32) -> (i32, i32, i32) {
    %c0_i32 = arith.constant 0 : i32
    %c0_i32_0 = arith.constant 0 : i32
    %c0_i32_1 = arith.constant 0 : i32
    return %arg0, %c0_i32, %c0_i32_0 : i32, i32, i32
  }
  func.func @transform_5(%arg0: i32) -> (i32, i32, i32) {
    %c0_i32 = arith.constant 0 : i32
    %c0_i32_0 = arith.constant 0 : i32
    %c0_i32_1 = arith.constant 0 : i32
    return %arg0, %c0_i32, %c0_i32_0 : i32, i32, i32
  }
  func.func @transform_6(%arg0: i32) -> (i32, i32, i32) {
    %c0_i32 = arith.constant 0 : i32
    %c0_i32_0 = arith.constant 0 : i32
    %c0_i32_1 = arith.constant 0 : i32
    return %arg0, %c0_i32, %c0_i32_0 : i32, i32, i32
  }
  func.func @transform_7(%arg0: i32) -> (i32, i32, i32) {
    %c0_i32 = arith.constant 0 : i32
    %c0_i32_0 = arith.constant 0 : i32
    %c0_i32_1 = arith.constant 0 : i32
    return %arg0, %c0_i32, %c0_i32_0 : i32, i32, i32
  }
  func.func @transform_8(%arg0: i32) -> (i32, i32, i32) {
    %c0_i32 = arith.constant 0 : i32
    %c0_i32_0 = arith.constant 0 : i32
    %c0_i32_1 = arith.constant 0 : i32
    return %arg0, %c0_i32, %c0_i32_0 : i32, i32, i32
  }
  func.func @transform_9(%arg0: i32) -> (i32, i32, i32) {
    %c0_i32 = arith.constant 0 : i32
    %c0_i32_0 = arith.constant 0 : i32
    %c0_i32_1 = arith.constant 0 : i32
    return %arg0, %c0_i32, %c0_i32_0 : i32, i32, i32
  }
  func.func @transform_10(%arg0: i32) -> (i32, i32, i32) {
    %c0_i32 = arith.constant 0 : i32
    %c0_i32_0 = arith.constant 0 : i32
    %c0_i32_1 = arith.constant 0 : i32
    return %arg0, %c0_i32, %c0_i32_0 : i32, i32, i32
  }
  func.func @transform_11(%arg0: i32) -> (i32, i32, i32) {
    %c0_i32 = arith.constant 0 : i32
    %c0_i32_0 = arith.constant 0 : i32
    %c0_i32_1 = arith.constant 0 : i32
    return %arg0, %c0_i32, %c0_i32_0 : i32, i32, i32
  }
  func.func @transform_12(%arg0: i32) -> (i32, i32, i32) {
    %c0_i32 = arith.constant 0 : i32
    %c0_i32_0 = arith.constant 0 : i32
    %c0_i32_1 = arith.constant 0 : i32
    return %arg0, %c0_i32, %c0_i32_0 : i32, i32, i32
  }
  func.func @transform_13(%arg0: i32) -> (i32, i32) {
    %c0_i32 = arith.constant 0 : i32
    %c0_i32_0 = arith.constant 0 : i32
    %c0_i32_1 = arith.constant 0 : i32
    return %c0_i32, %c0_i32_0 : i32, i32
  }
  func.func @transform_14(%arg0: i32) -> (i32, i32) {
    %c0_i32 = arith.constant 0 : i32
    %c0_i32_0 = arith.constant 0 : i32
    %c0_i32_1 = arith.constant 0 : i32
    return %c0_i32, %c0_i32_0 : i32, i32
  }
  func.func @transform_15(%arg0: i32) -> (i32, i32, i32) {
    %c0_i32 = arith.constant 0 : i32
    %c0_i32_0 = arith.constant 0 : i32
    %c0_i32_1 = arith.constant 0 : i32
    return %arg0, %c0_i32, %c0_i32_0 : i32, i32, i32
  }
}

module attributes {stable_mosaic.version = 11 : i64} {
  func.func @_frontend_kernel(%arg0: memref<2x16x16xf32, #tpu.memory_space<vmem>>, %arg1: memref<3x16x32xf32, #tpu.memory_space<vmem>>, %arg2: memref<1x32xf32, #tpu.memory_space<vmem>>, %arg3: memref<3x32x32xf32, #tpu.memory_space<vmem>>, %arg4: memref<1x32xf32, #tpu.memory_space<vmem>>, %arg5: memref<8x32xf32, #tpu.memory_space<vmem>>, %arg6: memref<16x32xf32, #tpu.memory_space<vmem>>) attributes {dimension_semantics = [], scalar_prefetch = 0 : i64, scratch_operands = 0 : i64, tpu.core_type = #tpu.core_type<tc>} {
    %0 = tpu.iota {dimensions = array<i32: 0>} : vector<16x16xi32>
    %1 = tpu.iota {dimensions = array<i32: 1>} : vector<16x16xi32>
    %c1_i32 = arith.constant 1 : i32
    %2 = vector.broadcast %c1_i32 : i32 to vector<16x16xi32>
    %3 = arith.subi %0, %2 : vector<16x16xi32>
    %4 = arith.cmpi eq, %1, %3 : vector<16x16xi32>
    %cst = arith.constant 1.000000e+00 : f32
    %cst_0 = arith.constant 0.000000e+00 : f32
    %5 = vector.broadcast %cst : f32 to vector<16x16xf32>
    %6 = vector.broadcast %cst_0 : f32 to vector<16x16xf32>
    %7 = arith.select %4, %5, %6 : vector<16x16xi1>, vector<16x16xf32>
    %c1_i32_1 = arith.constant 1 : i32
    %8 = vector.broadcast %c1_i32_1 : i32 to vector<16x16xi32>
    %9 = arith.addi %0, %8 : vector<16x16xi32>
    %10 = arith.cmpi eq, %1, %9 : vector<16x16xi32>
    %cst_2 = arith.constant 1.000000e+00 : f32
    %cst_3 = arith.constant 0.000000e+00 : f32
    %11 = vector.broadcast %cst_2 : f32 to vector<16x16xf32>
    %12 = vector.broadcast %cst_3 : f32 to vector<16x16xf32>
    %13 = arith.select %10, %11, %12 : vector<16x16xi1>, vector<16x16xf32>
    %14 = tpu.iota {dimensions = array<i32: 0>} : vector<8x16xi32>
    %15 = tpu.iota {dimensions = array<i32: 1>} : vector<8x16xi32>
    %c2_i32 = arith.constant 2 : i32
    %16 = vector.broadcast %c2_i32 : i32 to vector<8x16xi32>
    %17 = arith.muli %16, %14 : vector<8x16xi32>
    %c1_i32_4 = arith.constant 1 : i32
    %18 = vector.broadcast %c1_i32_4 : i32 to vector<8x16xi32>
    %19 = arith.subi %17, %18 : vector<8x16xi32>
    %20 = arith.cmpi eq, %15, %19 : vector<8x16xi32>
    %cst_5 = arith.constant 1.000000e+00 : f32
    %cst_6 = arith.constant 0.000000e+00 : f32
    %21 = vector.broadcast %cst_5 : f32 to vector<8x16xf32>
    %22 = vector.broadcast %cst_6 : f32 to vector<8x16xf32>
    %23 = arith.select %20, %21, %22 : vector<8x16xi1>, vector<8x16xf32>
    %c2_i32_7 = arith.constant 2 : i32
    %24 = vector.broadcast %c2_i32_7 : i32 to vector<8x16xi32>
    %25 = arith.muli %24, %14 : vector<8x16xi32>
    %26 = arith.cmpi eq, %15, %25 : vector<8x16xi32>
    %cst_8 = arith.constant 1.000000e+00 : f32
    %cst_9 = arith.constant 0.000000e+00 : f32
    %27 = vector.broadcast %cst_8 : f32 to vector<8x16xf32>
    %28 = vector.broadcast %cst_9 : f32 to vector<8x16xf32>
    %29 = arith.select %26, %27, %28 : vector<8x16xi1>, vector<8x16xf32>
    %c2_i32_10 = arith.constant 2 : i32
    %30 = vector.broadcast %c2_i32_10 : i32 to vector<8x16xi32>
    %31 = arith.muli %30, %14 : vector<8x16xi32>
    %c1_i32_11 = arith.constant 1 : i32
    %32 = vector.broadcast %c1_i32_11 : i32 to vector<8x16xi32>
    %33 = arith.addi %31, %32 : vector<8x16xi32>
    %34 = arith.cmpi eq, %15, %33 : vector<8x16xi32>
    %cst_12 = arith.constant 1.000000e+00 : f32
    %cst_13 = arith.constant 0.000000e+00 : f32
    %35 = vector.broadcast %cst_12 : f32 to vector<8x16xf32>
    %36 = vector.broadcast %cst_13 : f32 to vector<8x16xf32>
    %37 = arith.select %34, %35, %36 : vector<8x16xi1>, vector<8x16xf32>
    %c0 = arith.constant 0 : index
    %c0_14 = arith.constant 0 : index
    %c0_15 = arith.constant 0 : index
    %38 = vector.load %arg1[%c0, %c0_14, %c0_15] : memref<3x16x32xf32, #tpu.memory_space<vmem>>, vector<1x16x32xf32>
    %39 = vector.shape_cast %38 : vector<1x16x32xf32> to vector<16x32xf32>
    %c1 = arith.constant 1 : index
    %c0_16 = arith.constant 0 : index
    %c0_17 = arith.constant 0 : index
    %40 = vector.load %arg1[%c1, %c0_16, %c0_17] : memref<3x16x32xf32, #tpu.memory_space<vmem>>, vector<1x16x32xf32>
    %41 = vector.shape_cast %40 : vector<1x16x32xf32> to vector<16x32xf32>
    %c2 = arith.constant 2 : index
    %c0_18 = arith.constant 0 : index
    %c0_19 = arith.constant 0 : index
    %42 = vector.load %arg1[%c2, %c0_18, %c0_19] : memref<3x16x32xf32, #tpu.memory_space<vmem>>, vector<1x16x32xf32>
    %43 = vector.shape_cast %42 : vector<1x16x32xf32> to vector<16x32xf32>
    %c0_20 = arith.constant 0 : index
    %c0_21 = arith.constant 0 : index
    %c0_22 = arith.constant 0 : index
    %44 = vector.load %arg3[%c0_20, %c0_21, %c0_22] : memref<3x32x32xf32, #tpu.memory_space<vmem>>, vector<1x32x32xf32>
    %45 = vector.shape_cast %44 : vector<1x32x32xf32> to vector<32x32xf32>
    %c1_23 = arith.constant 1 : index
    %c0_24 = arith.constant 0 : index
    %c0_25 = arith.constant 0 : index
    %46 = vector.load %arg3[%c1_23, %c0_24, %c0_25] : memref<3x32x32xf32, #tpu.memory_space<vmem>>, vector<1x32x32xf32>
    %47 = vector.shape_cast %46 : vector<1x32x32xf32> to vector<32x32xf32>
    %c2_26 = arith.constant 2 : index
    %c0_27 = arith.constant 0 : index
    %c0_28 = arith.constant 0 : index
    %48 = vector.load %arg3[%c2_26, %c0_27, %c0_28] : memref<3x32x32xf32, #tpu.memory_space<vmem>>, vector<1x32x32xf32>
    %49 = vector.shape_cast %48 : vector<1x32x32xf32> to vector<32x32xf32>
    %c0_29 = arith.constant 0 : index
    %c0_30 = arith.constant 0 : index
    %50 = vector.load %arg2[%c0_29, %c0_30] : memref<1x32xf32, #tpu.memory_space<vmem>>, vector<1x32xf32>
    %c0_31 = arith.constant 0 : index
    %c0_32 = arith.constant 0 : index
    %51 = vector.load %arg4[%c0_31, %c0_32] : memref<1x32xf32, #tpu.memory_space<vmem>>, vector<1x32xf32>
    %c0_33 = arith.constant 0 : index
    %c0_34 = arith.constant 0 : index
    %52 = vector.load %arg5[%c0_33, %c0_34] : memref<8x32xf32, #tpu.memory_space<vmem>>, vector<8x32xf32>
    %c0_35 = arith.constant 0 : index
    %c0_36 = arith.constant 0 : index
    %c0_37 = arith.constant 0 : index
    %53 = vector.load %arg0[%c0_35, %c0_36, %c0_37] : memref<2x16x16xf32, #tpu.memory_space<vmem>>, vector<1x16x16xf32>
    %54 = vector.shape_cast %53 : vector<1x16x16xf32> to vector<16x16xf32>
    %cst_38 = arith.constant dense<0.000000e+00> : vector<16x16xf32>
    %55 = tpu.matmul %7, %54, %cst_38 {dimension_numbers = #tpu.dot_dimension_numbers<[1], [0], [0], [1], [0, 0, 1, 1], [], []>} : vector<16x16xf32>, vector<16x16xf32>, vector<16x16xf32> -> vector<16x16xf32>
    %cst_39 = arith.constant dense<0.000000e+00> : vector<16x32xf32>
    %56 = tpu.matmul %55, %39, %cst_39 {dimension_numbers = #tpu.dot_dimension_numbers<[1], [0], [0], [1], [0, 0, 1, 1], [], []>} : vector<16x16xf32>, vector<16x32xf32>, vector<16x32xf32> -> vector<16x32xf32>
    %cst_40 = arith.constant dense<0.000000e+00> : vector<16x32xf32>
    %57 = tpu.matmul %54, %41, %cst_40 {dimension_numbers = #tpu.dot_dimension_numbers<[1], [0], [0], [1], [0, 0, 1, 1], [], []>} : vector<16x16xf32>, vector<16x32xf32>, vector<16x32xf32> -> vector<16x32xf32>
    %58 = arith.addf %56, %57 : vector<16x32xf32>
    %cst_41 = arith.constant dense<0.000000e+00> : vector<16x16xf32>
    %59 = tpu.matmul %13, %54, %cst_41 {dimension_numbers = #tpu.dot_dimension_numbers<[1], [0], [0], [1], [0, 0, 1, 1], [], []>} : vector<16x16xf32>, vector<16x16xf32>, vector<16x16xf32> -> vector<16x16xf32>
    %cst_42 = arith.constant dense<0.000000e+00> : vector<16x32xf32>
    %60 = tpu.matmul %59, %43, %cst_42 {dimension_numbers = #tpu.dot_dimension_numbers<[1], [0], [0], [1], [0, 0, 1, 1], [], []>} : vector<16x16xf32>, vector<16x32xf32>, vector<16x32xf32> -> vector<16x32xf32>
    %61 = arith.addf %58, %60 : vector<16x32xf32>
    %62 = vector.broadcast %50 : vector<1x32xf32> to vector<16x32xf32>
    %63 = arith.addf %61, %62 : vector<16x32xf32>
    %cst_43 = arith.constant 5.000000e-01 : f32
    %64 = vector.broadcast %cst_43 : f32 to vector<16x32xf32>
    %65 = arith.mulf %64, %63 : vector<16x32xf32>
    %cst_44 = arith.constant 0.707106769 : f32
    %66 = vector.broadcast %cst_44 : f32 to vector<16x32xf32>
    %67 = arith.mulf %63, %66 : vector<16x32xf32>
    %cst_45 = arith.constant 0.000000e+00 : f32
    %68 = vector.broadcast %cst_45 : f32 to vector<16x32xf32>
    %69 = arith.cmpf olt, %67, %68 : vector<16x32xf32>
    %cst_46 = arith.constant -1.000000e+00 : f32
    %cst_47 = arith.constant 1.000000e+00 : f32
    %70 = vector.broadcast %cst_46 : f32 to vector<16x32xf32>
    %71 = vector.broadcast %cst_47 : f32 to vector<16x32xf32>
    %72 = arith.select %69, %70, %71 : vector<16x32xi1>, vector<16x32xf32>
    %73 = math.absf %67 : vector<16x32xf32>
    %cst_48 = arith.constant 0.327591091 : f32
    %74 = vector.broadcast %cst_48 : f32 to vector<16x32xf32>
    %75 = arith.mulf %74, %73 : vector<16x32xf32>
    %cst_49 = arith.constant 1.000000e+00 : f32
    %76 = vector.broadcast %cst_49 : f32 to vector<16x32xf32>
    %77 = arith.addf %76, %75 : vector<16x32xf32>
    %cst_50 = arith.constant 1.000000e+00 : f32
    %78 = vector.broadcast %cst_50 : f32 to vector<16x32xf32>
    %79 = arith.divf %78, %77 : vector<16x32xf32>
    %cst_51 = arith.constant 1.06140542 : f32
    %80 = vector.broadcast %cst_51 : f32 to vector<16x32xf32>
    %81 = arith.mulf %80, %79 : vector<16x32xf32>
    %cst_52 = arith.constant -1.45315206 : f32
    %82 = vector.broadcast %cst_52 : f32 to vector<16x32xf32>
    %83 = arith.addf %81, %82 : vector<16x32xf32>
    %84 = arith.mulf %83, %79 : vector<16x32xf32>
    %cst_53 = arith.constant 1.42141378 : f32
    %85 = vector.broadcast %cst_53 : f32 to vector<16x32xf32>
    %86 = arith.addf %84, %85 : vector<16x32xf32>
    %87 = arith.mulf %86, %79 : vector<16x32xf32>
    %cst_54 = arith.constant -0.284496725 : f32
    %88 = vector.broadcast %cst_54 : f32 to vector<16x32xf32>
    %89 = arith.addf %87, %88 : vector<16x32xf32>
    %90 = arith.mulf %89, %79 : vector<16x32xf32>
    %cst_55 = arith.constant 0.254829586 : f32
    %91 = vector.broadcast %cst_55 : f32 to vector<16x32xf32>
    %92 = arith.addf %90, %91 : vector<16x32xf32>
    %93 = arith.mulf %92, %79 : vector<16x32xf32>
    %cst_56 = arith.constant 0.000000e+00 : f32
    %94 = vector.broadcast %cst_56 : f32 to vector<16x32xf32>
    %95 = arith.subf %94, %73 : vector<16x32xf32>
    %96 = arith.mulf %95, %73 : vector<16x32xf32>
    %97 = math.exp %96 : vector<16x32xf32>
    %98 = arith.mulf %93, %97 : vector<16x32xf32>
    %cst_57 = arith.constant 1.000000e+00 : f32
    %99 = vector.broadcast %cst_57 : f32 to vector<16x32xf32>
    %100 = arith.subf %99, %98 : vector<16x32xf32>
    %101 = arith.mulf %72, %100 : vector<16x32xf32>
    %cst_58 = arith.constant 1.000000e+00 : f32
    %102 = vector.broadcast %cst_58 : f32 to vector<16x32xf32>
    %103 = arith.addf %102, %101 : vector<16x32xf32>
    %104 = arith.mulf %65, %103 : vector<16x32xf32>
    %cst_59 = arith.constant dense<0.000000e+00> : vector<8x32xf32>
    %105 = tpu.matmul %23, %104, %cst_59 {dimension_numbers = #tpu.dot_dimension_numbers<[1], [0], [0], [1], [0, 0, 1, 1], [], []>} : vector<8x16xf32>, vector<16x32xf32>, vector<8x32xf32> -> vector<8x32xf32>
    %cst_60 = arith.constant dense<0.000000e+00> : vector<8x32xf32>
    %106 = tpu.matmul %105, %45, %cst_60 {dimension_numbers = #tpu.dot_dimension_numbers<[1], [0], [0], [1], [0, 0, 1, 1], [], []>} : vector<8x32xf32>, vector<32x32xf32>, vector<8x32xf32> -> vector<8x32xf32>
    %cst_61 = arith.constant dense<0.000000e+00> : vector<8x32xf32>
    %107 = tpu.matmul %29, %104, %cst_61 {dimension_numbers = #tpu.dot_dimension_numbers<[1], [0], [0], [1], [0, 0, 1, 1], [], []>} : vector<8x16xf32>, vector<16x32xf32>, vector<8x32xf32> -> vector<8x32xf32>
    %cst_62 = arith.constant dense<0.000000e+00> : vector<8x32xf32>
    %108 = tpu.matmul %107, %47, %cst_62 {dimension_numbers = #tpu.dot_dimension_numbers<[1], [0], [0], [1], [0, 0, 1, 1], [], []>} : vector<8x32xf32>, vector<32x32xf32>, vector<8x32xf32> -> vector<8x32xf32>
    %109 = arith.addf %106, %108 : vector<8x32xf32>
    %cst_63 = arith.constant dense<0.000000e+00> : vector<8x32xf32>
    %110 = tpu.matmul %37, %104, %cst_63 {dimension_numbers = #tpu.dot_dimension_numbers<[1], [0], [0], [1], [0, 0, 1, 1], [], []>} : vector<8x16xf32>, vector<16x32xf32>, vector<8x32xf32> -> vector<8x32xf32>
    %cst_64 = arith.constant dense<0.000000e+00> : vector<8x32xf32>
    %111 = tpu.matmul %110, %49, %cst_64 {dimension_numbers = #tpu.dot_dimension_numbers<[1], [0], [0], [1], [0, 0, 1, 1], [], []>} : vector<8x32xf32>, vector<32x32xf32>, vector<8x32xf32> -> vector<8x32xf32>
    %112 = arith.addf %109, %111 : vector<8x32xf32>
    %113 = vector.broadcast %51 : vector<1x32xf32> to vector<8x32xf32>
    %114 = arith.addf %112, %113 : vector<8x32xf32>
    %cst_65 = arith.constant 5.000000e-01 : f32
    %115 = vector.broadcast %cst_65 : f32 to vector<8x32xf32>
    %116 = arith.mulf %115, %114 : vector<8x32xf32>
    %cst_66 = arith.constant 0.707106769 : f32
    %117 = vector.broadcast %cst_66 : f32 to vector<8x32xf32>
    %118 = arith.mulf %114, %117 : vector<8x32xf32>
    %cst_67 = arith.constant 0.000000e+00 : f32
    %119 = vector.broadcast %cst_67 : f32 to vector<8x32xf32>
    %120 = arith.cmpf olt, %118, %119 : vector<8x32xf32>
    %cst_68 = arith.constant -1.000000e+00 : f32
    %cst_69 = arith.constant 1.000000e+00 : f32
    %121 = vector.broadcast %cst_68 : f32 to vector<8x32xf32>
    %122 = vector.broadcast %cst_69 : f32 to vector<8x32xf32>
    %123 = arith.select %120, %121, %122 : vector<8x32xi1>, vector<8x32xf32>
    %124 = math.absf %118 : vector<8x32xf32>
    %cst_70 = arith.constant 0.327591091 : f32
    %125 = vector.broadcast %cst_70 : f32 to vector<8x32xf32>
    %126 = arith.mulf %125, %124 : vector<8x32xf32>
    %cst_71 = arith.constant 1.000000e+00 : f32
    %127 = vector.broadcast %cst_71 : f32 to vector<8x32xf32>
    %128 = arith.addf %127, %126 : vector<8x32xf32>
    %cst_72 = arith.constant 1.000000e+00 : f32
    %129 = vector.broadcast %cst_72 : f32 to vector<8x32xf32>
    %130 = arith.divf %129, %128 : vector<8x32xf32>
    %cst_73 = arith.constant 1.06140542 : f32
    %131 = vector.broadcast %cst_73 : f32 to vector<8x32xf32>
    %132 = arith.mulf %131, %130 : vector<8x32xf32>
    %cst_74 = arith.constant -1.45315206 : f32
    %133 = vector.broadcast %cst_74 : f32 to vector<8x32xf32>
    %134 = arith.addf %132, %133 : vector<8x32xf32>
    %135 = arith.mulf %134, %130 : vector<8x32xf32>
    %cst_75 = arith.constant 1.42141378 : f32
    %136 = vector.broadcast %cst_75 : f32 to vector<8x32xf32>
    %137 = arith.addf %135, %136 : vector<8x32xf32>
    %138 = arith.mulf %137, %130 : vector<8x32xf32>
    %cst_76 = arith.constant -0.284496725 : f32
    %139 = vector.broadcast %cst_76 : f32 to vector<8x32xf32>
    %140 = arith.addf %138, %139 : vector<8x32xf32>
    %141 = arith.mulf %140, %130 : vector<8x32xf32>
    %cst_77 = arith.constant 0.254829586 : f32
    %142 = vector.broadcast %cst_77 : f32 to vector<8x32xf32>
    %143 = arith.addf %141, %142 : vector<8x32xf32>
    %144 = arith.mulf %143, %130 : vector<8x32xf32>
    %cst_78 = arith.constant 0.000000e+00 : f32
    %145 = vector.broadcast %cst_78 : f32 to vector<8x32xf32>
    %146 = arith.subf %145, %124 : vector<8x32xf32>
    %147 = arith.mulf %146, %124 : vector<8x32xf32>
    %148 = math.exp %147 : vector<8x32xf32>
    %149 = arith.mulf %144, %148 : vector<8x32xf32>
    %cst_79 = arith.constant 1.000000e+00 : f32
    %150 = vector.broadcast %cst_79 : f32 to vector<8x32xf32>
    %151 = arith.subf %150, %149 : vector<8x32xf32>
    %152 = arith.mulf %123, %151 : vector<8x32xf32>
    %cst_80 = arith.constant 1.000000e+00 : f32
    %153 = vector.broadcast %cst_80 : f32 to vector<8x32xf32>
    %154 = arith.addf %153, %152 : vector<8x32xf32>
    %155 = arith.mulf %116, %154 : vector<8x32xf32>
    %156 = arith.addf %155, %52 : vector<8x32xf32>
    %c0_81 = arith.constant 0 : index
    %c0_82 = arith.constant 0 : index
    %157 = vector.load %arg6[%c0_81, %c0_82] : memref<16x32xf32, #tpu.memory_space<vmem>>, vector<8x32xf32>
    tpu.vector_store %arg6[%c0_81, %c0_82], %156 {strides = array<i32>} : memref<16x32xf32, #tpu.memory_space<vmem>>, vector<8x32xf32>,
    %c1_83 = arith.constant 1 : index
    %c0_84 = arith.constant 0 : index
    %c0_85 = arith.constant 0 : index
    %158 = vector.load %arg0[%c1_83, %c0_84, %c0_85] : memref<2x16x16xf32, #tpu.memory_space<vmem>>, vector<1x16x16xf32>
    %159 = vector.shape_cast %158 : vector<1x16x16xf32> to vector<16x16xf32>
    %cst_86 = arith.constant dense<0.000000e+00> : vector<16x16xf32>
    %160 = tpu.matmul %7, %159, %cst_86 {dimension_numbers = #tpu.dot_dimension_numbers<[1], [0], [0], [1], [0, 0, 1, 1], [], []>} : vector<16x16xf32>, vector<16x16xf32>, vector<16x16xf32> -> vector<16x16xf32>
    %cst_87 = arith.constant dense<0.000000e+00> : vector<16x32xf32>
    %161 = tpu.matmul %160, %39, %cst_87 {dimension_numbers = #tpu.dot_dimension_numbers<[1], [0], [0], [1], [0, 0, 1, 1], [], []>} : vector<16x16xf32>, vector<16x32xf32>, vector<16x32xf32> -> vector<16x32xf32>
    %cst_88 = arith.constant dense<0.000000e+00> : vector<16x32xf32>
    %162 = tpu.matmul %159, %41, %cst_88 {dimension_numbers = #tpu.dot_dimension_numbers<[1], [0], [0], [1], [0, 0, 1, 1], [], []>} : vector<16x16xf32>, vector<16x32xf32>, vector<16x32xf32> -> vector<16x32xf32>
    %163 = arith.addf %161, %162 : vector<16x32xf32>
    %cst_89 = arith.constant dense<0.000000e+00> : vector<16x16xf32>
    %164 = tpu.matmul %13, %159, %cst_89 {dimension_numbers = #tpu.dot_dimension_numbers<[1], [0], [0], [1], [0, 0, 1, 1], [], []>} : vector<16x16xf32>, vector<16x16xf32>, vector<16x16xf32> -> vector<16x16xf32>
    %cst_90 = arith.constant dense<0.000000e+00> : vector<16x32xf32>
    %165 = tpu.matmul %164, %43, %cst_90 {dimension_numbers = #tpu.dot_dimension_numbers<[1], [0], [0], [1], [0, 0, 1, 1], [], []>} : vector<16x16xf32>, vector<16x32xf32>, vector<16x32xf32> -> vector<16x32xf32>
    %166 = arith.addf %163, %165 : vector<16x32xf32>
    %167 = vector.broadcast %50 : vector<1x32xf32> to vector<16x32xf32>
    %168 = arith.addf %166, %167 : vector<16x32xf32>
    %cst_91 = arith.constant 5.000000e-01 : f32
    %169 = vector.broadcast %cst_91 : f32 to vector<16x32xf32>
    %170 = arith.mulf %169, %168 : vector<16x32xf32>
    %cst_92 = arith.constant 0.707106769 : f32
    %171 = vector.broadcast %cst_92 : f32 to vector<16x32xf32>
    %172 = arith.mulf %168, %171 : vector<16x32xf32>
    %cst_93 = arith.constant 0.000000e+00 : f32
    %173 = vector.broadcast %cst_93 : f32 to vector<16x32xf32>
    %174 = arith.cmpf olt, %172, %173 : vector<16x32xf32>
    %cst_94 = arith.constant -1.000000e+00 : f32
    %cst_95 = arith.constant 1.000000e+00 : f32
    %175 = vector.broadcast %cst_94 : f32 to vector<16x32xf32>
    %176 = vector.broadcast %cst_95 : f32 to vector<16x32xf32>
    %177 = arith.select %174, %175, %176 : vector<16x32xi1>, vector<16x32xf32>
    %178 = math.absf %172 : vector<16x32xf32>
    %cst_96 = arith.constant 0.327591091 : f32
    %179 = vector.broadcast %cst_96 : f32 to vector<16x32xf32>
    %180 = arith.mulf %179, %178 : vector<16x32xf32>
    %cst_97 = arith.constant 1.000000e+00 : f32
    %181 = vector.broadcast %cst_97 : f32 to vector<16x32xf32>
    %182 = arith.addf %181, %180 : vector<16x32xf32>
    %cst_98 = arith.constant 1.000000e+00 : f32
    %183 = vector.broadcast %cst_98 : f32 to vector<16x32xf32>
    %184 = arith.divf %183, %182 : vector<16x32xf32>
    %cst_99 = arith.constant 1.06140542 : f32
    %185 = vector.broadcast %cst_99 : f32 to vector<16x32xf32>
    %186 = arith.mulf %185, %184 : vector<16x32xf32>
    %cst_100 = arith.constant -1.45315206 : f32
    %187 = vector.broadcast %cst_100 : f32 to vector<16x32xf32>
    %188 = arith.addf %186, %187 : vector<16x32xf32>
    %189 = arith.mulf %188, %184 : vector<16x32xf32>
    %cst_101 = arith.constant 1.42141378 : f32
    %190 = vector.broadcast %cst_101 : f32 to vector<16x32xf32>
    %191 = arith.addf %189, %190 : vector<16x32xf32>
    %192 = arith.mulf %191, %184 : vector<16x32xf32>
    %cst_102 = arith.constant -0.284496725 : f32
    %193 = vector.broadcast %cst_102 : f32 to vector<16x32xf32>
    %194 = arith.addf %192, %193 : vector<16x32xf32>
    %195 = arith.mulf %194, %184 : vector<16x32xf32>
    %cst_103 = arith.constant 0.254829586 : f32
    %196 = vector.broadcast %cst_103 : f32 to vector<16x32xf32>
    %197 = arith.addf %195, %196 : vector<16x32xf32>
    %198 = arith.mulf %197, %184 : vector<16x32xf32>
    %cst_104 = arith.constant 0.000000e+00 : f32
    %199 = vector.broadcast %cst_104 : f32 to vector<16x32xf32>
    %200 = arith.subf %199, %178 : vector<16x32xf32>
    %201 = arith.mulf %200, %178 : vector<16x32xf32>
    %202 = math.exp %201 : vector<16x32xf32>
    %203 = arith.mulf %198, %202 : vector<16x32xf32>
    %cst_105 = arith.constant 1.000000e+00 : f32
    %204 = vector.broadcast %cst_105 : f32 to vector<16x32xf32>
    %205 = arith.subf %204, %203 : vector<16x32xf32>
    %206 = arith.mulf %177, %205 : vector<16x32xf32>
    %cst_106 = arith.constant 1.000000e+00 : f32
    %207 = vector.broadcast %cst_106 : f32 to vector<16x32xf32>
    %208 = arith.addf %207, %206 : vector<16x32xf32>
    %209 = arith.mulf %170, %208 : vector<16x32xf32>
    %cst_107 = arith.constant dense<0.000000e+00> : vector<8x32xf32>
    %210 = tpu.matmul %23, %209, %cst_107 {dimension_numbers = #tpu.dot_dimension_numbers<[1], [0], [0], [1], [0, 0, 1, 1], [], []>} : vector<8x16xf32>, vector<16x32xf32>, vector<8x32xf32> -> vector<8x32xf32>
    %cst_108 = arith.constant dense<0.000000e+00> : vector<8x32xf32>
    %211 = tpu.matmul %210, %45, %cst_108 {dimension_numbers = #tpu.dot_dimension_numbers<[1], [0], [0], [1], [0, 0, 1, 1], [], []>} : vector<8x32xf32>, vector<32x32xf32>, vector<8x32xf32> -> vector<8x32xf32>
    %cst_109 = arith.constant dense<0.000000e+00> : vector<8x32xf32>
    %212 = tpu.matmul %29, %209, %cst_109 {dimension_numbers = #tpu.dot_dimension_numbers<[1], [0], [0], [1], [0, 0, 1, 1], [], []>} : vector<8x16xf32>, vector<16x32xf32>, vector<8x32xf32> -> vector<8x32xf32>
    %cst_110 = arith.constant dense<0.000000e+00> : vector<8x32xf32>
    %213 = tpu.matmul %212, %47, %cst_110 {dimension_numbers = #tpu.dot_dimension_numbers<[1], [0], [0], [1], [0, 0, 1, 1], [], []>} : vector<8x32xf32>, vector<32x32xf32>, vector<8x32xf32> -> vector<8x32xf32>
    %214 = arith.addf %211, %213 : vector<8x32xf32>
    %cst_111 = arith.constant dense<0.000000e+00> : vector<8x32xf32>
    %215 = tpu.matmul %37, %209, %cst_111 {dimension_numbers = #tpu.dot_dimension_numbers<[1], [0], [0], [1], [0, 0, 1, 1], [], []>} : vector<8x16xf32>, vector<16x32xf32>, vector<8x32xf32> -> vector<8x32xf32>
    %cst_112 = arith.constant dense<0.000000e+00> : vector<8x32xf32>
    %216 = tpu.matmul %215, %49, %cst_112 {dimension_numbers = #tpu.dot_dimension_numbers<[1], [0], [0], [1], [0, 0, 1, 1], [], []>} : vector<8x32xf32>, vector<32x32xf32>, vector<8x32xf32> -> vector<8x32xf32>
    %217 = arith.addf %214, %216 : vector<8x32xf32>
    %218 = vector.broadcast %51 : vector<1x32xf32> to vector<8x32xf32>
    %219 = arith.addf %217, %218 : vector<8x32xf32>
    %cst_113 = arith.constant 5.000000e-01 : f32
    %220 = vector.broadcast %cst_113 : f32 to vector<8x32xf32>
    %221 = arith.mulf %220, %219 : vector<8x32xf32>
    %cst_114 = arith.constant 0.707106769 : f32
    %222 = vector.broadcast %cst_114 : f32 to vector<8x32xf32>
    %223 = arith.mulf %219, %222 : vector<8x32xf32>
    %cst_115 = arith.constant 0.000000e+00 : f32
    %224 = vector.broadcast %cst_115 : f32 to vector<8x32xf32>
    %225 = arith.cmpf olt, %223, %224 : vector<8x32xf32>
    %cst_116 = arith.constant -1.000000e+00 : f32
    %cst_117 = arith.constant 1.000000e+00 : f32
    %226 = vector.broadcast %cst_116 : f32 to vector<8x32xf32>
    %227 = vector.broadcast %cst_117 : f32 to vector<8x32xf32>
    %228 = arith.select %225, %226, %227 : vector<8x32xi1>, vector<8x32xf32>
    %229 = math.absf %223 : vector<8x32xf32>
    %cst_118 = arith.constant 0.327591091 : f32
    %230 = vector.broadcast %cst_118 : f32 to vector<8x32xf32>
    %231 = arith.mulf %230, %229 : vector<8x32xf32>
    %cst_119 = arith.constant 1.000000e+00 : f32
    %232 = vector.broadcast %cst_119 : f32 to vector<8x32xf32>
    %233 = arith.addf %232, %231 : vector<8x32xf32>
    %cst_120 = arith.constant 1.000000e+00 : f32
    %234 = vector.broadcast %cst_120 : f32 to vector<8x32xf32>
    %235 = arith.divf %234, %233 : vector<8x32xf32>
    %cst_121 = arith.constant 1.06140542 : f32
    %236 = vector.broadcast %cst_121 : f32 to vector<8x32xf32>
    %237 = arith.mulf %236, %235 : vector<8x32xf32>
    %cst_122 = arith.constant -1.45315206 : f32
    %238 = vector.broadcast %cst_122 : f32 to vector<8x32xf32>
    %239 = arith.addf %237, %238 : vector<8x32xf32>
    %240 = arith.mulf %239, %235 : vector<8x32xf32>
    %cst_123 = arith.constant 1.42141378 : f32
    %241 = vector.broadcast %cst_123 : f32 to vector<8x32xf32>
    %242 = arith.addf %240, %241 : vector<8x32xf32>
    %243 = arith.mulf %242, %235 : vector<8x32xf32>
    %cst_124 = arith.constant -0.284496725 : f32
    %244 = vector.broadcast %cst_124 : f32 to vector<8x32xf32>
    %245 = arith.addf %243, %244 : vector<8x32xf32>
    %246 = arith.mulf %245, %235 : vector<8x32xf32>
    %cst_125 = arith.constant 0.254829586 : f32
    %247 = vector.broadcast %cst_125 : f32 to vector<8x32xf32>
    %248 = arith.addf %246, %247 : vector<8x32xf32>
    %249 = arith.mulf %248, %235 : vector<8x32xf32>
    %cst_126 = arith.constant 0.000000e+00 : f32
    %250 = vector.broadcast %cst_126 : f32 to vector<8x32xf32>
    %251 = arith.subf %250, %229 : vector<8x32xf32>
    %252 = arith.mulf %251, %229 : vector<8x32xf32>
    %253 = math.exp %252 : vector<8x32xf32>
    %254 = arith.mulf %249, %253 : vector<8x32xf32>
    %cst_127 = arith.constant 1.000000e+00 : f32
    %255 = vector.broadcast %cst_127 : f32 to vector<8x32xf32>
    %256 = arith.subf %255, %254 : vector<8x32xf32>
    %257 = arith.mulf %228, %256 : vector<8x32xf32>
    %cst_128 = arith.constant 1.000000e+00 : f32
    %258 = vector.broadcast %cst_128 : f32 to vector<8x32xf32>
    %259 = arith.addf %258, %257 : vector<8x32xf32>
    %260 = arith.mulf %221, %259 : vector<8x32xf32>
    %261 = arith.addf %260, %52 : vector<8x32xf32>
    %c8 = arith.constant 8 : index
    %c0_129 = arith.constant 0 : index
    %262 = vector.load %arg6[%c8, %c0_129] : memref<16x32xf32, #tpu.memory_space<vmem>>, vector<8x32xf32>
    tpu.vector_store %arg6[%c8, %c0_129], %261 {strides = array<i32>} : memref<16x32xf32, #tpu.memory_space<vmem>>, vector<8x32xf32>,
    return
  }
}

</mosaic_0001>

<bundles_post_ra>
// kernel: whisper_encoder_forward.2
= control target key start
LH: loop header
LB: loop body
LE: loop exit
PB: predicated region body
PF: predicated region fallthrough
CT: control target
= control target key end

     0   :  { %11 = vsyncpa [#allocation3], 0  ;;  %s2316_s21 = smov [#allocation2]   ;;  %s2673_s0 = inlined_call_operand.vmem [shape: f32[2,16,16], index: 0, kind: input, shape index: {}]   ;;  %s2674_s1 = inlined_call_operand.vmem [shape: f32[3,16,32], index: 1, kind: input, shape index: {}]   ;;  %s2675_s2 = inlined_call_operand.vmem [shape: f32[1,32], index: 2, kind: input, shape index: {}]   ;;  %s2676_s3 = inlined_call_operand.hbm [shape: f32[3,32,32], index: 3, kind: input, shape index: {}]   ;;  %s2677_s4 = inlined_call_operand.vmem [shape: f32[1,32], index: 4, kind: input, shape index: {}]   ;;  %s2678_s5 = inlined_call_operand.vmem [shape: f32[8,32], index: 5, kind: input, shape index: {}]   ;;  %s2679_s6 = inlined_call_operand.vmem [shape: f32[16,32], index: 6, kind: output, shape index: {}]  }
   0x1   :  { %s23_s22 = sshll.u32 %s2316_s21, 4  ;;  %s24_s22 = int_to_ptr.vmem [resolvable:$true] %s23_s22 }
   0x2   :  { %s2302_s23 = scalar_lea.vmem %s24_s22, 1536  ;;  %p2307_p1 = scmp.lt.s32.totalorder %s24_s22, %s24_s22 }
   0x3   :  { %p2303_p0 = scmp.ne.s32.totalorder %s24_s22, %s2302_s23  ;;  %p2308_p2 = scmp.lt.s32.totalorder %s2302_s23, %s2302_s23 }
   0x5   :  { %p2309_p3 = por %p2308_p2, %p2307_p1 }
   0x7   :  { %p2310_p4 = pnand %p2309_p3, %p2303_p0 }
   0x9   :  { %2313 = shalt.err (!%p2310_p4)
}
   0xa   :  { %s2317_s24 = smov 128   ;;  %s2318_s25 = smov 8  }
   0xb   :  { %29 = dma.hbm_to_vmem [thread:$0]  %s2676_s3, 1536, %s24_s22, [#allocation3], %s2317_s24, %s2317_s24, %s2318_s25  }
   0xc   :  { %2314 = dma.done.wait [#allocation3], 1536  }
   0xd   :  { %2315 = vsyncadd [#allocation3], 4294965760  ;;  %v37_v0 = vlaneseq  ;;  %vm90_vm0 = vcmask 130048   ;;  %v89_v6 = vld [vmem:[%s2673_s0 + $0x8] sm:$0xff]  ;;  %v88_v7 = vld [vmem:[%s2673_s0] sm:$0xff]  ;;  %v2319_v8 = vmov 0.0  }
   0xe   :  { %2086 = vmatprep.subr.mxu1 %v89_v6  ;;  %v2386_v12 = vld [vmem:[%s2674_s1 + $0x18] sm:$0xff]  ;;  %v2391_v14 = vld [vmem:[%s2674_s1 + $0x10] sm:$0xff]  ;;  %v2417_v17 = vld [vmem:[%s2674_s1 + $0x8] sm:$0xff]  ;;  %vm2320_vm5 = vmmov 0   ;;  %vm706_vm10 = vcmask 261120  }
   0xf   :  { %v2360_v1 = vshrl.u32 %v37_v0, 7  ;;  %v2362_v2 = vand.u32 127, %v37_v0  ;;  %2087 = vmatpush3.msra.mxu1 %v89_v6  ;;  %2100 = vmatprep.subr.mxu0 %v2417_v17  ;;  %v2424_v18 = vld [vmem:[%s2674_s1] sm:$0xff]  ;;  %v2431_v19 = vld [vmem:[%s2674_s1 + $0x28] sm:$0xff] }
  0x10   :  { %2088 = vmatprep.subr.mxu1 %v88_v7  ;;  %2101 = vmatpush3.msra.mxu0 %v2417_v17  ;;  %v2438_v22 = vld [vmem:[%s2674_s1 + $0x20] sm:$0xff] }
  0x11   :  { %v1955_v3 = vadd.s32 4294967295, %v2360_v1  ;;  %v39_v4 = vadd.s32 8, %v2360_v1  ;;  %v48_v10 = vadd.s32 1, %v2360_v1  ;;  %2089 = vmatpush3.msra.mxu1 %v88_v7  ;;  %2102 = vmatprep.subr.mxu0 %v2424_v18  ;;  %v2454_v30 = vld [vmem:[%s2675_s2] ss:$0 sm:$0xff] }
  0x12   :  { %2093 = vmatprep.subr.mxu1 %v2386_v12  ;;  %2103 = vmatpush3.msra.mxu0 %v2424_v18 }
  0x13   :  { %vm44_vm1 = vcmp.eq.s32.totalorder %v2362_v2, %v1955_v3  ;;  %v1956_v5 = vadd.s32 4294967295, %v39_v4  ;;  %v49_v13 = vadd.s32 1, %v39_v4  ;;  %vm50_vm3 = vcmp.eq.s32.totalorder %v2362_v2, %v48_v10  ;;  %2114 = vmatprep.subr.mxu0 %v2431_v19 }
  0x14   :  { %v2374_v9 = vsel %vm44_vm1, 1.0, %v2319_v8  ;;  %v2401_v15 = vsel %vm50_vm3, 1.0, %v2319_v8 }
  0x15   :  { %2090 = vmatprep.mubr.msk.f32.mxu1 %vm90_vm0, %v2374_v9  ;;  %vm45_vm2 = vcmp.eq.s32.totalorder %v2362_v2, %v1956_v5  ;;  %vm51_vm4 = vcmp.eq.s32.totalorder %v2362_v2, %v49_v13 }
  0x16   :  { %v2381_v11 = vsel %vm45_vm2, 1.0, %v2319_v8  ;;  %v2409_v16 = vsel %vm51_vm4, 1.0, %v2319_v8 }
  0x17   :  { %2091 = vmatmul.mubr.msk.f32.vlgmr.msra.gmra.mxu1 %vm90_vm0, %v2381_v11 }
  0x18   :  { %2094 = vmatpush3.msra.mxu1 %v2386_v12  ;;  %2097 = vmatprep.mubr.msk.f32.mxu1 %vm90_vm0, %v88_v7 }
  0x19   :  { %2095 = vmatprep.subr.mxu1 %v2391_v14 }
  0x1a   :  { %2096 = vmatpush3.msra.mxu1 %v2391_v14 }
  0x1b   :  { %2098 = vmatmul.mubr.msk.f32.vlgmr.msra.gmra.mxu1 %vm90_vm0, %v89_v6  ;;  %2107 = vmatprep.subr.mxu1 %v89_v6 }
  0x1c   :  { %2108 = vmatpush3.msra.mxu1 %v89_v6  ;;  %2111 = vmatprep.mubr.msk.f32.mxu1 %vm90_vm0, %v2401_v15 }
  0x1d   :  { %2109 = vmatprep.subr.mxu1 %v88_v7 }
  0x1e   :  { %2110 = vmatpush3.msra.mxu1 %v88_v7 }
  0x1f   :  { %2112 = vmatmul.mubr.msk.f32.vlgmr.msra.gmra.mxu1 %vm90_vm0, %v2409_v16  ;;  %2121 = vmatprep.subr.mxu1 %v2319_v8 }
  0x20   :  { %2125 = vmatprep.mubr.msk.f32.mxu1 %vm2320_vm5, %v2319_v8 }
  0xd7   :  { %v2092_v20 = vpop.f32.mrf.mxu1 }
  0xd9   :  { %v163_v21 = vpop.f32.mrf.mxu1 }
  0xda   :  { %2104 = vmatprep.mubr.msk.f32.mxu0 %vm90_vm0, %v163_v21  ;;  %v54_v21 = vmul.u32 2, %v2360_v1 }
  0xdb   :  { %v2099_v23 = vpop.f32.mrf.mxu1  ;;  %2105 = vmatmul.mubr.msk.f32.vlgmr.msra.gmra.mxu0 %vm90_vm0, %v2092_v20 }
  0xdc   :  { %2115 = vmatpush3.msra.mxu0 %v2431_v19  ;;  %vm58_vm9 = vcmp.eq.s32.totalorder %v2362_v2, %v54_v21 }
  0xdd   :  { %v244_v24 = vpop.f32.mrf.mxu1  ;;  %2116 = vmatprep.subr.mxu0 %v2438_v22 }
  0xde   :  { %2117 = vmatpush3.msra.mxu0 %v2438_v22 }
  0xdf   :  { %v2113_v25 = vpop.f32.mrf.mxu1  ;;  %2128 = vmatprep.subr.mxu0 %v2319_v8 }
  0xe1   :  { %v406_v26 = vpop.f32.mrf.mxu1 }
  0xe2   :  { %2118 = vmatprep.mubr.msk.f32.mxu0 %vm90_vm0, %v406_v26  ;;  %v2321_v26 = vmov 1.0  }
  0xe3   :  { %2119 = vmatmul.mubr.msk.f32.vlgmr.msra.gmra.mxu0 %vm90_vm0, %v2113_v25 }
  0xe4   :  { %2132 = vmatprep.mubr.msk.f32.mxu0 %vm2320_vm5, %v2319_v8 }
 0x19b   :  { %v2106_v27 = vpop.f32.mrf.mxu0 }
 0x19c   :  { %v331_v29 = vadd.f32 %v2106_v27, %v2099_v23 }
 0x19d   :  { %v325_v28 = vpop.f32.mrf.mxu0 }
 0x19e   :  { %v326_v32 = vadd.f32 %v325_v28, %v244_v24 }
 0x1a3   :  { %v2120_v31 = vpop.f32.mrf.mxu0 }
 0x1a4   :  { %v497_v33 = vadd.f32 %v2120_v31, %v331_v29  ;;  %v1957_v31 = vadd.s32 4294967295, %v54_v21 }
 0x1a5   :  { %v487_v34 = vpop.f32.mrf.mxu0 }
 0x1a6   :  { %v505_v35 = vadd.f32 %v2454_v30, %v497_v33  ;;  %v496_v36 = vadd.f32 %v487_v34, %v326_v32  ;;  %vm56_vm8 = vcmp.eq.s32.totalorder %v2362_v2, %v1957_v31 }
 0x1a8   :  { %v509_v37 = vmul.f32 0.70710677, %v505_v35  ;;  %v504_v38 = vadd.f32 %v2454_v30, %v496_v36  ;;  %v507_v33 = vmul.f32 0.5, %v505_v35  ;;  %v2466_v35 = vsel %vm56_vm8, 1.0, %v2319_v8 }
 0x1aa   :  { %v515_v39 = vand.u32 2147483647, %v509_v37  ;;  %v508_v40 = vmul.f32 0.70710677, %v504_v38  ;;  %vm511_vm6 = vcmp.lt.f32.partialorder %v509_v37, 0.0  ;;  %v506_v1 = vmul.f32 0.5, %v504_v38 }
 0x1ab   :  { %v513_v27 = vsel %vm511_vm6, -1.0, %v2321_v26  ;;  %v2481_v38 = vld [vmem:[#allocation2 + $0x30] sm:$0xff] }
 0x1ac   :  { %v517_v41 = vmul.f32 0.3275911, %v515_v39  ;;  %v514_v42 = vand.u32 2147483647, %v508_v40  ;;  %v543_v46 = vsub.f32 0.0, %v515_v39  ;;  %vm510_vm7 = vcmp.lt.f32.partialorder %v508_v40, 0.0 }
 0x1ad   :  { %v512_v36 = vsel %vm510_vm7, -1.0, %v2321_v26  ;;  %v2469_v40 = vsel %vm58_vm9, 1.0, %v2319_v8 }
 0x1ae   :  { %v519_v43 = vadd.f32 1.0, %v517_v41  ;;  %v516_v44 = vmul.f32 0.3275911, %v514_v42  ;;  %v542_v47 = vsub.f32 0.0, %v514_v42  ;;  %v545_v48 = vmul.f32 %v543_v46, %v515_v39  ;;  %v2489_v46 = vld [vmem:[#allocation2 + $0x28] sm:$0xff] }
 0x1b0   :  { %2270 = vrcp.f32 %v519_v43  ;;  %v518_v45 = vadd.f32 1.0, %v516_v44  ;;  %v544_v50 = vmul.f32 %v542_v47, %v514_v42  ;;  %v548_v52 = vmul.f32 1.442695, %v545_v48  ;;  %v2471_v43 = vld [vmem:[#allocation2 + $0x38] sm:$0xff]  ;;  %v2491_v47 = vld [vmem:[#allocation2 + $0x8] sm:$0xff]  ;;  %v2497_v48 = vld [vmem:[#allocation2 + $0x20] sm:$0xff] }
 0x1b1   :  { %v2473_v44 = vld [vmem:[#allocation2 + $0x18] sm:$0xff] }
 0x1b2   :  { %2272 = vrcp.f32 %v518_v45  ;;  %v546_v56 = vmul.f32 1.442695, %v544_v50  ;;  %v2483_v45 = vld [vmem:[#allocation2 + $0x10] sm:$0xff]  ;;  %v60_v50 = vadd.s32 1, %v54_v21 }
 0x1b3   :  { %2274 = vpow2.f32 %v548_v52 }
 0x1b4   :  { %2276 = vpow2.f32 %v546_v56  ;;  %vm61_vm11 = vcmp.eq.s32.totalorder %v2362_v2, %v60_v50  ;;  %v1981_v2 = vld [vmem:[%s2673_s0 + $0x18] sm:$0xff] }
 0x1bd   :  { %v2271_v49 = vpop.eup %2270 }
 0x1be   :  { %v525_v51 = vmul.f32 1.0614054, %v2271_v49 }
 0x1bf   :  { %v2273_v53 = vpop.eup %2272 }
 0x1c0   :  { %v527_v54 = vadd.f32 -1.4531521, %v525_v51  ;;  %v524_v55 = vmul.f32 1.0614054, %v2273_v53  ;;  %v2275_v10 = vpop.eup %2274 }
 0x1c1   :  { %v2277_v24 = vpop.eup %2276 }
 0x1c2   :  { %v529_v57 = vmul.f32 %v2271_v49, %v527_v54  ;;  %v526_v58 = vadd.f32 -1.4531521, %v524_v55  ;;  %v2521_v55 = vsel %vm61_vm11, 1.0, %v2319_v8 }
 0x1c4   :  { %v531_v59 = vadd.f32 1.4214138, %v529_v57  ;;  %v528_v60 = vmul.f32 %v2273_v53, %v526_v58  ;;  %v1980_v57 = vld [vmem:[%s2673_s0 + $0x10] sm:$0xff] }
 0x1c6   :  { %v533_v61 = vmul.f32 %v2271_v49, %v531_v59  ;;  %v530_v62 = vadd.f32 1.4214138, %v528_v60 }
 0x1c8   :  { %v535_v63 = vadd.f32 -0.28449672, %v533_v61  ;;  %v532_v0 = vmul.f32 %v2273_v53, %v530_v62 }
 0x1ca   :  { %v537_v3 = vmul.f32 %v2271_v49, %v535_v63  ;;  %v534_v4 = vadd.f32 -0.28449672, %v532_v0 }
 0x1cc   :  { %v539_v5 = vadd.f32 0.2548296, %v537_v3  ;;  %v536_v6 = vmul.f32 %v2273_v53, %v534_v4 }
 0x1ce   :  { %v541_v7 = vmul.f32 %v2271_v49, %v539_v5  ;;  %v538_v13 = vadd.f32 0.2548296, %v536_v6  ;;  %v2509_v49 = vld [vmem:[#allocation2] sm:$0xff] }
 0x1d0   :  { %v551_v20 = vmul.f32 %v2275_v10, %v541_v7  ;;  %v540_v23 = vmul.f32 %v2273_v53, %v538_v13  ;;  %v2514_v53 = vld [vmem:[#allocation2 + $0x58] sm:$0xff] }
 0x1d2   :  { %v553_v25 = vsub.f32 1.0, %v551_v20  ;;  %v550_v28 = vmul.f32 %v2277_v24, %v540_v23 }
 0x1d4   :  { %v555_v29 = vmul.f32 %v553_v25, %v513_v27  ;;  %v552_v32 = vsub.f32 1.0, %v550_v28 }
 0x1d6   :  { %v557_v34 = vadd.f32 1.0, %v555_v29  ;;  %v554_v39 = vmul.f32 %v552_v32, %v512_v36 }
 0x1d8   :  { %v559_v37 = vmul.f32 %v557_v34, %v507_v33  ;;  %v556_v41 = vadd.f32 1.0, %v554_v39 }
 0x1da   :  { %2122 = vmatpush3.msra.mxu1 %v559_v37  ;;  %2129 = vmatpush3.msra.mxu0 %v559_v37  ;;  %v558_v42 = vmul.f32 %v556_v41, %v506_v1 }
 0x1db   :  { %2123 = vmatprep.subr.mxu1 %v2319_v8  ;;  %2130 = vmatprep.subr.mxu0 %v2319_v8 }
 0x1dc   :  { %2124 = vmatpush3.msra.mxu1 %v558_v42  ;;  %2131 = vmatpush3.msra.mxu0 %v558_v42 }
 0x1dd   :  { %2126 = vmatmul.mubr.msk.f32.vlgmr.msra.gmra.mxu1 %vm90_vm0, %v2466_v35  ;;  %2133 = vmatmul.mubr.msk.f32.vlgmr.msra.gmra.mxu0 %vm90_vm0, %v2469_v40 }
 0x1de   :  { %2135 = vmatprep.subr.mxu1 %v2319_v8  ;;  %2146 = vmatprep.subr.mxu0 %v2319_v8 }
 0x1df   :  { %2136 = vmatpush3.msra.mxu1 %v2471_v43  ;;  %2147 = vmatpush3.msra.mxu0 %v2473_v44 }
 0x1e0   :  { %2137 = vmatprep.subr.mxu1 %v2319_v8  ;;  %2148 = vmatprep.subr.mxu0 %v2319_v8 }
 0x1e1   :  { %2138 = vmatpush3.msra.mxu1 %v2481_v38  ;;  %2149 = vmatpush3.msra.mxu0 %v2483_v45 }
 0x1e2   :  { %2139 = vmatprep.subr.mxu1 %v2319_v8  ;;  %2150 = vmatprep.subr.mxu0 %v2319_v8 }
 0x1e3   :  { %2140 = vmatpush3.msra.mxu1 %v2489_v46  ;;  %2151 = vmatpush3.msra.mxu0 %v2491_v47 }
 0x1e4   :  { %2141 = vmatprep.subr.mxu1 %v2319_v8  ;;  %2152 = vmatprep.subr.mxu0 %v2319_v8 }
 0x1e5   :  { %2142 = vmatpush3.msra.mxu1 %v2497_v48  ;;  %2143 = vmatprep.mubr.msk.f32.mxu1 %vm2320_vm5, %v2319_v8 }
 0x1e6   :  { %2154 = vmatprep.mubr.msk.f32.mxu0 %vm2320_vm5, %v2319_v8  ;;  %2157 = vmatprep.subr.mxu1 %v2319_v8 }
 0x1e7   :  { %2153 = vmatpush3.msra.mxu0 %v2509_v49 }
 0x1e8   :  { %2164 = vmatprep.subr.mxu0 %v2319_v8 }
 0x29d   :  { %v629_v51 = vpop.f32.mrf.mxu1  ;;  %v702_v52 = vpop.f32.mrf.mxu0 }
 0x29e   :  { %2144 = vmatmul.mubr.msk.f32.vlgmr.msra.gmra.mxu1 %vm706_vm10, %v702_v52  ;;  %2155 = vmatmul.mubr.msk.f32.vlgmr.msra.gmra.mxu0 %vm706_vm10, %v629_v51 }
 0x29f   :  { %2158 = vmatpush3.msra.mxu1 %v559_v37  ;;  %v2134_v54 = vpop.f32.mrf.mxu0  ;;  %2161 = vmatprep.mubr.msk.f32.mxu1 %vm2320_vm5, %v2319_v8  ;;  %v2127_v56 = vpop.f32.mrf.mxu1 }
 0x2a0   :  { %2159 = vmatprep.subr.mxu1 %v2319_v8  ;;  %2165 = vmatpush3.msra.mxu0 %v2514_v53 }
 0x2a1   :  { %2160 = vmatpush3.msra.mxu1 %v558_v42  ;;  %2166 = vmatprep.subr.mxu0 %v2319_v8 }
 0x2a2   :  { %2162 = vmatmul.mubr.msk.f32.vlgmr.msra.gmra.mxu1 %vm90_vm0, %v2521_v55  ;;  %2175 = vmatprep.subr.mxu1 %v1981_v2 }
 0x2a3   :  { %2176 = vmatpush3.msra.mxu1 %v1981_v2  ;;  %2179 = vmatprep.mubr.msk.f32.mxu1 %vm90_vm0, %v2374_v9  ;;  %v2553_v9 = vld [vmem:[#allocation2 + $0x50] sm:$0xff] }
 0x2a4   :  { %2177 = vmatprep.subr.mxu1 %v1980_v57  ;;  %2172 = vmatprep.mubr.msk.f32.mxu0 %vm2320_vm5, %v2319_v8 }
 0x2a5   :  { %2178 = vmatpush3.msra.mxu1 %v1980_v57  ;;  %2167 = vmatpush3.msra.mxu0 %v2553_v9 }
 0x2a6   :  { %2180 = vmatmul.mubr.msk.f32.vlgmr.msra.gmra.mxu1 %vm90_vm0, %v2381_v11  ;;  %2182 = vmatprep.subr.mxu1 %v2386_v12  ;;  %v2557_v11 = vld [vmem:[#allocation2 + $0x48] sm:$0xff] }
 0x2a7   :  { %2183 = vmatpush3.msra.mxu1 %v2386_v12  ;;  %2186 = vmatprep.mubr.msk.f32.mxu1 %vm90_vm0, %v1980_v57  ;;  %v2561_v12 = vld [vmem:[#allocation2 + $0x40] sm:$0xff] }
 0x2a8   :  { %2184 = vmatprep.subr.mxu1 %v2391_v14  ;;  %2168 = vmatprep.subr.mxu0 %v2319_v8 }
 0x2a9   :  { %2185 = vmatpush3.msra.mxu1 %v2391_v14  ;;  %2169 = vmatpush3.msra.mxu0 %v2557_v11 }
 0x2aa   :  { %2187 = vmatmul.mubr.msk.f32.vlgmr.msra.gmra.mxu1 %vm90_vm0, %v1981_v2  ;;  %2196 = vmatprep.subr.mxu1 %v1981_v2 }
 0x2ab   :  { %2197 = vmatpush3.msra.mxu1 %v1981_v2  ;;  %2200 = vmatprep.mubr.msk.f32.mxu1 %vm90_vm0, %v2401_v15 }
 0x2ac   :  { %2198 = vmatprep.subr.mxu1 %v1980_v57  ;;  %2170 = vmatprep.subr.mxu0 %v2319_v8 }
 0x2ad   :  { %2199 = vmatpush3.msra.mxu1 %v1980_v57  ;;  %2171 = vmatpush3.msra.mxu0 %v2561_v12 }
 0x2ae   :  { %2201 = vmatmul.mubr.msk.f32.vlgmr.msra.gmra.mxu1 %vm90_vm0, %v2409_v16  ;;  %2210 = vmatprep.subr.mxu1 %v2319_v8 }
 0x2af   :  { %2214 = vmatprep.mubr.msk.f32.mxu1 %vm2320_vm5, %v2319_v8  ;;  %2189 = vmatprep.subr.mxu0 %v2417_v17 }
 0x35e   :  { %v776_v14 = vpop.f32.mrf.mxu1  ;;  %v849_v15 = vpop.f32.mrf.mxu0 }
 0x35f   :  { %v850_v16 = vadd.f32 %v849_v15, %v776_v14 }
 0x360   :  { %v2145_v58 = vpop.f32.mrf.mxu1  ;;  %v2156_v59 = vpop.f32.mrf.mxu0 }
 0x362   :  { %v922_v60 = vpop.f32.mrf.mxu1 }
 0x363   :  { %2173 = vmatmul.mubr.msk.f32.vlgmr.msra.gmra.mxu0 %vm706_vm10, %v922_v60 }
 0x364   :  { %v2163_v61 = vpop.f32.mrf.mxu1  ;;  %2190 = vmatpush3.msra.mxu0 %v2417_v17 }
 0x365   :  { %2191 = vmatprep.subr.mxu0 %v2424_v18 }
 0x366   :  { %v2181_v62 = vpop.f32.mrf.mxu1  ;;  %2192 = vmatpush3.msra.mxu0 %v2424_v18  ;;  %v2583_v18 = vld [vmem:[%s2677_s4] ss:$0 sm:$0xff] }
 0x367   :  { %2203 = vmatprep.subr.mxu0 %v2431_v19 }
 0x368   :  { %v1105_v63 = vpop.f32.mrf.mxu1 }
 0x369   :  { %2193 = vmatprep.mubr.msk.f32.mxu0 %vm90_vm0, %v1105_v63 }
 0x36a   :  { %v2188_v0 = vpop.f32.mrf.mxu1  ;;  %2194 = vmatmul.mubr.msk.f32.vlgmr.msra.gmra.mxu0 %vm90_vm0, %v2181_v62 }
 0x36b   :  { %2204 = vmatpush3.msra.mxu0 %v2431_v19 }
 0x36c   :  { %v1186_v3 = vpop.f32.mrf.mxu1  ;;  %2205 = vmatprep.subr.mxu0 %v2438_v22 }
 0x36d   :  { %2206 = vmatpush3.msra.mxu0 %v2438_v22 }
 0x36e   :  { %v2202_v17 = vpop.f32.mrf.mxu1  ;;  %2217 = vmatprep.subr.mxu0 %v2319_v8 }
 0x370   :  { %v1342_v4 = vpop.f32.mrf.mxu1 }
 0x371   :  { %2207 = vmatprep.mubr.msk.f32.mxu0 %vm90_vm0, %v1342_v4 }
 0x372   :  { %2208 = vmatmul.mubr.msk.f32.vlgmr.msra.gmra.mxu0 %vm90_vm0, %v2202_v17 }
 0x373   :  { %2221 = vmatprep.mubr.msk.f32.mxu0 %vm2320_vm5, %v2319_v8 }
 0x423   :  { %v995_v19 = vpop.f32.mrf.mxu0 }
 0x424   :  { %v999_v5 = vadd.f32 %v995_v19, %v850_v16 }
 0x425   :  { %v2174_v6 = vpop.f32.mrf.mxu0 }
 0x426   :  { %v2586_v22 = vadd.f32 %v2583_v18, %v999_v5 }
 0x428   :  { %v1008_v7 = vmul.f32 0.70710677, %v2586_v22 }
 0x42a   :  { %v1011_v10 = vand.u32 2147483647, %v1008_v7  ;;  %v2195_v20 = vpop.f32.mrf.mxu0  ;;  %vm1009_vm12 = vcmp.lt.f32.partialorder %v1008_v7, 0.0  ;;  %v2608_v7 = vld [vmem:[%s2678_s5] sm:$0xff] }
 0x42b   :  { %v1273_v24 = vadd.f32 %v2195_v20, %v2188_v0 }
 0x42c   :  { %v1012_v13 = vmul.f32 0.3275911, %v1011_v10  ;;  %v1267_v23 = vpop.f32.mrf.mxu0  ;;  %v1025_v31 = vsub.f32 0.0, %v1011_v10 }
 0x42d   :  { %v1268_v27 = vadd.f32 %v1267_v23, %v1186_v3 }
 0x42e   :  { %v1013_v21 = vadd.f32 1.0, %v1012_v13  ;;  %v1026_v39 = vmul.f32 %v1025_v31, %v1011_v10 }
 0x430   :  { %2278 = vrcp.f32 %v1013_v21  ;;  %v1027_v51 = vmul.f32 1.442695, %v1026_v39 }
 0x432   :  { %v2209_v25 = vpop.f32.mrf.mxu0 }
 0x433   :  { %v1433_v28 = vadd.f32 %v2209_v25, %v1273_v24  ;;  %v1010_v25 = vsel %vm1009_vm12, -1.0, %v2321_v26 }
 0x434   :  { %v1423_v29 = vpop.f32.mrf.mxu0 }
 0x435   :  { %v2590_v32 = vadd.f32 %v2454_v30, %v1433_v28  ;;  %v1432_v33 = vadd.f32 %v1423_v29, %v1268_v27 }
 0x437   :  { %v2593_v34 = vmul.f32 0.70710677, %v2590_v32  ;;  %v2596_v36 = vadd.f32 %v2454_v30, %v1432_v33  ;;  %v1007_v33 = vmul.f32 0.5, %v2586_v22 }
 0x439   :  { %v1445_v37 = vand.u32 2147483647, %v2593_v34  ;;  %v2600_v1 = vmul.f32 0.70710677, %v2596_v36  ;;  %vm1441_vm13 = vcmp.lt.f32.partialorder %v2593_v34, 0.0  ;;  %v1436_v34 = vmul.f32 0.5, %v2596_v36 }
 0x43b   :  { %v1447_v41 = vmul.f32 0.3275911, %v1445_v37  ;;  %v1444_v42 = vand.u32 2147483647, %v2600_v1  ;;  %v1473_v15 = vsub.f32 0.0, %v1445_v37  ;;  %vm1440_vm14 = vcmp.lt.f32.partialorder %v2600_v1, 0.0 }
 0x43d   :  { %v2279_v50 = vpop.eup %2278  ;;  %v1449_v52 = vadd.f32 1.0, %v1447_v41  ;;  %v1446_v54 = vmul.f32 0.3275911, %v1444_v42  ;;  %v1472_v59 = vsub.f32 0.0, %v1444_v42  ;;  %v1475_v60 = vmul.f32 %v1473_v15, %v1445_v37 }
 0x43e   :  { %v1016_v2 = vmul.f32 1.0614054, %v2279_v50 }
 0x43f   :  { %2280 = vrcp.f32 %v1449_v52  ;;  %v1448_v56 = vadd.f32 1.0, %v1446_v54  ;;  %v1474_v0 = vmul.f32 %v1472_v59, %v1444_v42  ;;  %v1478_v17 = vmul.f32 1.442695, %v1475_v60 }
 0x440   :  { %v1017_v57 = vadd.f32 -1.4531521, %v1016_v2  ;;  %2282 = vpow2.f32 %v1027_v51  ;;  %v1443_v59 = vsel %vm1441_vm13, -1.0, %v2321_v26 }
 0x441   :  { %2284 = vrcp.f32 %v1448_v56  ;;  %v1476_v20 = vmul.f32 1.442695, %v1474_v0  ;;  %v1437_v0 = vmul.f32 0.5, %v2590_v32 }
 0x442   :  { %v1018_v30 = vmul.f32 %v2279_v50, %v1017_v57  ;;  %2286 = vpow2.f32 %v1478_v17 }
 0x443   :  { %2288 = vpow2.f32 %v1476_v20 }
 0x444   :  { %v1019_v14 = vadd.f32 1.4214138, %v1018_v30 }
 0x446   :  { %v1020_v16 = vmul.f32 %v2279_v50, %v1019_v14 }
 0x448   :  { %v1021_v58 = vadd.f32 -0.28449672, %v1020_v16 }
 0x44a   :  { %v1022_v61 = vmul.f32 %v2279_v50, %v1021_v58 }
 0x44c   :  { %v2281_v62 = vpop.eup %2280  ;;  %v1023_v63 = vadd.f32 0.2548296, %v1022_v61 }
 0x44d   :  { %v1455_v3 = vmul.f32 1.0614054, %v2281_v62  ;;  %v2283_v4 = vpop.eup %2282 }
 0x44e   :  { %v1024_v19 = vmul.f32 %v2279_v50, %v1023_v63  ;;  %v2285_v5 = vpop.eup %2284 }
 0x44f   :  { %v1457_v6 = vadd.f32 -1.4531521, %v1455_v3  ;;  %v1454_v13 = vmul.f32 1.0614054, %v2285_v5  ;;  %v2287_v57 = vpop.eup %2286 }
 0x450   :  { %v1029_v10 = vmul.f32 %v2283_v4, %v1024_v19  ;;  %v2289_v16 = vpop.eup %2288 }
 0x451   :  { %v1459_v21 = vmul.f32 %v2281_v62, %v1457_v6  ;;  %v1456_v24 = vadd.f32 -1.4531521, %v1454_v13 }
 0x452   :  { %v1030_v23 = vsub.f32 1.0, %v1029_v10 }
 0x453   :  { %v1461_v27 = vadd.f32 1.4214138, %v1459_v21  ;;  %v1458_v29 = vmul.f32 %v2285_v5, %v1456_v24 }
 0x454   :  { %v1031_v28 = vmul.f32 %v1030_v23, %v1010_v25 }
 0x455   :  { %v1463_v31 = vmul.f32 %v2281_v62, %v1461_v27  ;;  %v1460_v37 = vadd.f32 1.4214138, %v1458_v29 }
 0x456   :  { %v1032_v39 = vadd.f32 1.0, %v1031_v28 }
 0x457   :  { %v1465_v41 = vadd.f32 -0.28449672, %v1463_v31  ;;  %v1462_v50 = vmul.f32 %v2285_v5, %v1460_v37 }
 0x458   :  { %v1033_v42 = vmul.f32 %v1032_v39, %v1007_v33 }
 0x459   :  { %v1467_v51 = vmul.f32 %v2281_v62, %v1465_v41  ;;  %v1464_v54 = vadd.f32 -0.28449672, %v1462_v50 }
 0x45a   :  { %v1034_v52 = vadd.f32 %v1033_v42, %v2608_v7 }
 0x45b   :  { %v1469_v2 = vadd.f32 0.2548296, %v1467_v51  ;;  %v1466_v22 = vmul.f32 %v2285_v5, %v1464_v54 }
 0x45c   :  { %1035 = vst.msk [vmem:[%s2679_s6] sm:$0xff] %vm706_vm10, %v1034_v52 }
 0x45d   :  { %v1471_v56 = vmul.f32 %v2281_v62, %v1469_v2  ;;  %v1468_v30 = vadd.f32 0.2548296, %v1466_v22  ;;  %v1442_v62 = vsel %vm1440_vm14, -1.0, %v2321_v26 }
 0x45f   :  { %v1481_v14 = vmul.f32 %v2287_v57, %v1471_v56  ;;  %v1470_v15 = vmul.f32 %v2285_v5, %v1468_v30 }
 0x461   :  { %v1483_v58 = vsub.f32 1.0, %v1481_v14  ;;  %v1480_v60 = vmul.f32 %v2289_v16, %v1470_v15 }
 0x463   :  { %v1485_v61 = vmul.f32 %v1483_v58, %v1443_v59  ;;  %v1482_v63 = vsub.f32 1.0, %v1480_v60 }
 0x465   :  { %v1487_v3 = vadd.f32 1.0, %v1485_v61  ;;  %v1484_v17 = vmul.f32 %v1482_v63, %v1442_v62 }
 0x467   :  { %v1489_v4 = vmul.f32 %v1487_v3, %v1437_v0  ;;  %v1486_v19 = vadd.f32 1.0, %v1484_v17 }
 0x469   :  { %2211 = vmatpush3.msra.mxu1 %v1489_v4  ;;  %2218 = vmatpush3.msra.mxu0 %v1489_v4  ;;  %v1488_v5 = vmul.f32 %v1486_v19, %v1436_v34 }
 0x46a   :  { %2212 = vmatprep.subr.mxu1 %v2319_v8  ;;  %2219 = vmatprep.subr.mxu0 %v2319_v8 }
 0x46b   :  { %2213 = vmatpush3.msra.mxu1 %v1488_v5  ;;  %2220 = vmatpush3.msra.mxu0 %v1488_v5 }
 0x46c   :  { %2222 = vmatmul.mubr.msk.f32.vlgmr.msra.gmra.mxu0 %vm90_vm0, %v2469_v40  ;;  %2215 = vmatmul.mubr.msk.f32.vlgmr.msra.gmra.mxu1 %vm90_vm0, %v2466_v35 }
 0x46d   :  { %2224 = vmatprep.subr.mxu1 %v2319_v8  ;;  %2235 = vmatprep.subr.mxu0 %v2319_v8 }
 0x46e   :  { %2225 = vmatpush3.msra.mxu1 %v2471_v43  ;;  %2236 = vmatpush3.msra.mxu0 %v2473_v44 }
 0x46f   :  { %2226 = vmatprep.subr.mxu1 %v2319_v8  ;;  %2237 = vmatprep.subr.mxu0 %v2319_v8 }
 0x470   :  { %2227 = vmatpush3.msra.mxu1 %v2481_v38  ;;  %2238 = vmatpush3.msra.mxu0 %v2483_v45 }
 0x471   :  { %2228 = vmatprep.subr.mxu1 %v2319_v8  ;;  %2239 = vmatprep.subr.mxu0 %v2319_v8 }
 0x472   :  { %2229 = vmatpush3.msra.mxu1 %v2489_v46  ;;  %2240 = vmatpush3.msra.mxu0 %v2491_v47 }
 0x473   :  { %2230 = vmatprep.subr.mxu1 %v2319_v8  ;;  %2232 = vmatprep.mubr.msk.f32.mxu1 %vm2320_vm5, %v2319_v8 }
 0x474   :  { %2231 = vmatpush3.msra.mxu1 %v2497_v48  ;;  %2241 = vmatprep.subr.mxu0 %v2319_v8 }
 0x475   :  { %2246 = vmatprep.subr.mxu1 %v2319_v8  ;;  %2242 = vmatpush3.msra.mxu0 %v2509_v49 }
 0x476   :  { %2243 = vmatprep.mubr.msk.f32.mxu0 %vm2320_vm5, %v2319_v8  ;;  %2253 = vmatprep.subr.mxu0 %v2319_v8 }
 0x52c   :  { %v1626_v35 = vpop.f32.mrf.mxu0  ;;  %v1556_v40 = vpop.f32.mrf.mxu1 }
 0x52d   :  { %2233 = vmatmul.mubr.msk.f32.vlgmr.msra.gmra.mxu1 %vm706_vm10, %v1626_v35  ;;  %2244 = vmatmul.mubr.msk.f32.vlgmr.msra.gmra.mxu0 %vm706_vm10, %v1556_v40 }
 0x52e   :  { %2247 = vmatpush3.msra.mxu1 %v1489_v4  ;;  %v2223_v43 = vpop.f32.mrf.mxu0  ;;  %2250 = vmatprep.mubr.msk.f32.mxu1 %vm2320_vm5, %v2319_v8  ;;  %v2216_v44 = vpop.f32.mrf.mxu1 }
 0x52f   :  { %2248 = vmatprep.subr.mxu1 %v2319_v8  ;;  %2254 = vmatpush3.msra.mxu0 %v2514_v53 }
 0x530   :  { %2249 = vmatpush3.msra.mxu1 %v1488_v5  ;;  %2255 = vmatprep.subr.mxu0 %v2319_v8 }
 0x531   :  { %2251 = vmatmul.mubr.msk.f32.vlgmr.msra.gmra.mxu1 %vm90_vm0, %v2521_v55  ;;  %2256 = vmatpush3.msra.mxu0 %v2553_v9 }
 0x532   :  { %2257 = vmatprep.subr.mxu0 %v2319_v8  ;;  %2261 = vmatprep.mubr.msk.f32.mxu0 %vm2320_vm5, %v2319_v8 }
 0x533   :  { %2258 = vmatpush3.msra.mxu0 %v2557_v11 }
 0x534   :  { %2259 = vmatprep.subr.mxu0 %v2319_v8 }
 0x535   :  { %2260 = vmatpush3.msra.mxu0 %v2561_v12 }
 0x5ed   :  { %v1699_v38 = vpop.f32.mrf.mxu1  ;;  %v1772_v45 = vpop.f32.mrf.mxu0 }
 0x5ee   :  { %v1773_v46 = vadd.f32 %v1772_v45, %v1699_v38 }
 0x5ef   :  { %v2234_v47 = vpop.f32.mrf.mxu1  ;;  %v2245_v48 = vpop.f32.mrf.mxu0 }
 0x5f1   :  { %v1842_v49 = vpop.f32.mrf.mxu1 }
 0x5f2   :  { %2262 = vmatmul.mubr.msk.f32.vlgmr.msra.gmra.mxu0 %vm706_vm10, %v1842_v49 }
 0x5f3   :  { %v2252_v53 = vpop.f32.mrf.mxu1 }
 0x6b2   :  { %v1915_v55 = vpop.f32.mrf.mxu0 }
 0x6b3   :  { %v1919_v9 = vadd.f32 %v1915_v55, %v1773_v46 }
 0x6b4   :  { %v2263_v32 = vpop.f32.mrf.mxu0 }
 0x6b5   :  { %v1920_v36 = vadd.f32 %v2583_v18, %v1919_v9 }
 0x6b7   :  { %v1922_v1 = vmul.f32 0.70710677, %v1920_v36  ;;  %v1921_v50 = vmul.f32 0.5, %v1920_v36 }
 0x6b9   :  { %v1925_v11 = vand.u32 2147483647, %v1922_v1  ;;  %vm1923_vm15 = vcmp.lt.f32.partialorder %v1922_v1, 0.0 }
 0x6ba   :  { %v1924_v41 = vsel %vm1923_vm15, -1.0, %v2321_v26 }
 0x6bb   :  { %v1926_v6 = vmul.f32 0.3275911, %v1925_v11  ;;  %v1939_v12 = vsub.f32 0.0, %v1925_v11 }
 0x6bd   :  { %v1927_v8 = vadd.f32 1.0, %v1926_v6  ;;  %v1940_v10 = vmul.f32 %v1939_v12, %v1925_v11 }
 0x6bf   :  { %2290 = vrcp.f32 %v1927_v8  ;;  %v1941_v21 = vmul.f32 1.442695, %v1940_v10 }
 0x6c1   :  { %2292 = vpow2.f32 %v1941_v21 }
 0x6cc   :  { %v2291_v13 = vpop.eup %2290 }
 0x6cd   :  { %v1930_v20 = vmul.f32 1.0614054, %v2291_v13 }
 0x6ce   :  { %v2293_v18 = vpop.eup %2292 }
 0x6cf   :  { %v1931_v23 = vadd.f32 -1.4531521, %v1930_v20 }
 0x6d1   :  { %v1932_v24 = vmul.f32 %v2291_v13, %v1931_v23 }
 0x6d3   :  { %v1933_v25 = vadd.f32 1.4214138, %v1932_v24 }
 0x6d5   :  { %v1934_v27 = vmul.f32 %v2291_v13, %v1933_v25 }
 0x6d7   :  { %v1935_v28 = vadd.f32 -0.28449672, %v1934_v27 }
 0x6d9   :  { %v1936_v29 = vmul.f32 %v2291_v13, %v1935_v28 }
 0x6db   :  { %v1937_v31 = vadd.f32 0.2548296, %v1936_v29 }
 0x6dd   :  { %v1938_v33 = vmul.f32 %v2291_v13, %v1937_v31 }
 0x6df   :  { %v1943_v39 = vmul.f32 %v2293_v18, %v1938_v33 }
 0x6e1   :  { %v1944_v37 = vsub.f32 1.0, %v1943_v39 }
 0x6e3   :  { %v1945_v42 = vmul.f32 %v1944_v37, %v1924_v41 }
 0x6e5   :  { %v1946_v51 = vadd.f32 1.0, %v1945_v42 }
 0x6e7   :  { %v1947_v52 = vmul.f32 %v1946_v51, %v1921_v50 }
 0x6e9   :  { %v1948_v54 = vadd.f32 %v1947_v52, %v2608_v7 }
 0x6eb   :  { %1949 = vst.msk [vmem:[%s2679_s6 + $0x8] sm:$0xff] %vm706_vm10, %v1948_v54 }
 0x6ec   :  { %1954 = vsyncpa [#allocation3], 1 }

// kernel: whisper_encoder_forward.3
= control target key start
LH: loop header
LB: loop body
LE: loop exit
PB: predicated region body
PF: predicated region fallthrough
CT: control target
= control target key end

     0   :  { %s3221_s18 = smov 0   ;;  %s3557_s0 = inlined_call_operand.vmem [shape: f32[16,32], index: 0, kind: input, shape index: {}]   ;;  %s3558_s1 = inlined_call_operand.vmem [shape: f32[2,1,32], index: 1, kind: input, shape index: {}]   ;;  %s3559_s2 = inlined_call_operand.vmem [shape: f32[2,1,32], index: 2, kind: input, shape index: {}]   ;;  %s3560_s3 = inlined_call_operand.vmem [shape: f32[2,32,96], index: 3, kind: input, shape index: {}]   ;;  %s3561_s4 = inlined_call_operand.vmem [shape: f32[2,1,96], index: 4, kind: input, shape index: {}]   ;;  %s3562_s5 = inlined_call_operand.vmem [shape: f32[2,32,32], index: 5, kind: input, shape index: {}]   ;;  %s3563_s6 = inlined_call_operand.vmem [shape: f32[2,1,32], index: 6, kind: input, shape index: {}]   ;;  %s3564_s7 = inlined_call_operand.vmem [shape: f32[2,1,32], index: 7, kind: input, shape index: {}]   ;;  %s3565_s8 = inlined_call_operand.vmem [shape: f32[2,1,32], index: 8, kind: input, shape index: {}]   ;;  %s3566_s9 = inlined_call_operand.vmem [shape: f32[2,32,64], index: 9, kind: input, shape index: {}]   ;;  %s3567_s10 = inlined_call_operand.vmem [shape: f32[2,1,64], index: 10, kind: input, shape index: {}]   ;;  %s3568_s11 = inlined_call_operand.vmem [shape: f32[2,64,32], index: 11, kind: input, shape index: {}]   ;;  %s3569_s12 = inlined_call_operand.vmem [shape: f32[2,1,32], index: 12, kind: input, shape index: {}]   ;;  %s3570_s13 = inlined_call_operand.vmem [shape: f32[1,32], index: 13, kind: input, shape index: {}]   ;;  %s3571_s14 = inlined_call_operand.vmem [shape: f32[1,32], index: 14, kind: input, shape index: {}]   ;;  %s3572_s15 = inlined_call_operand.vmem [shape: f32[2,16,32], index: 15, kind: output, shape index: {}]  }
   0x1   :  { %3575 = sst [smem:[#allocation6_spill]] %s3559_s2 }
   0x2   :  { %3576 = sst [smem:[#allocation7_spill]] %s3560_s3 }
   0x3   :  { %3577 = sst [smem:[#allocation8_spill]] %s3562_s5 }
   0x4   :  { %3578 = sst [smem:[#allocation9_spill]] %s3570_s13 }
   0x5   :  { %3579 = sst [smem:[#allocation10_spill]] %s3571_s14 }
   0x6 LB: > { %3580 = sst [smem:[#allocation4_spill]] %s3122_s18  ;;  %s3227_s19 = sadd.s32 4294967295, %s3122_s18   ;;  %s3122_s18 = sphi %s3221_s18, %s25_s18  }
   0x7   : > { %p2784_p0 = scmp.ge.s32.totalorder %s3122_s18, 1  ;;  %p531_p1 = scmp.lt.s32.totalorder %s3122_s18, 3 }
   0x9   : > { %p532_p2 = pnand %p2784_p0, %p531_p1 }
   0xb   : > { %535 = sbr.rel (%p532_p2) target bundleno = 2836 (0xb14), region = 80 }
  0x10   : > { %p618_p3 = scmp.lt.s32.totalorder %s3227_s19, 1  ;;  %s3582_s3 = sld [smem:[#allocation7_spill]] }
  0x11   : > { %s3583_s5 = sld [smem:[#allocation8_spill]]  ;;  %p2795_p4 = scmp.ne.s32.totalorder %s3227_s19, 0 }
  0x12   : > { %s3233_s20 = scalar_select %p618_p3, %s3227_s19, 1 }
  0x14   : > { %s2842_s27 = sshll.u32 %s3233_s20, 5  ;;  %s661_s28 = scalar_lea.vmem %s3569_s12, %s3233_s20 }
  0x15   : > { %s2846_s29 = sshll.u32 %s3233_s20, 4  ;;  %670 = sbr.rel (%p2795_p4) target bundleno = 28 (0x1c), region = 84 }
  0x16   : > { %s3251_s21 = scalar_lea.vmem %s3582_s3, %s2842_s27  ;;  %s3273_s3 = scalar_lea.vmem %s3566_s9, %s2842_s27 }
  0x17   : > { %s3256_s14 = scalar_lea.vmem %s3583_s5, %s2842_s27  ;;  %s653_s5 = scalar_lea.vmem %s3567_s10, %s3233_s20 }
  0x18   : > { %3584 = sst [smem:[#allocation5_spill]] %s3256_s14  ;;  %s2845_s14 = sshll.u32 %s3233_s20, 6 }
  0x19   : > { %s3283_s24 = scalar_lea.vmem %s3568_s11, %s2845_s14  ;;  %s3293_s27 = scalar_lea.vmem %s3572_s15, %s2846_s29 }
  0x1a   : > { %v671_v0 = vld [vmem:[%s3557_s0] sm:$0xff]  ;;  %vm673_vm0 = vcmask 261120   ;;  %v672_v1 = vld [vmem:[%s3557_s0 + $0x8] sm:$0xff] }
  0x1b   : > { %674 = vst.msk [vmem:[#allocation2] sm:$0xff] %vm673_vm0, %v671_v0  ;;  %675 = vst.msk [vmem:[#allocation2 + $0x8] sm:$0xff] %vm673_vm0, %v672_v1 }
  0x1c PF: > { %vm680_vm1 = vcmask 261120   ;;  %v727_v16 = vld [vmem:[%s3251_s21 + $0x18] sm:$0xff]  ;;  %v726_v17 = vld [vmem:[%s3251_s21 + $0x10] sm:$0xff]  ;;  %v725_v18 = vld [vmem:[%s3251_s21 + $0x8] sm:$0xff]  ;;  %s3585_s22 = scalar_lea.vmem %s3558_s1, %s3233_s20  ;;  %v3124_v36 = vmov 0.0   ;;  %vm3125_vm2 = vmmov 0   ;;  %s3588_s16 = scalar_lea.vmem %s3561_s4, %s3233_s20 }
  0x1d   : > { %2907 = vmatprep.subr.mxu1 %v727_v16  ;;  %v724_v19 = vld [vmem:[%s3251_s21] sm:$0xff]  ;;  %s3586_s21 = sld [smem:[#allocation6_spill]]  ;;  %2928 = vmatprep.subr.mxu0 %v3124_v36  ;;  %s3126_s17 = smov 88   ;;  %vm821_vm3 = vcmask 64512   ;;  %vm1154_vm4 = vcmask 130112   ;;  %vm1325_vm5 = vcmask 195712  }
  0x1e   : > { %2908 = vmatpush3.msra.mxu1 %v727_v16  ;;  %v2796_v27 = vld [vmem:[%s3585_s22] ss:$0 sm:$0xff]  ;;  %2930 = vmatprep.mubr.msk.f32.mxu0 %vm3125_vm2, %v3124_v36  ;;  %s3127_s14 = smov 96   ;;  %s3128_s18 = smov 112   ;;  %vm1496_vm6 = vcmask 261312   ;;  %vm2475_vm9 = vcmask 523264  }
  0x1f   : > { %2909 = vmatprep.subr.mxu1 %v726_v17  ;;  %v2798_v38 = vld [vmem:[%s3588_s16] ss:$0 sm:$0xff]  ;;  %s3129_s2 = smov 120   ;;  %s3130_s30 = smov 104  }
  0x20   : > { %2910 = vmatpush3.msra.mxu1 %v726_v17  ;;  %s3131_s22 = smov 80   ;;  %s3132_s13 = smov 72  }
  0x21   : > { %2911 = vmatprep.subr.mxu1 %v725_v18  ;;  %s3133_s23 = smov 64   ;;  %s3136_s25 = smov 56  }
  0x22   : > { %v3302_v2 = vld [vmem:[#allocation2] sm:$0xff]  ;;  %v3304_v3 = vld [vmem:[#allocation2 + $0x8] sm:$0xff]  ;;  %2912 = vmatpush3.msra.mxu1 %v725_v18  ;;  %s3589_s29 = sld [smem:[#allocation5_spill]]  ;;  %s3137_s16 = smov 8  }
  0x23   : > { %v681_v4 = vsel %vm680_vm1, %v3302_v2, 0.0  ;;  %v684_v5 = vsel %vm680_vm1, %v3304_v3, 0.0  ;;  %2913 = vmatprep.subr.mxu1 %v724_v19  ;;  %s3587_s26 = scalar_lea.vmem %s3586_s21, %s3233_s20  ;;  %s3134_s21 = smov 48  }
  0x24   : > { %682 = vadd.xlane.f32.xlu0 %v681_v4  ;;  %2914 = vmatpush3.msra.mxu1 %v724_v19  ;;  %v2797_v29 = vld [vmem:[%s3587_s26] ss:$0 sm:$0xff]  ;;  %s3135_s26 = smov 40   ;;  %p2836_p5 = scmp.eq.s32.totalorder %s3227_s19, 1 }
  0x25   : > { %2918 = vmatprep.subr.mxu1 %v3124_v36 }
  0x28   : > { %685 = vadd.xlane.f32.xlu0 %v684_v5 }
  0xad   : > { %v683_v6 = vpop.xlane.xlu0 %682 }
  0xae   : > { %v688_v7 = vmul.f32 0.03125, %v683_v6 }
  0xb0   : > { %v690_v8 = vsub.f32 %v3302_v2, %v688_v7 }
  0xb1   : > { %v686_v9 = vpop.xlane.xlu0 %685 }
  0xb2   : > { %v689_v10 = vmul.f32 0.03125, %v686_v9  ;;  %v692_v11 = vmul.f32 %v690_v8, %v690_v8 }
  0xb4   : > { %v691_v12 = vsub.f32 %v3304_v3, %v689_v10  ;;  %v694_v13 = vsel %vm680_vm1, %v692_v11, 0.0 }
  0xb5   : > { %695 = vadd.xlane.f32.xlu1 %v694_v13 }
  0xb6   : > { %v693_v14 = vmul.f32 %v691_v12, %v691_v12 }
  0xb8   : > { %v697_v15 = vsel %vm680_vm1, %v693_v14, 0.0 }
  0xb9   : > { %698 = vadd.xlane.f32.xlu1 %v697_v15 }
 0x13e   : > { %v696_v20 = vpop.xlane.xlu1 %695 }
 0x13f   : > { %v700_v21 = vmul.f32 0.03125, %v696_v20 }
 0x141   : > { %v702_v22 = vadd.f32 1e-05, %v700_v21 }
 0x142   : > { %v699_v23 = vpop.xlane.xlu1 %698 }
 0x143   : > { %3064 = vrsqrt.f32 %v702_v22  ;;  %v701_v24 = vmul.f32 0.03125, %v699_v23 }
 0x145   : > { %v703_v25 = vadd.f32 1e-05, %v701_v24 }
 0x147   : > { %3066 = vrsqrt.f32 %v703_v25 }
 0x150   : > { %v3065_v26 = vpop.eup %3064 }
 0x151   : > { %v706_v28 = vmul.f32 %v3065_v26, %v690_v8 }
 0x153   : > { %v714_v30 = vmul.f32 %v2796_v27, %v706_v28 }
 0x154   : > { %v3067_v31 = vpop.eup %3066 }
 0x155   : > { %v707_v32 = vmul.f32 %v3067_v31, %v691_v12  ;;  %v722_v33 = vadd.f32 %v2797_v29, %v714_v30 }
 0x157   : > { %v715_v34 = vmul.f32 %v2796_v27, %v707_v32  ;;  %2915 = vmatprep.mubr.msk.f32.mxu1 %vm680_vm1, %v722_v33 }
 0x159   : > { %v723_v35 = vadd.f32 %v2797_v29, %v715_v34 }
 0x15b   : > { %2916 = vmatmul.mubr.msk.f32.vlgmr.msra.gmra.mxu1 %vm680_vm1, %v723_v35 }
 0x15c   : > { %2920 = vmatprep.mubr.msk.f32.mxu1 %vm3125_vm2, %v3124_v36 }
 0x21b   : > { %v2917_v37 = vpop.f32.mrf.mxu1 }
 0x21c   : > { %v3347_v42 = vadd.f32 %v2917_v37, %v2798_v38 }
 0x21d   : > { %v807_v39 = vpop.f32.mrf.mxu1 }
 0x21e   : > { %v3341_v40 = vadd.f32 %v2798_v38, %v807_v39  ;;  %v817_v43 = vmul.f32 0.35355338, %v3347_v42 }
 0x220   : > { %987 = vrot.lane.b32.xlu1 %v3341_v40, %s3126_s17  ;;  %819 = vrot.lane.b32.xlu0 %v3341_v40, %s3127_s14  ;;  %v816_v41 = vmul.f32 0.35355338, %v3341_v40 }
 0x224   : > { %1156 = vrot.lane.b32.xlu0 %v816_v41, %s3128_s18  ;;  %985 = vrot.lane.b32.xlu1 %v816_v41, %s3129_s2 }
 0x228   : > { %1327 = vrot.lane.b32.xlu0 %v816_v41, %s3130_s30  ;;  %1158 = vrot.lane.b32.xlu1 %v3341_v40, %s3131_s22 }
 0x22c   : > { %1666 = vrot.lane.b32.xlu0 %v3347_v42, %s3126_s17  ;;  %1329 = vrot.lane.b32.xlu1 %v3341_v40, %s3132_s13  ;;  %s3138_s17 = smov 16  }
 0x230   : > { %1836 = vrot.lane.b32.xlu0 %v3347_v42, %s3131_s22  ;;  %1499 = vrot.lane.b32.xlu1 %v3347_v42, %s3127_s14  ;;  %s3139_s14 = smov 24  }
 0x234   : > { %2006 = vrot.lane.b32.xlu0 %v3347_v42, %s3132_s13  ;;  %1664 = vrot.lane.b32.xlu1 %v817_v43, %s3129_s2 }
 0x238   : > { %1834 = vrot.lane.b32.xlu1 %v817_v43, %s3128_s18 }
 0x23c   : > { %2004 = vrot.lane.b32.xlu1 %v817_v43, %s3130_s30  ;;  %s3590_s30 = scalar_lea.vmem %s3563_s6, %s3233_s20 }
 0x292   : > { %v988_v44 = vpop.permute.xlu1 %987  ;;  %v820_v45 = vpop.permute.xlu0 %819 }
 0x293   : > { %2919 = vmatpush3.xpose.msk.msra.mxu1 %vm821_vm3, %v820_v45  ;;  %2929 = vmatpush3.xpose.msk.msra.mxu0 %vm821_vm3, %v988_v44 }
 0x294   : > { %2938 = vmatprep.subr.mxu0 %v3124_v36  ;;  %2923 = vmatprep.subr.mxu1 %v3124_v36 }
 0x296   : > { %v1157_v46 = vpop.permute.xlu0 %1156  ;;  %v986_v47 = vpop.permute.xlu1 %985  ;;  %2921 = vmatmul.mubr.msk.f32.vlgmr.msra.gmra.mxu1 %vm821_vm3, %v816_v41 }
 0x297   : > { %2931 = vmatmul.mubr.msk.f32.vlgmr.msra.gmra.mxu0 %vm821_vm3, %v986_v47  ;;  %2925 = vmatprep.mubr.msk.f32.mxu1 %vm3125_vm2, %v3124_v36 }
 0x298   : > { %2940 = vmatprep.mubr.msk.f32.mxu0 %vm3125_vm2, %v3124_v36 }
 0x29a   : > { %v1159_v48 = vpop.permute.xlu1 %1158  ;;  %v1328_v49 = vpop.permute.xlu0 %1327 }
 0x29b   : > { %2939 = vmatpush3.xpose.msk.msra.mxu0 %vm821_vm3, %v1159_v48 }
 0x29c   : > { %2948 = vmatprep.subr.mxu0 %v3124_v36 }
 0x29e   : > { %2941 = vmatmul.mubr.msk.f32.vlgmr.msra.gmra.mxu0 %vm821_vm3, %v1157_v46  ;;  %v1330_v50 = vpop.permute.xlu1 %1329  ;;  %v1667_v51 = vpop.permute.xlu0 %1666 }
 0x29f   : > { %2949 = vmatpush3.xpose.msk.msra.mxu0 %vm821_vm3, %v1330_v50  ;;  %2950 = vmatprep.mubr.msk.f32.mxu0 %vm3125_vm2, %v3124_v36 }
 0x2a0   : > { %2958 = vmatprep.subr.mxu0 %v3124_v36 }
 0x2a2   : > { %2951 = vmatmul.mubr.msk.f32.vlgmr.msra.gmra.mxu0 %vm821_vm3, %v1328_v49  ;;  %v1500_v52 = vpop.permute.xlu1 %1499  ;;  %v1837_v54 = vpop.permute.xlu0 %1836 }
 0x2a3   : > { %2959 = vmatpush3.xpose.msk.msra.mxu0 %vm821_vm3, %v1500_v52  ;;  %2960 = vmatprep.mubr.msk.f32.mxu0 %vm3125_vm2, %v3124_v36 }
 0x2a4   : > { %2968 = vmatprep.subr.mxu0 %v3124_v36 }
 0x2a6   : > { %2961 = vmatmul.mubr.msk.f32.vlgmr.msra.gmra.mxu0 %vm821_vm3, %v817_v43  ;;  %v1665_v53 = vpop.permute.xlu1 %1664  ;;  %v2007_v56 = vpop.permute.xlu0 %2006 }
 0x2a7   : > { %2969 = vmatpush3.xpose.msk.msra.mxu0 %vm821_vm3, %v1667_v51  ;;  %2970 = vmatprep.mubr.msk.f32.mxu0 %vm3125_vm2, %v3124_v36 }
 0x2a8   : > { %2978 = vmatprep.subr.mxu0 %v3124_v36 }
 0x2aa   : > { %2971 = vmatmul.mubr.msk.f32.vlgmr.msra.gmra.mxu0 %vm821_vm3, %v1665_v53  ;;  %v1835_v55 = vpop.permute.xlu1 %1834 }
 0x2ab   : > { %2979 = vmatpush3.xpose.msk.msra.mxu0 %vm821_vm3, %v1837_v54  ;;  %2980 = vmatprep.mubr.msk.f32.mxu0 %vm3125_vm2, %v3124_v36 }
 0x2ac   : > { %2988 = vmatprep.subr.mxu0 %v3124_v36 }
 0x2ae   : > { %2981 = vmatmul.mubr.msk.f32.vlgmr.msra.gmra.mxu0 %vm821_vm3, %v1835_v55  ;;  %v2005_v57 = vpop.permute.xlu1 %2004 }
 0x2af   : > { %2989 = vmatpush3.xpose.msk.msra.mxu0 %vm821_vm3, %v2007_v56  ;;  %2990 = vmatprep.mubr.msk.f32.mxu0 %vm3125_vm2, %v3124_v36 }
 0x2b2   : > { %2991 = vmatmul.mubr.msk.f32.vlgmr.msra.gmra.mxu0 %vm821_vm3, %v2005_v57 }
 0x356   : > { %v893_v58 = vpop.f32.mrf.mxu1 }
 0x357   : > { %v1059_v59 = vpop.f32.mrf.mxu0  ;;  %v897_v60 = vsel %vm821_vm3, %v893_v58, -inf }
 0x358   : > { %898 = vmax.xlane.f32.xlu0 %v897_v60  ;;  %v2922_v61 = vpop.f32.mrf.mxu1  ;;  %v1063_v62 = vsel %vm821_vm3, %v1059_v59, -inf }
 0x359   : > { %1064 = vmax.xlane.f32.xlu1 %v1063_v62  ;;  %v2932_v63 = vpop.f32.mrf.mxu0 }
 0x35e   : > { %v1230_v0 = vpop.f32.mrf.mxu0 }
 0x35f   : > { %v1234_v1 = vsel %vm821_vm3, %v1230_v0, -inf }
 0x360   : > { %v2942_v4 = vpop.f32.mrf.mxu0  ;;  %1235 = vmax.xlane.f32.xlu0 %v1234_v1 }
 0x362   : > { %v1401_v5 = vpop.f32.mrf.mxu0 }
 0x363   : > { %v1405_v6 = vsel %vm821_vm3, %v1401_v5, -inf }
 0x364   : > { %v2952_v7 = vpop.f32.mrf.mxu0  ;;  %1406 = vmax.xlane.f32.xlu0 %v1405_v6 }
 0x366   : > { %v1572_v8 = vpop.f32.mrf.mxu0 }
 0x367   : > { %v1576_v9 = vsel %vm821_vm3, %v1572_v8, -inf }
 0x368   : > { %v2962_v10 = vpop.f32.mrf.mxu0  ;;  %1577 = vmax.xlane.f32.xlu0 %v1576_v9 }
 0x36a   : > { %v1738_v11 = vpop.f32.mrf.mxu0 }
 0x36b   : > { %v1742_v12 = vsel %vm821_vm3, %v1738_v11, -inf }
 0x36c   : > { %1743 = vmax.xlane.f32.xlu1 %v1742_v12  ;;  %v2972_v13 = vpop.f32.mrf.mxu0 }
 0x36e   : > { %v1908_v14 = vpop.f32.mrf.mxu0 }
 0x36f   : > { %v1912_v15 = vsel %vm821_vm3, %v1908_v14, -inf }
 0x370   : > { %v2982_v16 = vpop.f32.mrf.mxu0  ;;  %1913 = vmax.xlane.f32.xlu0 %v1912_v15 }
 0x372   : > { %v2078_v17 = vpop.f32.mrf.mxu0 }
 0x373   : > { %v2082_v19 = vsel %vm821_vm3, %v2078_v17, -inf }
 0x374   : > { %v2992_v18 = vpop.f32.mrf.mxu0 }
 0x37d   : > { %908 = vrot.lane.b32.xlu1 %v3341_v40, %s3133_s23 }
 0x3a1   : > { %2083 = vmax.xlane.f32.xlu1 %v2082_v19 }
 0x3b2   : > { %1245 = vrot.lane.b32.xlu1 %v3341_v40, %s3134_s21 }
 0x3b6   : > { %1416 = vrot.lane.b32.xlu1 %v3341_v40, %s3135_s26 }
 0x3ba   : > { %1587 = vrot.lane.b32.xlu1 %v3347_v42, %s3133_s23  ;;  %s3591_s23 = scalar_lea.vmem %s3564_s7, %s3233_s20 }
 0x3e1   : > { %v899_v20 = vpop.xlane.xlu0 %898 }
 0x3e2   : > { %v900_v21 = vsub.f32 %v893_v58, %v899_v20  ;;  %v1065_v22 = vpop.xlane.xlu1 %1064 }
 0x3e3   : > { %v1066_v23 = vsub.f32 %v1059_v59, %v1065_v22 }
 0x3e4   : > { %v901_v24 = vmul.f32 1.442695, %v900_v21 }
 0x3e5   : > { %v1067_v25 = vmul.f32 1.442695, %v1066_v23 }
 0x3e6   : > { %3068 = vpow2.f32 %v901_v24 }
 0x3e7   : > { %3070 = vpow2.f32 %v1067_v25 }
 0x3e9   : > { %v1236_v26 = vpop.xlane.xlu0 %1235 }
 0x3ea   : > { %v1237_v39 = vsub.f32 %v1230_v0, %v1236_v26 }
 0x3ec   : > { %v1238_v43 = vmul.f32 1.442695, %v1237_v39 }
 0x3ed   : > { %v1407_v27 = vpop.xlane.xlu0 %1406 }
 0x3ee   : > { %v1408_v28 = vsub.f32 %v1401_v5, %v1407_v27 }
 0x3f0   : > { %v1409_v29 = vmul.f32 1.442695, %v1408_v28 }
 0x3f1   : > { %v1578_v41 = vpop.xlane.xlu0 %1577 }
 0x3f2   : > { %3072 = vpow2.f32 %v1409_v29  ;;  %v1579_v44 = vsub.f32 %v1572_v8, %v1578_v41  ;;  %v2179_v41 = vld [vmem:[%s3589_s29 + $0x18] sm:$0xff] }
 0x3f3   : > { %v3069_v30 = vpop.eup %3068  ;;  %3074 = vpow2.f32 %v1238_v43  ;;  %v2178_v43 = vld [vmem:[%s3589_s29 + $0x10] sm:$0xff]  ;;  %2998 = vmatprep.subr.mxu0 %v2179_v41 }
 0x3f4   : > { %v3406_v31 = vpop.eup %3070  ;;  %v903_v32 = vsel %vm821_vm3, %v3069_v30, 0.0  ;;  %v1580_v46 = vmul.f32 1.442695, %v1579_v44  ;;  %2999 = vmatpush3.msra.mxu0 %v2179_v41  ;;  %v2461_v41 = vld [vmem:[%s3283_s24 + $0x8] sm:$0xff] }
 0x3f5   : > { %v1744_v33 = vpop.xlane.xlu1 %1743  ;;  %904 = vadd.xlane.f32.xlu0 %v903_v32  ;;  %v1069_v34 = vsel %vm821_vm3, %v3406_v31, 0.0  ;;  %3000 = vmatprep.subr.mxu0 %v2178_v43 }
 0x3f6   : > { %1070 = vadd.xlane.f32.xlu1 %v1069_v34  ;;  %3076 = vpow2.f32 %v1580_v46  ;;  %v1745_v48 = vsub.f32 %v1738_v11, %v1744_v33  ;;  %3001 = vmatpush3.msra.mxu0 %v2178_v43  ;;  %v2460_v43 = vld [vmem:[%s3283_s24] sm:$0xff] }
 0x3f8   : > { %v1746_v50 = vmul.f32 1.442695, %v1745_v48 }
 0x3f9   : > { %v909_v35 = vpop.permute.xlu1 %908  ;;  %v1914_v45 = vpop.xlane.xlu0 %1913 }
 0x3fa   : > { %2924 = vmatpush3.msra.mxu1 %v909_v35  ;;  %v1915_v47 = vsub.f32 %v1908_v14, %v1914_v45  ;;  %v2177_v45 = vld [vmem:[%s3589_s29 + $0x8] sm:$0xff] }
 0x3fb   : > { %2933 = vmatprep.subr.mxu1 %v3124_v36  ;;  %3002 = vmatprep.subr.mxu0 %v2177_v45 }
 0x3fc   : > { %v1916_v49 = vmul.f32 1.442695, %v1915_v47  ;;  %v2176_v47 = vld [vmem:[%s3589_s29] sm:$0xff]  ;;  %3003 = vmatpush3.msra.mxu0 %v2177_v45 }
 0x3fd   : > { %3004 = vmatprep.subr.mxu0 %v2176_v47 }
 0x3fe   : > { %3078 = vpow2.f32 %v1916_v49  ;;  %3005 = vmatpush3.msra.mxu0 %v2176_v47 }
 0x3ff   : > { %v3412_v37 = vpop.eup %3072  ;;  %3080 = vpow2.f32 %v1746_v50 }
 0x400   : > { %v1411_v38 = vsel %vm821_vm3, %v3412_v37, 0.0  ;;  %v3075_v51 = vpop.eup %3074 }
 0x401   : > { %1412 = vadd.xlane.f32.xlu1 %v1411_v38  ;;  %v1240_v52 = vsel %vm821_vm3, %v3075_v51, 0.0 }
 0x40b   : > { %1074 = vrot.lane.b32.xlu0 %v3341_v40, %s3136_s25  ;;  %v3419_v40 = vpop.eup %3076 }
 0x40c   : > { %v1582_v56 = vsel %vm821_vm3, %v3419_v40, 0.0  ;;  %v3423_v57 = vpop.eup %3078 }
 0x40d   : > { %v1918_v58 = vsel %vm821_vm3, %v3423_v57, 0.0  ;;  %v3081_v59 = vpop.eup %3080 }
 0x40e   : > { %v1748_v60 = vsel %vm821_vm3, %v3081_v59, 0.0 }
 0x412   : > { %1753 = vrot.lane.b32.xlu1 %v3347_v42, %s3136_s25 }
 0x42a   : > { %v2084_v53 = vpop.xlane.xlu1 %2083  ;;  %1241 = vadd.xlane.f32.xlu0 %v1240_v52 }
 0x42b   : > { %v2085_v54 = vsub.f32 %v2078_v17, %v2084_v53 }
 0x42d   : > { %v2086_v55 = vmul.f32 1.442695, %v2085_v54 }
 0x42e   : > { %1583 = vadd.xlane.f32.xlu0 %v1582_v56  ;;  %v1246_v63 = vpop.permute.xlu1 %1245 }
 0x42f   : > { %3082 = vpow2.f32 %v2086_v55 }
 0x432   : > { %1919 = vadd.xlane.f32.xlu0 %v1918_v58  ;;  %v1417_v0 = vpop.permute.xlu1 %1416 }
 0x436   : > { %1749 = vadd.xlane.f32.xlu1 %v1748_v60  ;;  %v1588_v1 = vpop.permute.xlu1 %1587  ;;  %v2825_v60 = vld [vmem:[%s3590_s30] ss:$0 sm:$0xff] }
 0x43c   : > { %v3428_v61 = vpop.eup %3082 }
 0x43d   : > { %v2088_v62 = vsel %vm821_vm3, %v3428_v61, 0.0 }
 0x43e   : > { %2089 = vadd.xlane.f32.xlu0 %v2088_v62 }
 0x447   : > { %2093 = vrot.lane.b32.xlu1 %v3347_v42, %s3135_s26  ;;  %s3592_s26 = scalar_lea.vmem %s3565_s8, %s3233_s20 }
 0x454   : > { %1923 = vrot.lane.b32.xlu0 %v3347_v42, %s3134_s21 }
 0x47e   : > { %v905_v4 = vpop.xlane.xlu0 %904 }
 0x47f   : > { %3084 = vrcp.f32 %v905_v4  ;;  %v1071_v5 = vpop.xlane.xlu1 %1070 }
 0x480   : > { %3086 = vrcp.f32 %v1071_v5 }
 0x482   : > { %v1075_v9 = vpop.permute.xlu0 %1074 }
 0x48a   : > { %v1413_v10 = vpop.xlane.xlu1 %1412 }
 0x48c   : > { %v3085_v6 = vpop.eup %3084 }
 0x48d   : > { %v907_v7 = vmul.f32 %v3085_v6, %v3069_v30  ;;  %v3087_v8 = vpop.eup %3086 }
 0x48e   : > { %v1073_v42 = vmul.f32 %v3087_v8, %v3406_v31  ;;  %v1754_v13 = vpop.permute.xlu1 %1753 }
 0x48f   : > { %2926 = vmatmul.mubr.msk.f32.vlgmr.msra.gmra.mxu1 %vm821_vm3, %v907_v7 }
 0x490   : > { %2934 = vmatpush3.msra.mxu1 %v1075_v9  ;;  %2935 = vmatprep.mubr.msk.f32.mxu1 %vm3125_vm2, %v3124_v36 }
 0x491   : > { %2943 = vmatprep.subr.mxu1 %v3124_v36 }
 0x493   : > { %2936 = vmatmul.mubr.msk.f32.vlgmr.msra.gmra.mxu1 %vm821_vm3, %v1073_v42 }
 0x494   : > { %2944 = vmatpush3.msra.mxu1 %v1246_v63  ;;  %2945 = vmatprep.mubr.msk.f32.mxu1 %vm3125_vm2, %v3124_v36 }
 0x495   : > { %2953 = vmatprep.subr.mxu1 %v3124_v36 }
 0x4b3   : > { %v1242_v11 = vpop.xlane.xlu0 %1241 }
 0x4b4   : > { %3088 = vrcp.f32 %v1242_v11 }
 0x4b5   : > { %3090 = vrcp.f32 %v1413_v10 }
 0x4b7   : > { %v1584_v12 = vpop.xlane.xlu0 %1583 }
 0x4b8   : > { %3092 = vrcp.f32 %v1584_v12 }
 0x4bb   : > { %v1920_v14 = vpop.xlane.xlu0 %1919 }
 0x4bf   : > { %v1750_v15 = vpop.xlane.xlu1 %1749 }
 0x4c0   : > { %3094 = vrcp.f32 %v1750_v15  ;;  %v2316_v15 = vld [vmem:[%s3273_s3 + $0x10] sm:$0xff] }
 0x4c1   : > { %v3089_v16 = vpop.eup %3088  ;;  %3096 = vrcp.f32 %v1920_v14  ;;  %v2317_v14 = vld [vmem:[%s3273_s3 + $0x18] sm:$0xff] }
 0x4c2   : > { %v1244_v17 = vmul.f32 %v3089_v16, %v3075_v51  ;;  %v3091_v18 = vpop.eup %3090  ;;  %v2315_v16 = vld [vmem:[%s3273_s3 + $0x8] sm:$0xff] }
 0x4c3   : > { %v1415_v19 = vmul.f32 %v3091_v18, %v3412_v37  ;;  %v2094_v28 = vpop.permute.xlu1 %2093 }
 0x4c4   : > { %2946 = vmatmul.mubr.msk.f32.vlgmr.msra.gmra.mxu1 %vm821_vm3, %v1244_v17  ;;  %v2314_v17 = vld [vmem:[%s3273_s3] sm:$0xff] }
 0x4c5   : > { %2954 = vmatpush3.msra.mxu1 %v1417_v0  ;;  %2955 = vmatprep.mubr.msk.f32.mxu1 %vm3125_vm2, %v3124_v36  ;;  %v3093_v20 = vpop.eup %3092 }
 0x4c6   : > { %2963 = vmatprep.subr.mxu1 %v3124_v36  ;;  %v1586_v22 = vmul.f32 %v3093_v20, %v3419_v40 }
 0x4c7   : > { %v2090_v21 = vpop.xlane.xlu0 %2089 }
 0x4c8   : > { %3098 = vrcp.f32 %v2090_v21  ;;  %2956 = vmatmul.mubr.msk.f32.vlgmr.msra.gmra.mxu1 %vm821_vm3, %v1415_v19 }
 0x4c9   : > { %2964 = vmatpush3.msra.mxu1 %v1588_v1  ;;  %2965 = vmatprep.mubr.msk.f32.mxu1 %vm3125_vm2, %v3124_v36 }
 0x4ca   : > { %2973 = vmatprep.subr.mxu1 %v3124_v36 }
 0x4cb   : > { %v1924_v26 = vpop.permute.xlu0 %1923 }
 0x4cc   : > { %2966 = vmatmul.mubr.msk.f32.vlgmr.msra.gmra.mxu1 %vm821_vm3, %v1586_v22 }
 0x4cd   : > { %v3095_v23 = vpop.eup %3094  ;;  %2974 = vmatpush3.msra.mxu1 %v1754_v13  ;;  %2975 = vmatprep.mubr.msk.f32.mxu1 %vm3125_vm2, %v3124_v36 }
 0x4ce   : > { %2983 = vmatprep.subr.mxu1 %v3124_v36  ;;  %v1752_v24 = vmul.f32 %v3095_v23, %v3081_v59  ;;  %v3097_v25 = vpop.eup %3096 }
 0x4cf   : > { %v1922_v27 = vmul.f32 %v3097_v25, %v3423_v57  ;;  %v2828_v25 = vld [vmem:[%s3591_s23] ss:$0 sm:$0xff] }
 0x4d0   : > { %2976 = vmatmul.mubr.msk.f32.vlgmr.msra.gmra.mxu1 %vm821_vm3, %v1752_v24 }
 0x4d1   : > { %2984 = vmatpush3.msra.mxu1 %v1924_v26  ;;  %2985 = vmatprep.mubr.msk.f32.mxu1 %vm3125_vm2, %v3124_v36 }
 0x4d2   : > { %2993 = vmatprep.subr.mxu1 %v3124_v36 }
 0x4d4   : > { %2986 = vmatmul.mubr.msk.f32.vlgmr.msra.gmra.mxu1 %vm821_vm3, %v1922_v27  ;;  %v2829_v27 = vld [vmem:[%s3592_s26] ss:$0 sm:$0xff] }
 0x4d5   : > { %v3099_v29 = vpop.eup %3098  ;;  %2994 = vmatpush3.msra.mxu1 %v2094_v28  ;;  %2995 = vmatprep.mubr.msk.f32.mxu1 %vm3125_vm2, %v3124_v36 }
 0x4d6   : > { %v2092_v30 = vmul.f32 %v3099_v29, %v3428_v61  ;;  %3009 = vmatprep.subr.mxu1 %v2317_v14 }
 0x4d8   : > { %2996 = vmatmul.mubr.msk.f32.vlgmr.msra.gmra.mxu1 %vm821_vm3, %v2092_v30 }
 0x4d9   : > { %3010 = vmatpush3.msra.mxu1 %v2317_v14 }
 0x4da   : > { %3011 = vmatprep.subr.mxu1 %v2316_v15 }
 0x4db   : > { %3012 = vmatpush3.msra.mxu1 %v2316_v15 }
 0x4dc   : > { %3013 = vmatprep.subr.mxu1 %v2315_v16 }
 0x4dd   : > { %3014 = vmatpush3.msra.mxu1 %v2315_v16 }
 0x4de   : > { %3015 = vmatprep.subr.mxu1 %v2314_v17 }
 0x4df   : > { %3016 = vmatpush3.msra.mxu1 %v2314_v17 }
 0x54f   : > { %v980_v31 = vpop.f32.mrf.mxu1 }
 0x550   : > { %984 = vst.msk [vmem:[#allocation3] sm:$0xff] %vm821_vm3, %v980_v31 }
 0x551   : > { %v2927_v32 = vpop.f32.mrf.mxu1 }
 0x553   : > { %v1146_v33 = vpop.f32.mrf.mxu1 }
 0x554   : > { %1151 = vrot.lane.b32.xlu0 %v1146_v33, %s3137_s16 }
 0x555   : > { %v2937_v34 = vpop.f32.mrf.mxu1 }
 0x556   : > { %v2467_v34 = vld [vmem:[%s3283_s24 + $0x38] sm:$0xff] }
 0x557   : > { %3020 = vmatprep.subr.mxu0 %v2467_v34 }
 0x584   : > { %v1317_v35 = vpop.f32.mrf.mxu1 }
 0x585   : > { %1322 = vrot.lane.b32.xlu1 %v1317_v35, %s3138_s17  ;;  %v2466_v35 = vld [vmem:[%s3283_s24 + $0x30] sm:$0xff] }
 0x586   : > { %v2947_v37 = vpop.f32.mrf.mxu1 }
 0x587   : > { %v2465_v37 = vld [vmem:[%s3283_s24 + $0x28] sm:$0xff] }
 0x588   : > { %v1488_v36 = vpop.f32.mrf.mxu1 }
 0x589   : > { %1493 = vrot.lane.b32.xlu1 %v1488_v36, %s3139_s14  ;;  %v2464_v36 = vld [vmem:[%s3283_s24 + $0x20] sm:$0xff] }
 0x58a   : > { %v2957_v38 = vpop.f32.mrf.mxu1 }
 0x58b   : > { %v2463_v38 = vld [vmem:[%s3283_s24 + $0x18] sm:$0xff] }
 0x58c   : > { %v1659_v39 = vpop.f32.mrf.mxu1 }
 0x58d   : > { %1663 = vst.msk [vmem:[#allocation3 + $0x8] sm:$0xff] %vm821_vm3, %v1659_v39  ;;  %v2462_v39 = vld [vmem:[%s3283_s24 + $0x10] sm:$0xff] }
 0x58e   : > { %v2967_v44 = vpop.f32.mrf.mxu1 }
 0x58f   : > { %v2830_v44 = vld [vmem:[%s653_s5] ss:$0 sm:$0xff] }
 0x590   : > { %v1825_v46 = vpop.f32.mrf.mxu1 }
 0x591   : > { %1830 = vrot.lane.b32.xlu0 %v1825_v46, %s3137_s16 }
 0x592   : > { %v2977_v48 = vpop.f32.mrf.mxu1 }
 0x594   : > { %v1995_v49 = vpop.f32.mrf.mxu1 }
 0x595   : > { %2000 = vrot.lane.b32.xlu0 %v1995_v49, %s3138_s17 }
 0x596   : > { %v2987_v50 = vpop.f32.mrf.mxu1 }
 0x598   : > { %v2165_v51 = vpop.f32.mrf.mxu1 }
 0x599   : > { %2170 = vrot.lane.b32.xlu1 %v2165_v51, %s3139_s14 }
 0x59a   : > { %v2997_v52 = vpop.f32.mrf.mxu1 }
 0x5c6   : > { %v1152_v40 = vpop.permute.xlu0 %1151 }
 0x5c7   : > { %1155 = vst.msk [vmem:[#allocation3] sm:$0xff] %vm1154_vm4, %v1152_v40 }
 0x5f7   : > { %v1323_v53 = vpop.permute.xlu1 %1322 }
 0x5f8   : > { %1326 = vst.msk [vmem:[#allocation3] sm:$0xff] %vm1325_vm5, %v1323_v53 }
 0x5fb   : > { %v1494_v54 = vpop.permute.xlu1 %1493 }
 0x5fc   : > { %1497 = vst.msk [vmem:[#allocation3] sm:$0xff] %vm1496_vm6, %v1494_v54 }
 0x603   : > { %v1831_v55 = vpop.permute.xlu0 %1830  ;;  %v2174_v56 = vld [vmem:[#allocation3] sm:$0xff] }
 0x604   : > { %1833 = vst.msk [vmem:[#allocation3 + $0x8] sm:$0xff] %vm1154_vm4, %v1831_v55  ;;  %3006 = vmatprep.mubr.msk.f32.mxu0 %vm680_vm1, %v2174_v56 }
 0x607   : > { %v2001_v57 = vpop.permute.xlu0 %2000 }
 0x608   : > { %2003 = vst.msk [vmem:[#allocation3 + $0x8] sm:$0xff] %vm1325_vm5, %v2001_v57 }
 0x60b   : > { %v2171_v58 = vpop.permute.xlu1 %2170 }
 0x60c   : > { %2173 = vst.msk [vmem:[#allocation3 + $0x8] sm:$0xff] %vm1496_vm6, %v2171_v58 }
 0x613   : > { %v2175_v59 = vld [vmem:[#allocation3 + $0x8] sm:$0xff] }
 0x614   : > { %3007 = vmatmul.mubr.msk.f32.vlgmr.msra.gmra.mxu0 %vm680_vm1, %v2175_v59 }
 0x615   : > { %3021 = vmatpush3.msra.mxu0 %v2467_v34 }
 0x616   : > { %3022 = vmatprep.subr.mxu0 %v2466_v35 }
 0x617   : > { %3023 = vmatpush3.msra.mxu0 %v2466_v35 }
 0x618   : > { %3024 = vmatprep.subr.mxu0 %v2465_v37 }
 0x619   : > { %3025 = vmatpush3.msra.mxu0 %v2465_v37  ;;  %v2833_v37 = vld [vmem:[%s661_s28] ss:$0 sm:$0xff] }
 0x61a   : > { %3026 = vmatprep.subr.mxu0 %v2464_v36 }
 0x61b   : > { %3027 = vmatpush3.msra.mxu0 %v2464_v36 }
 0x61c   : > { %3028 = vmatprep.subr.mxu0 %v2463_v38 }
 0x61d   : > { %3029 = vmatpush3.msra.mxu0 %v2463_v38 }
 0x61e   : > { %3030 = vmatprep.subr.mxu0 %v2462_v39 }
 0x61f   : > { %3031 = vmatpush3.msra.mxu0 %v2462_v39 }
 0x620   : > { %3032 = vmatprep.subr.mxu0 %v2461_v41 }
 0x621   : > { %3033 = vmatpush3.msra.mxu0 %v2461_v41 }
 0x622   : > { %3034 = vmatprep.subr.mxu0 %v2460_v43 }
 0x623   : > { %3035 = vmatpush3.msra.mxu0 %v2460_v43 }
 0x6d4   : > { %v3008_v61 = vpop.f32.mrf.mxu0 }
 0x6d5   : > { %v2265_v62 = vadd.f32 %v3008_v61, %v2825_v60 }
 0x6d6   : > { %v2259_v63 = vpop.f32.mrf.mxu0 }
 0x6d7   : > { %v3483_v0 = vadd.f32 %v2265_v62, %v3304_v3  ;;  %v2260_v1 = vadd.f32 %v2825_v60, %v2259_v63 }
 0x6d9   : > { %v3486_v4 = vadd.f32 %v2260_v1, %v3302_v2  ;;  %v2275_v5 = vsel %vm680_vm1, %v3483_v0, 0.0 }
 0x6da   : > { %2276 = vadd.xlane.f32.xlu1 %v2275_v5 }
 0x6db   : > { %v2272_v6 = vsel %vm680_vm1, %v3486_v4, 0.0 }
 0x6dc   : > { %2273 = vadd.xlane.f32.xlu0 %v2272_v6 }
 0x763   : > { %v2277_v7 = vpop.xlane.xlu1 %2276 }
 0x764   : > { %v2279_v8 = vmul.f32 0.03125, %v2277_v7 }
 0x765   : > { %v2274_v9 = vpop.xlane.xlu0 %2273 }
 0x766   : > { %v2278_v3 = vmul.f32 0.03125, %v2274_v9  ;;  %v2281_v42 = vsub.f32 %v3483_v0, %v2279_v8 }
 0x768   : > { %v2280_v2 = vsub.f32 %v3486_v4, %v2278_v3  ;;  %v2283_v12 = vmul.f32 %v2281_v42, %v2281_v42 }
 0x76a   : > { %v2282_v10 = vmul.f32 %v2280_v2, %v2280_v2  ;;  %v2287_v13 = vsel %vm680_vm1, %v2283_v12, 0.0 }
 0x76c   : > { %v2284_v11 = vsel %vm680_vm1, %v2282_v10, 0.0 }
 0x76d   : > { %2285 = vadd.xlane.f32.xlu0 %v2284_v11 }
 0x771   : > { %2288 = vadd.xlane.f32.xlu0 %v2287_v13 }
 0x7f6   : > { %v2286_v18 = vpop.xlane.xlu0 %2285 }
 0x7f7   : > { %v2290_v19 = vmul.f32 0.03125, %v2286_v18 }
 0x7f9   : > { %v2292_v20 = vadd.f32 1e-05, %v2290_v19 }
 0x7fa   : > { %v2289_v21 = vpop.xlane.xlu0 %2288 }
 0x7fb   : > { %3100 = vrsqrt.f32 %v2292_v20  ;;  %v2291_v22 = vmul.f32 0.03125, %v2289_v21 }
 0x7fd   : > { %v2293_v23 = vadd.f32 1e-05, %v2291_v22 }
 0x7ff   : > { %3102 = vrsqrt.f32 %v2293_v23  ;;  %v3140_v23 = vmov 1.0  }
 0x808   : > { %v3101_v24 = vpop.eup %3100 }
 0x809   : > { %v2296_v26 = vmul.f32 %v3101_v24, %v2280_v2 }
 0x80b   : > { %v2304_v28 = vmul.f32 %v2828_v25, %v2296_v26 }
 0x80c   : > { %v3103_v29 = vpop.eup %3102 }
 0x80d   : > { %v2297_v30 = vmul.f32 %v3103_v29, %v2281_v42  ;;  %v2312_v31 = vadd.f32 %v2829_v27, %v2304_v28 }
 0x80f   : > { %v2305_v32 = vmul.f32 %v2828_v25, %v2297_v30  ;;  %3017 = vmatprep.mubr.msk.f32.mxu1 %vm680_vm1, %v2312_v31 }
 0x811   : > { %v2313_v33 = vadd.f32 %v2829_v27, %v2305_v32 }
 0x813   : > { %3018 = vmatmul.mubr.msk.f32.vlgmr.msra.gmra.mxu1 %vm680_vm1, %v2313_v33 }
 0x8d3   : > { %v3019_v45 = vpop.f32.mrf.mxu1 }
 0x8d4   : > { %v2403_v46 = vadd.f32 %v3019_v45, %v2830_v44 }
 0x8d5   : > { %v2397_v47 = vpop.f32.mrf.mxu1 }
 0x8d6   : > { %v2409_v48 = vmul.f32 0.70710677, %v2403_v46  ;;  %v2398_v49 = vadd.f32 %v2830_v44, %v2397_v47  ;;  %v2407_v33 = vmul.f32 0.5, %v2403_v46 }
 0x8d8   : > { %v2415_v50 = vand.u32 2147483647, %v2409_v48  ;;  %v2408_v51 = vmul.f32 0.70710677, %v2398_v49  ;;  %vm2411_vm7 = vcmp.lt.f32.partialorder %v2409_v48, 0.0  ;;  %v2406_v31 = vmul.f32 0.5, %v2398_v49 }
 0x8d9   : > { %v2413_v24 = vsel %vm2411_vm7, -1.0, %v3140_v23 }
 0x8da   : > { %v2417_v52 = vmul.f32 0.3275911, %v2415_v50  ;;  %v2414_v40 = vand.u32 2147483647, %v2408_v51  ;;  %v2443_v56 = vsub.f32 0.0, %v2415_v50  ;;  %vm2410_vm8 = vcmp.lt.f32.partialorder %v2408_v51, 0.0 }
 0x8db   : > { %v2412_v28 = vsel %vm2410_vm8, -1.0, %v3140_v23 }
 0x8dc   : > { %v2419_v53 = vadd.f32 1.0, %v2417_v52  ;;  %v2416_v54 = vmul.f32 0.3275911, %v2414_v40  ;;  %v2442_v57 = vsub.f32 0.0, %v2414_v40  ;;  %v2445_v58 = vmul.f32 %v2443_v56, %v2415_v50 }
 0x8de   : > { %3104 = vrcp.f32 %v2419_v53  ;;  %v2418_v55 = vadd.f32 1.0, %v2416_v54  ;;  %v2444_v60 = vmul.f32 %v2442_v57, %v2414_v40  ;;  %v2448_v62 = vmul.f32 1.442695, %v2445_v58 }
 0x8e0   : > { %3106 = vrcp.f32 %v2418_v55  ;;  %v2446_v6 = vmul.f32 1.442695, %v2444_v60 }
 0x8e1   : > { %3108 = vpow2.f32 %v2448_v62 }
 0x8e2   : > { %3110 = vpow2.f32 %v2446_v6 }
 0x8eb   : > { %v3105_v59 = vpop.eup %3104 }
 0x8ec   : > { %v2425_v61 = vmul.f32 1.0614054, %v3105_v59 }
 0x8ed   : > { %v3107_v63 = vpop.eup %3106 }
 0x8ee   : > { %v2427_v1 = vadd.f32 -1.4531521, %v2425_v61  ;;  %v2424_v5 = vmul.f32 1.0614054, %v3107_v63  ;;  %v3109_v17 = vpop.eup %3108 }
 0x8ef   : > { %v3111_v21 = vpop.eup %3110 }
 0x8f0   : > { %v2429_v7 = vmul.f32 %v3105_v59, %v2427_v1  ;;  %v2426_v8 = vadd.f32 -1.4531521, %v2424_v5 }
 0x8f2   : > { %v2431_v9 = vadd.f32 1.4214138, %v2429_v7  ;;  %v2428_v3 = vmul.f32 %v3107_v63, %v2426_v8 }
 0x8f4   : > { %v2433_v42 = vmul.f32 %v3105_v59, %v2431_v9  ;;  %v2430_v2 = vadd.f32 1.4214138, %v2428_v3 }
 0x8f6   : > { %v2435_v10 = vadd.f32 -0.28449672, %v2433_v42  ;;  %v2432_v11 = vmul.f32 %v3107_v63, %v2430_v2 }
 0x8f8   : > { %v2437_v12 = vmul.f32 %v3105_v59, %v2435_v10  ;;  %v2434_v13 = vadd.f32 -0.28449672, %v2432_v11 }
 0x8fa   : > { %v2439_v14 = vadd.f32 0.2548296, %v2437_v12  ;;  %v2436_v15 = vmul.f32 %v3107_v63, %v2434_v13 }
 0x8fc   : > { %v2441_v16 = vmul.f32 %v3105_v59, %v2439_v14  ;;  %v2438_v18 = vadd.f32 0.2548296, %v2436_v15 }
 0x8fe   : > { %v2451_v19 = vmul.f32 %v3109_v17, %v2441_v16  ;;  %v2440_v20 = vmul.f32 %v3107_v63, %v2438_v18 }
 0x900   : > { %v2453_v22 = vsub.f32 1.0, %v2451_v19  ;;  %v2450_v25 = vmul.f32 %v3111_v21, %v2440_v20 }
 0x902   : > { %v2455_v26 = vmul.f32 %v2453_v22, %v2413_v24  ;;  %v2452_v27 = vsub.f32 1.0, %v2450_v25 }
 0x904   : > { %v2454_v29 = vmul.f32 %v2452_v27, %v2412_v28  ;;  %v2457_v30 = vadd.f32 1.0, %v2455_v26 }
 0x906   : > { %v2456_v32 = vadd.f32 1.0, %v2454_v29  ;;  %v2459_v35 = vmul.f32 %v2457_v30, %v2407_v33 }
 0x908   : > { %v2458_v34 = vmul.f32 %v2456_v32, %v2406_v31 }
 0x90a   : > { %3036 = vmatprep.mubr.msk.f32.mxu0 %vm2475_vm9, %v2458_v34 }
 0x90b   : > { %3037 = vmatmul.mubr.msk.f32.vlgmr.msra.gmra.mxu0 %vm2475_vm9, %v2459_v35 }
 0x9cb   : > { %v3038_v36 = vpop.f32.mrf.mxu0 }
 0x9cc   : > { %v2554_v38 = vadd.f32 %v3038_v36, %v2833_v37 }
 0x9cd   : > { %v2548_v39 = vpop.f32.mrf.mxu0 }
 0x9ce   : > { %v2558_v41 = vadd.f32 %v2554_v38, %v3483_v0  ;;  %v2549_v43 = vadd.f32 %v2833_v37, %v2548_v39  ;;  %2564 = sbr.rel (%p2836_p5) target bundleno = 2516 (0x9d4), region = 88 }
 0x9d0   : > { %2560 = vst.msk [vmem:[#allocation2 + $0x8] sm:$0xff] %vm680_vm1, %v2558_v41  ;;  %v2557_v44 = vadd.f32 %v2549_v43, %v3486_v4 }
 0x9d2   : > { %2559 = vst.msk [vmem:[#allocation2] sm:$0xff] %vm680_vm1, %v2557_v44 }
 0x9d3   : > { %2565 = vst.msk [vmem:[%s3293_s27] sm:$0xff] %vm680_vm1, %v2557_v44  ;;  %2566 = vst.msk [vmem:[%s3293_s27 + $0x8] sm:$0xff] %vm680_vm1, %v2558_v41 }
 0x9d4 PF: > { %p2837_p6 = scmp.ne.s32.totalorder %s3227_s19, 1 }
 0x9d5   : > { %s3593_s28 = sld [smem:[#allocation9_spill]] (!%p2837_p6) }
 0x9d6   : > { %2570 = sbr.rel (%p2837_p6) target bundleno = 2836 (0xb14), region = 92  ;;  %s3594_s14 = sld [smem:[#allocation10_spill]] (!%p2837_p6) }
 0x9db   : > { %v2573_v0 = vsel %vm680_vm1, %v2557_v44, 0.0  ;;  %v2576_v4 = vsel %vm680_vm1, %v2558_v41, 0.0  ;;  %v2838_v61 = vld [vmem:[%s3593_s28] ss:$0 sm:$0xff] }
 0x9dc   : > { %2574 = vadd.xlane.f32.xlu0 %v2573_v0  ;;  %v2839_v63 = vld [vmem:[%s3594_s14] ss:$0 sm:$0xff] }
 0x9e0   : > { %2577 = vadd.xlane.f32.xlu0 %v2576_v4 }
 0xa65   : > { %v2575_v45 = vpop.xlane.xlu0 %2574 }
 0xa66   : > { %v2579_v46 = vmul.f32 0.03125, %v2575_v45 }
 0xa68   : > { %v2581_v47 = vsub.f32 %v2557_v44, %v2579_v46 }
 0xa69   : > { %v2578_v48 = vpop.xlane.xlu0 %2577 }
 0xa6a   : > { %v2580_v49 = vmul.f32 0.03125, %v2578_v48  ;;  %v2583_v50 = vmul.f32 %v2581_v47, %v2581_v47 }
 0xa6c   : > { %v2582_v51 = vsub.f32 %v2558_v41, %v2580_v49  ;;  %v2585_v52 = vsel %vm680_vm1, %v2583_v50, 0.0 }
 0xa6d   : > { %2586 = vadd.xlane.f32.xlu1 %v2585_v52 }
 0xa6e   : > { %v2584_v40 = vmul.f32 %v2582_v51, %v2582_v51 }
 0xa70   : > { %v2588_v53 = vsel %vm680_vm1, %v2584_v40, 0.0 }
 0xa71   : > { %2589 = vadd.xlane.f32.xlu1 %v2588_v53 }
 0xaf6   : > { %v2587_v54 = vpop.xlane.xlu1 %2586 }
 0xaf7   : > { %v2591_v55 = vmul.f32 0.03125, %v2587_v54 }
 0xaf9   : > { %v2593_v56 = vadd.f32 1e-05, %v2591_v55 }
 0xafa   : > { %v2590_v57 = vpop.xlane.xlu1 %2589 }
 0xafb   : > { %3112 = vrsqrt.f32 %v2593_v56  ;;  %v2592_v58 = vmul.f32 0.03125, %v2590_v57 }
 0xafd   : > { %v2594_v59 = vadd.f32 1e-05, %v2592_v58 }
 0xaff   : > { %3114 = vrsqrt.f32 %v2594_v59 }
 0xb08   : > { %v3113_v60 = vpop.eup %3112 }
 0xb09   : > { %v2597_v62 = vmul.f32 %v3113_v60, %v2581_v47 }
 0xb0b   : > { %v2605_v1 = vmul.f32 %v2838_v61, %v2597_v62 }
 0xb0c   : > { %v3115_v5 = vpop.eup %3114 }
 0xb0d   : > { %v2613_v6 = vadd.f32 %v2839_v63, %v2605_v1  ;;  %v2598_v7 = vmul.f32 %v3115_v5, %v2582_v51 }
 0xb0f   : > { %2615 = vst.msk [vmem:[%s3293_s27] sm:$0xff] %vm680_vm1, %v2613_v6  ;;  %v2606_v8 = vmul.f32 %v2838_v61, %v2598_v7 }
 0xb11   : > { %v2614_v9 = vadd.f32 %v2839_v63, %v2606_v8 }
 0xb13   : > { %2616 = vst.msk [vmem:[%s3293_s27 + $0x8] sm:$0xff] %vm680_vm1, %v2614_v9 }
 0xb14 PF: > { %s3595_s18 = sld [smem:[#allocation4_spill]] }
 0xb1a   : > { %s25_s18 = sadd.s32 1, %s3595_s18  }
 0xb1b   : > { %p22_p7 = scmp.ge.s32.totalorder %s25_s18, 4  }
 0xb1d   :  { %24 = sbr.rel (!%p22_p7) target bundleno = 6 (0x6), region = 155 }

</bundles_post_ra>
